<compile_context>
chip_gen: v5e
topology: v5e:2x2
jax: 0.10.0
libtpu: 0.0.40
codegen_flags: <defaults>
</compile_context>

<pallas_src>
import functools

import numpy as np
import jax
import jax.numpy as jnp
from jax import lax
from jax.experimental import pallas as pl
from jax.experimental.pallas import tpu as pltpu


# ----------------------------------------------------------------------------
# Helpers (plain JAX / numpy glue, run once at parameter-setup time)
# ----------------------------------------------------------------------------
def _round_up(x, m):
    return ((x + m - 1) // m) * m


def conv_circular_to_dense(K, H, W):
    """Dense operator of Conv2d(k=3, stride=1, padding='same', circular).

    Returns M (C_in*H*W, C_out*H*W) such that y_flat = x_flat @ M reproduces
    the PyTorch conv (cross-correlation) with circular padding, with x_flat /
    y_flat flattened in (C, H, W) row-major order (== torch.flatten(x, 1)).
    """
    K = np.asarray(K, dtype=np.float32)            # (O, C, 3, 3)
    O, C, KH, KW = K.shape
    A = np.zeros((O, H, W, C, H, W), dtype=np.float32)
    hh = np.arange(H)
    ww = np.arange(W)
    for o in range(O):
        for c in range(C):
            for kh in range(KH):
                for kw in range(KW):
                    src_h = (hh + kh - 1) % H
                    src_w = (ww + kw - 1) % W
                    A[o, hh[:, None], ww[None, :], c,
                      src_h[:, None], src_w[None, :]] += K[o, c, kh, kw]
    A = A.reshape(O * H * W, C * H * W)            # (out_feat, in_feat)
    return jnp.asarray(A.T)                        # (in_feat, out_feat) for x @ M


def conv_bias_to_dense(b, H, W):
    """Conv bias (O,) -> flattened per-(o,h,w) bias of shape (1, O*H*W)."""
    b = np.asarray(b, dtype=np.float32)
    return jnp.asarray(np.repeat(b, H * W)[None, :])


_PARAM_ORDER = ("w1", "b1", "w2", "b2", "w3", "b3", "w4", "b4")


def build_kernel_params(raw, input_shape, action_dim, n_latent_var, n_out_channels):
    """Convert torch-layout raw params into the kernel's fused, padded bf16 form."""
    C, H, W = input_shape
    feat_mid = n_out_channels * H * W
    Lpad = max(128, _round_up(n_latent_var, 128))
    Apad = max(128, _round_up(action_dim + 1, 128))
    bf = jnp.bfloat16

    # Layer 1: both heads' first circulant convs, concatenated along N (shared x).
    ca0 = conv_circular_to_dense(raw["conv_a_0_w"], H, W)     # (feat_in, feat_mid)
    cv0 = conv_circular_to_dense(raw["conv_v_0_w"], H, W)
    w1 = jnp.concatenate([ca0, cv0], axis=1).astype(bf)       # (feat_in, 2*feat_mid)
    b1 = jnp.concatenate([conv_bias_to_dense(raw["conv_a_0_b"], H, W),
                          conv_bias_to_dense(raw["conv_v_0_b"], H, W)], axis=1)

    # Layer 2: block-diagonal of the two second circulant convs -> one matmul.
    ca1 = conv_circular_to_dense(raw["conv_a_1_w"], H, W)     # (feat_mid, feat_mid)
    cv1 = conv_circular_to_dense(raw["conv_v_1_w"], H, W)
    w2 = (jnp.zeros((2 * feat_mid, 2 * feat_mid), jnp.float32)
          .at[:feat_mid, :feat_mid].set(ca1)
          .at[feat_mid:, feat_mid:].set(cv1)).astype(bf)
    b2 = jnp.concatenate([conv_bias_to_dense(raw["conv_a_1_b"], H, W),
                          conv_bias_to_dense(raw["conv_v_1_b"], H, W)], axis=1)

    # Layer 3: block-diagonal of linear_a_0 / linear_v_0, lane-padded to Lpad.
    w3 = (jnp.zeros((2 * feat_mid, 2 * Lpad), jnp.float32)
          .at[:feat_mid, :n_latent_var].set(raw["linear_a_0_w"].T)
          .at[feat_mid:, Lpad:Lpad + n_latent_var].set(raw["linear_v_0_w"].T)).astype(bf)
    b3 = (jnp.zeros((1, 2 * Lpad), jnp.float32)
          .at[0, :n_latent_var].set(raw["linear_a_0_b"])
          .at[0, Lpad:Lpad + n_latent_var].set(raw["linear_v_0_b"]))

    # Layer 4: both heads stacked along K; logits -> lanes [0, A), value -> lane A.
    w4 = (jnp.zeros((2 * Lpad, Apad), jnp.float32)
          .at[:n_latent_var, :action_dim].set(raw["linear_a_1_w"].T)
          .at[Lpad:Lpad + n_latent_var, action_dim].set(raw["linear_v_1_w"][0])).astype(bf)
    b4 = (jnp.zeros((1, Apad), jnp.float32)
          .at[0, :action_dim].set(raw["linear_a_1_b"])
          .at[0, action_dim].set(raw["linear_v_1_b"][0]))

    return {"w1": w1, "b1": b1, "w2": w2, "b2": b2,
            "w3": w3, "b3": b3, "w4": w4, "b4": b4}


# ----------------------------------------------------------------------------
# Pallas kernel: both heads, one batch tile per grid step, 4 matmuls total.
# ----------------------------------------------------------------------------
def actor_critic_kernel(
        x_ref,
        w1_ref, b1_ref, w2_ref, b2_ref, w3_ref, b3_ref, w4_ref, b4_ref,
        out_ref, *, action_dim):
    NEG = jnp.float32(-1e30)
    bf = jnp.bfloat16

    x = x_ref[...].astype(bf)                                          # (TM, feat_in)

    # L1: conv_a_0 | conv_v_0 (circulant, fused along N) + relu.
    h = jnp.maximum(jnp.dot(x, w1_ref[...], preferred_element_type=jnp.float32)
                    + b1_ref[...], 0.0).astype(bf)                     # (TM, 2*feat_mid)
    # L2: conv_a_1 / conv_v_1 as block-diagonal circulant + relu.
    h = jnp.maximum(jnp.dot(h, w2_ref[...], preferred_element_type=jnp.float32)
                    + b2_ref[...], 0.0).astype(bf)                     # (TM, 2*feat_mid)
    # L3: linear_a_0 / linear_v_0 as block-diagonal (lane-padded) + relu.
    h = jnp.maximum(jnp.dot(h, w3_ref[...], preferred_element_type=jnp.float32)
                    + b3_ref[...], 0.0).astype(bf)                     # (TM, 2*Lpad)
    # L4: both heads -> one lane-dense slab.
    z = jnp.dot(h, w4_ref[...], preferred_element_type=jnp.float32) + b4_ref[...]

    lane = lax.broadcasted_iota(jnp.int32, z.shape, 1)
    is_logit = lane < action_dim
    logits = jnp.where(is_logit, z, NEG)
    m = jnp.max(logits, axis=-1, keepdims=True)
    e = jnp.exp(logits - m)                                            # padded lanes -> 0
    probs = e * pl.reciprocal(jnp.sum(e, axis=-1, keepdims=True), approx=True)

    out_ref[...] = jnp.where(is_logit, probs,
                             jnp.where(lane == action_dim, z, 0.0))


def actor_critic_forward(state_nchw, kparams, action_dim):
    """Returns (action_probs (B, A), value (B, 1)) == (forward_a, forward_v)."""
    B, C, H, W = state_nchw.shape
    feat_in = C * H * W
    Apad = kparams["b4"].shape[1]

    x = state_nchw.reshape(B, feat_in).astype(jnp.float32)   # torch.flatten order (C,H,W)

    # Batch tiling: 128-row tiles for large batches, sublane-padded for tiny ones.
    block_b = 128 if B >= 128 else _round_up(B, 8)
    B_pad = _round_up(B, block_b)
    if B_pad != B:
        x = jnp.pad(x, ((0, B_pad - B), (0, 0)))
    nb = B_pad // block_b

    weights = [kparams[k] for k in _PARAM_ORDER]
    in_specs = [pl.BlockSpec((block_b, feat_in), lambda i: (i, 0))]
    # Constant block index -> weights stay resident in VMEM across grid steps.
    in_specs += [pl.BlockSpec(w.shape, lambda i: (0, 0)) for w in weights]

    kern = functools.partial(actor_critic_kernel, action_dim=action_dim)

    out = pl.pallas_call(
        kern,
        out_shape=jax.ShapeDtypeStruct((B_pad, Apad), jnp.float32),
        grid_spec=pltpu.PrefetchScalarGridSpec(
            num_scalar_prefetch=0,
            grid=(nb,),
            in_specs=in_specs,
            out_specs=pl.BlockSpec((block_b, Apad), lambda i: (i, 0)),
        ),
        compiler_params=pltpu.CompilerParams(
            dimension_semantics=("parallel",)),
    )(x, *weights)

    probs = out[:B, :action_dim]
    value = out[:B, action_dim:action_dim + 1]
    return probs, value


# ----------------------------------------------------------------------------
# Pure-JAX reference (roll-based circular conv) of the torch forward.
# Weight matrices are rounded to bf16 (same rounding the kernel applies) so the
# comparison isolates the kernel's math, not the storage precision.
# ----------------------------------------------------------------------------
def reference_forward(x, raw):
    q = lambda w: w.astype(jnp.bfloat16).astype(jnp.float32)

    def conv_circ(x, K, b):
        K = q(K)
        Bn, Cn, H, W = x.shape
        y = jnp.zeros((Bn, K.shape[0], H, W), jnp.float32)
        for kh in range(3):
            for kw in range(3):
                xs = jnp.roll(x, shift=(-(kh - 1), -(kw - 1)), axis=(2, 3))
                y = y + jnp.einsum("oc,bchw->bohw", K[:, :, kh, kw], xs)
        return y + b[None, :, None, None]

    def lin(h, Wm, b):
        return h @ q(Wm).T + b

    h = jax.nn.relu(conv_circ(x, raw["conv_a_0_w"], raw["conv_a_0_b"]))
    h = jax.nn.relu(conv_circ(h, raw["conv_a_1_w"], raw["conv_a_1_b"]))
    h = h.reshape(x.shape[0], -1)
    h = jax.nn.relu(lin(h, raw["linear_a_0_w"], raw["linear_a_0_b"]))
    probs = jax.nn.softmax(lin(h, raw["linear_a_1_w"], raw["linear_a_1_b"]), axis=-1)

    g = jax.nn.relu(conv_circ(x, raw["conv_v_0_w"], raw["conv_v_0_b"]))
    g = jax.nn.relu(conv_circ(g, raw["conv_v_1_w"], raw["conv_v_1_b"]))
    g = g.reshape(x.shape[0], -1)
    g = jax.nn.relu(lin(g, raw["linear_v_0_w"], raw["linear_v_0_b"]))
    value = lin(g, raw["linear_v_1_w"], raw["linear_v_1_b"])
    return probs, value


# ----------------------------------------------------------------------------
# Main
# ----------------------------------------------------------------------------
if __name__ == "__main__":
    # Module hyper-parameters (small, consistent with the PyTorch __init__).
    B = 2
    input_shape = (4, 8, 8)          # (C, H, W)
    action_dim = 5
    n_latent_var = 32
    n_out_channels = 8
    C, H, W = input_shape
    feat = n_out_channels * H * W    # flatten size after the convs

    key = jax.random.PRNGKey(0)
    ks = jax.random.split(key, 17)

    def init(k, shape, scale=0.1):
        return scale * jax.random.normal(k, shape, dtype=jnp.float32)

    # Raw parameters with the exact nn.Module shapes (deterministic init).
    raw = {
        "conv_a_0_w": init(ks[0], (n_out_channels, C, 3, 3)),
        "conv_a_0_b": init(ks[1], (n_out_channels,), 0.01),
        "conv_a_1_w": init(ks[2], (n_out_channels, n_out_channels, 3, 3)),
        "conv_a_1_b": init(ks[3], (n_out_channels,), 0.01),
        "linear_a_0_w": init(ks[4], (n_latent_var, feat)),
        "linear_a_0_b": init(ks[5], (n_latent_var,), 0.01),
        "linear_a_1_w": init(ks[6], (action_dim, n_latent_var)),
        "linear_a_1_b": init(ks[7], (action_dim,), 0.01),
        "conv_v_0_w": init(ks[8], (n_out_channels, C, 3, 3)),
        "conv_v_0_b": init(ks[9], (n_out_channels,), 0.01),
        "conv_v_1_w": init(ks[10], (n_out_channels, n_out_channels, 3, 3)),
        "conv_v_1_b": init(ks[11], (n_out_channels,), 0.01),
        "linear_v_0_w": init(ks[12], (n_latent_var, feat)),
        "linear_v_0_b": init(ks[13], (n_latent_var,), 0.01),
        "linear_v_1_w": init(ks[14], (1, n_latent_var)),
        "linear_v_1_b": init(ks[15], (1,), 0.01),
    }

    kparams = build_kernel_params(raw, input_shape, action_dim,
                                  n_latent_var, n_out_channels)

    # Deterministic example state (NCHW, like the PyTorch module).
    state = jax.random.normal(ks[16], (B, C, H, W), dtype=jnp.float32)

    probs, value = actor_critic_forward(state, kparams, action_dim)
    probs = jax.block_until_ready(probs)
    value = jax.block_until_ready(value)

    # Validate against an independent pure-JAX reference of the torch forward.
    ref_probs, ref_value = reference_forward(state, raw)
    np.testing.assert_allclose(np.asarray(probs), np.asarray(ref_probs),
                               rtol=3e-2, atol=3e-3)
    np.testing.assert_allclose(np.asarray(value), np.asarray(ref_value),
                               rtol=3e-2, atol=3e-3)
    assert probs.shape == (B, action_dim) and value.shape == (B, 1)

    # TODO(synk): Categorical sampling / log_prob / entropy and the Memory list
    # appends in act()/evaluate() are host-side control flow, left out of the kernel.
    print("KERNEL_OK")
</pallas_src>

<mosaic_0001>
module attributes {stable_mosaic.version = 11 : i64} {
  func.func @actor_critic_kernel(%arg0: i32, %arg1: memref<8x256xf32, #tpu.memory_space<vmem>>, %arg2: memref<256x1024xbf16, #tpu.memory_space<vmem>>, %arg3: memref<1x1024xf32, #tpu.memory_space<vmem>>, %arg4: memref<1024x1024xbf16, #tpu.memory_space<vmem>>, %arg5: memref<1x1024xf32, #tpu.memory_space<vmem>>, %arg6: memref<1024x256xbf16, #tpu.memory_space<vmem>>, %arg7: memref<1x256xf32, #tpu.memory_space<vmem>>, %arg8: memref<256x128xbf16, #tpu.memory_space<vmem>>, %arg9: memref<1x128xf32, #tpu.memory_space<vmem>>, %arg10: memref<8x128xf32, #tpu.memory_space<vmem>>) attributes {dimension_semantics = [#tpu.dimension_semantics<parallel>], iteration_bounds = array<i64: 1>, scalar_prefetch = 0 : i64, scratch_operands = 0 : i64, tpu.core_type = #tpu.core_type<tc>, window_params = [{transform_indices = @transform_0, window_bounds = array<i64: 8, 256>}, {pipeline_mode = #tpu.pipeline_mode<synchronous>, transform_indices = @transform_1, window_bounds = array<i64: 256, 1024>}, {pipeline_mode = #tpu.pipeline_mode<synchronous>, transform_indices = @transform_2, window_bounds = array<i64: 1, 1024>}, {pipeline_mode = #tpu.pipeline_mode<synchronous>, transform_indices = @transform_3, window_bounds = array<i64: 1024, 1024>}, {pipeline_mode = #tpu.pipeline_mode<synchronous>, transform_indices = @transform_4, window_bounds = array<i64: 1, 1024>}, {pipeline_mode = #tpu.pipeline_mode<synchronous>, transform_indices = @transform_5, window_bounds = array<i64: 1024, 256>}, {pipeline_mode = #tpu.pipeline_mode<synchronous>, transform_indices = @transform_6, window_bounds = array<i64: 1, 256>}, {pipeline_mode = #tpu.pipeline_mode<synchronous>, transform_indices = @transform_7, window_bounds = array<i64: 256, 128>}, {pipeline_mode = #tpu.pipeline_mode<synchronous>, transform_indices = @transform_8, window_bounds = array<i64: 1, 128>}, {transform_indices = @transform_9, window_bounds = array<i64: 8, 128>}]} {
    %c0 = arith.constant 0 : index
    %c0_0 = arith.constant 0 : index
    %0 = vector.load %arg1[%c0, %c0_0] : memref<8x256xf32, #tpu.memory_space<vmem>>, vector<8x256xf32>
    %1 = arith.truncf %0 : vector<8x256xf32> to vector<8x256xbf16>
    %c0_1 = arith.constant 0 : index
    %c0_2 = arith.constant 0 : index
    %2 = vector.load %arg2[%c0_1, %c0_2] : memref<256x1024xbf16, #tpu.memory_space<vmem>>, vector<256x1024xbf16>
    %cst = arith.constant dense<0.000000e+00> : vector<8x1024xf32>
    %3 = tpu.matmul %1, %2, %cst {dimension_numbers = #tpu.dot_dimension_numbers<[1], [0], [0], [1], [0, 0, 1, 1], [], []>} : vector<8x256xbf16>, vector<256x1024xbf16>, vector<8x1024xf32> -> vector<8x1024xf32>
    %c0_3 = arith.constant 0 : index
    %c0_4 = arith.constant 0 : index
    %4 = vector.load %arg3[%c0_3, %c0_4] : memref<1x1024xf32, #tpu.memory_space<vmem>>, vector<1x1024xf32>
    %5 = vector.broadcast %4 : vector<1x1024xf32> to vector<8x1024xf32>
    %6 = arith.addf %3, %5 : vector<8x1024xf32>
    %cst_5 = arith.constant 0.000000e+00 : f32
    %7 = vector.broadcast %cst_5 : f32 to vector<8x1024xf32>
    %8 = arith.maximumf %6, %7 : vector<8x1024xf32>
    %9 = arith.truncf %8 : vector<8x1024xf32> to vector<8x1024xbf16>
    %c0_6 = arith.constant 0 : index
    %c0_7 = arith.constant 0 : index
    %10 = vector.load %arg4[%c0_6, %c0_7] : memref<1024x1024xbf16, #tpu.memory_space<vmem>>, vector<1024x1024xbf16>
    %cst_8 = arith.constant dense<0.000000e+00> : vector<8x1024xf32>
    %11 = tpu.matmul %9, %10, %cst_8 {dimension_numbers = #tpu.dot_dimension_numbers<[1], [0], [0], [1], [0, 0, 1, 1], [], []>} : vector<8x1024xbf16>, vector<1024x1024xbf16>, vector<8x1024xf32> -> vector<8x1024xf32>
    %c0_9 = arith.constant 0 : index
    %c0_10 = arith.constant 0 : index
    %12 = vector.load %arg5[%c0_9, %c0_10] : memref<1x1024xf32, #tpu.memory_space<vmem>>, vector<1x1024xf32>
    %13 = vector.broadcast %12 : vector<1x1024xf32> to vector<8x1024xf32>
    %14 = arith.addf %11, %13 : vector<8x1024xf32>
    %cst_11 = arith.constant 0.000000e+00 : f32
    %15 = vector.broadcast %cst_11 : f32 to vector<8x1024xf32>
    %16 = arith.maximumf %14, %15 : vector<8x1024xf32>
    %17 = arith.truncf %16 : vector<8x1024xf32> to vector<8x1024xbf16>
    %c0_12 = arith.constant 0 : index
    %c0_13 = arith.constant 0 : index
    %18 = vector.load %arg6[%c0_12, %c0_13] : memref<1024x256xbf16, #tpu.memory_space<vmem>>, vector<1024x256xbf16>
    %cst_14 = arith.constant dense<0.000000e+00> : vector<8x256xf32>
    %19 = tpu.matmul %17, %18, %cst_14 {dimension_numbers = #tpu.dot_dimension_numbers<[1], [0], [0], [1], [0, 0, 1, 1], [], []>} : vector<8x1024xbf16>, vector<1024x256xbf16>, vector<8x256xf32> -> vector<8x256xf32>
    %c0_15 = arith.constant 0 : index
    %c0_16 = arith.constant 0 : index
    %20 = vector.load %arg7[%c0_15, %c0_16] : memref<1x256xf32, #tpu.memory_space<vmem>>, vector<1x256xf32>
    %21 = vector.broadcast %20 : vector<1x256xf32> to vector<8x256xf32>
    %22 = arith.addf %19, %21 : vector<8x256xf32>
    %cst_17 = arith.constant 0.000000e+00 : f32
    %23 = vector.broadcast %cst_17 : f32 to vector<8x256xf32>
    %24 = arith.maximumf %22, %23 : vector<8x256xf32>
    %25 = arith.truncf %24 : vector<8x256xf32> to vector<8x256xbf16>
    %c0_18 = arith.constant 0 : index
    %c0_19 = arith.constant 0 : index
    %26 = vector.load %arg8[%c0_18, %c0_19] : memref<256x128xbf16, #tpu.memory_space<vmem>>, vector<256x128xbf16>
    %cst_20 = arith.constant dense<0.000000e+00> : vector<8x128xf32>
    %27 = tpu.matmul %25, %26, %cst_20 {dimension_numbers = #tpu.dot_dimension_numbers<[1], [0], [0], [1], [0, 0, 1, 1], [], []>} : vector<8x256xbf16>, vector<256x128xbf16>, vector<8x128xf32> -> vector<8x128xf32>
    %c0_21 = arith.constant 0 : index
    %c0_22 = arith.constant 0 : index
    %28 = vector.load %arg9[%c0_21, %c0_22] : memref<1x128xf32, #tpu.memory_space<vmem>>, vector<1x128xf32>
    %29 = vector.broadcast %28 : vector<1x128xf32> to vector<8x128xf32>
    %30 = arith.addf %27, %29 : vector<8x128xf32>
    %31 = tpu.iota {dimensions = array<i32: 1>} : vector<8x128xi32>
    %c5_i32 = arith.constant 5 : i32
    %32 = vector.broadcast %c5_i32 : i32 to vector<8x128xi32>
    %33 = arith.cmpi slt, %31, %32 : vector<8x128xi32>
    %cst_23 = arith.constant -1.000000e+30 : f32
    %34 = vector.broadcast %cst_23 : f32 to vector<8x128xf32>
    %35 = arith.select %33, %30, %34 : vector<8x128xi1>, vector<8x128xf32>
    %cst_24 = arith.constant dense<0xFF800000> : vector<8xf32>
    %36 = vector.multi_reduction <maximumf>, %35, %cst_24 [1] : vector<8x128xf32> to vector<8xf32>
    %37 = vector.shape_cast %36 : vector<8xf32> to vector<8x1xf32>
    %38 = vector.broadcast %37 : vector<8x1xf32> to vector<8x128xf32>
    %39 = arith.subf %35, %38 : vector<8x128xf32>
    %40 = math.exp %39 : vector<8x128xf32>
    %cst_25 = arith.constant dense<0.000000e+00> : vector<8xf32>
    %41 = vector.multi_reduction <add>, %40, %cst_25 [1] : vector<8x128xf32> to vector<8xf32>
    %42 = vector.shape_cast %41 : vector<8xf32> to vector<8x1xf32>
    %43 = tpu.reciprocal %42 {approx = true} : vector<8x1xf32> -> vector<8x1xf32>
    %44 = vector.broadcast %43 : vector<8x1xf32> to vector<8x128xf32>
    %45 = arith.mulf %40, %44 : vector<8x128xf32>
    %c5_i32_26 = arith.constant 5 : i32
    %46 = vector.broadcast %c5_i32_26 : i32 to vector<8x128xi32>
    %47 = arith.cmpi eq, %31, %46 : vector<8x128xi32>
    %cst_27 = arith.constant 0.000000e+00 : f32
    %48 = vector.broadcast %cst_27 : f32 to vector<8x128xf32>
    %49 = arith.select %47, %30, %48 : vector<8x128xi1>, vector<8x128xf32>
    %50 = arith.select %33, %45, %49 : vector<8x128xi1>, vector<8x128xf32>
    %c0_28 = arith.constant 0 : index
    %c0_29 = arith.constant 0 : index
    %51 = vector.load %arg10[%c0_28, %c0_29] : memref<8x128xf32, #tpu.memory_space<vmem>>, vector<8x128xf32>
    tpu.vector_store %arg10[%c0_28, %c0_29], %50 {strides = array<i32>} : memref<8x128xf32, #tpu.memory_space<vmem>>, vector<8x128xf32>,
    return
  }
  func.func @transform_0(%arg0: i32) -> (i32, i32) {
    %c0_i32 = arith.constant 0 : i32
    %c0_i32_0 = arith.constant 0 : i32
    return %arg0, %c0_i32 : i32, i32
  }
  func.func @transform_1(%arg0: i32) -> (i32, i32) {
    %c0_i32 = arith.constant 0 : i32
    %c0_i32_0 = arith.constant 0 : i32
    %c0_i32_1 = arith.constant 0 : i32
    return %c0_i32, %c0_i32_0 : i32, i32
  }
  func.func @transform_2(%arg0: i32) -> (i32, i32) {
    %c0_i32 = arith.constant 0 : i32
    %c0_i32_0 = arith.constant 0 : i32
    %c0_i32_1 = arith.constant 0 : i32
    return %c0_i32, %c0_i32_0 : i32, i32
  }
  func.func @transform_3(%arg0: i32) -> (i32, i32) {
    %c0_i32 = arith.constant 0 : i32
    %c0_i32_0 = arith.constant 0 : i32
    %c0_i32_1 = arith.constant 0 : i32
    return %c0_i32, %c0_i32_0 : i32, i32
  }
  func.func @transform_4(%arg0: i32) -> (i32, i32) {
    %c0_i32 = arith.constant 0 : i32
    %c0_i32_0 = arith.constant 0 : i32
    %c0_i32_1 = arith.constant 0 : i32
    return %c0_i32, %c0_i32_0 : i32, i32
  }
  func.func @transform_5(%arg0: i32) -> (i32, i32) {
    %c0_i32 = arith.constant 0 : i32
    %c0_i32_0 = arith.constant 0 : i32
    %c0_i32_1 = arith.constant 0 : i32
    return %c0_i32, %c0_i32_0 : i32, i32
  }
  func.func @transform_6(%arg0: i32) -> (i32, i32) {
    %c0_i32 = arith.constant 0 : i32
    %c0_i32_0 = arith.constant 0 : i32
    %c0_i32_1 = arith.constant 0 : i32
    return %c0_i32, %c0_i32_0 : i32, i32
  }
  func.func @transform_7(%arg0: i32) -> (i32, i32) {
    %c0_i32 = arith.constant 0 : i32
    %c0_i32_0 = arith.constant 0 : i32
    %c0_i32_1 = arith.constant 0 : i32
    return %c0_i32, %c0_i32_0 : i32, i32
  }
  func.func @transform_8(%arg0: i32) -> (i32, i32) {
    %c0_i32 = arith.constant 0 : i32
    %c0_i32_0 = arith.constant 0 : i32
    %c0_i32_1 = arith.constant 0 : i32
    return %c0_i32, %c0_i32_0 : i32, i32
  }
  func.func @transform_9(%arg0: i32) -> (i32, i32) {
    %c0_i32 = arith.constant 0 : i32
    %c0_i32_0 = arith.constant 0 : i32
    return %arg0, %c0_i32 : i32, i32
  }
}

</mosaic_0001>

<bundles_post_ra>
// kernel: tpu_custom_call.1
= control target key start
LH: loop header
LB: loop body
LE: loop exit
PB: predicated region body
PF: predicated region fallthrough
CT: control target
= control target key end

     0   :  { %14 = vsyncpa [#allocation3], 0  ;;  %s10854_s0 = inlined_call_operand.hbm [shape: f32[8,256], index: 0, kind: input, shape index: {}]   ;;  %s10855_s1 = inlined_call_operand.hbm [shape: bf16[256,1024], index: 1, kind: input, shape index: {}]   ;;  %s10856_s2 = inlined_call_operand.hbm [shape: f32[1,1024], index: 2, kind: input, shape index: {}]   ;;  %s10857_s3 = inlined_call_operand.hbm [shape: bf16[1024,1024], index: 3, kind: input, shape index: {}]   ;;  %s10858_s4 = inlined_call_operand.hbm [shape: f32[1,1024], index: 4, kind: input, shape index: {}]   ;;  %s10859_s5 = inlined_call_operand.hbm [shape: bf16[1024,256], index: 5, kind: input, shape index: {}]   ;;  %s10860_s6 = inlined_call_operand.hbm [shape: f32[1,256], index: 6, kind: input, shape index: {}]   ;;  %s10861_s7 = inlined_call_operand.hbm [shape: bf16[256,128], index: 7, kind: input, shape index: {}]   ;;  %s10862_s8 = inlined_call_operand.hbm [shape: f32[1,128], index: 8, kind: input, shape index: {}]   ;;  %s10863_s9 = inlined_call_operand.hbm [shape: f32[8,128], index: 9, kind: output, shape index: {}]  }
   0x1   :  { %15 = vsyncpa [#allocation6], 0 }
   0x2   :  { %16 = vsyncpa [#allocation9], 0 }
   0x3   :  { %17 = vsyncpa [#allocation12], 0 }
   0x4   :  { %18 = vsyncpa [#allocation15], 0  ;;  %s35_s11 = sshll.u32 %s10855_s1, 4  ;;  %s36_s11 = int_to_ptr.hbm [resolvable:$true] %s35_s11 }
   0x5   :  { %19 = vsyncpa [#allocation4], 0  ;;  %s10493_s12 = smov [#allocation5]   ;;  %s59_s16 = sshll.u32 %s10857_s3, 4  ;;  %s60_s16 = int_to_ptr.hbm [resolvable:$true] %s59_s16 }
   0x6   :  { %s37_s13 = sshll.u32 %s10493_s12, 4  ;;  %s10494_s17 = smov 512   ;;  %s38_s13 = int_to_ptr.vmem [resolvable:$true] %s37_s13 }
   0x7   :  { %s10495_s18 = smov 32   ;;  %s10496_s19 = smov [#allocation8]  }
   0x8   :  { %43 = dma.hbm_to_vmem [thread:$0]  %s36_s11, 16384, %s38_s13, [#allocation6], %s10494_s17, %s10494_s17, %s10495_s18  }
   0x9   :  { %s61_s20 = sshll.u32 %s10496_s19, 4  ;;  %s83_s23 = sshll.u32 %s10859_s5, 4  ;;  %s62_s20 = int_to_ptr.vmem [resolvable:$true] %s61_s20  ;;  %s84_s23 = int_to_ptr.hbm [resolvable:$true] %s83_s23 }
   0xa   :  { %67 = dma.hbm_to_vmem [thread:$0]  %s60_s16, 65536, %s62_s20, [#allocation9], %s10494_s17, %s10494_s17, %s10495_s18  }
   0xb   :  { %s10497_s1 = smov [#allocation11]   ;;  %s107_s3 = sshll.u32 %s10861_s7, 4  ;;  %s108_s3 = int_to_ptr.hbm [resolvable:$true] %s107_s3 }
   0xc   :  { %s85_s24 = sshll.u32 %s10497_s1, 4  ;;  %s10498_s27 = smov 128   ;;  %s86_s24 = int_to_ptr.vmem [resolvable:$true] %s85_s24 }
   0xd   :  { %s10499_s28 = smov 8   ;;  %s10500_s29 = smov [#allocation14]  }
   0xe   :  { %91 = dma.hbm_to_vmem [thread:$0]  %s84_s23, 16384, %s86_s24, [#allocation12], %s10498_s27, %s10498_s27, %s10499_s28  }
   0xf   :  { %s109_s30 = sshll.u32 %s10500_s29, 4  ;;  %s10501_s10 = smov 64   ;;  %s110_s30 = int_to_ptr.vmem [resolvable:$true] %s109_s30 }
  0x10   :  { %s10502_s11 = smov 4   ;;  %s25_s13 = sshll.u32 %s10854_s0, 4  ;;  %s26_s13 = int_to_ptr.hbm [resolvable:$true] %s25_s13 }
  0x11   :  { %115 = dma.hbm_to_vmem [thread:$0]  %s108_s3, 2048, %s110_s30, [#allocation15], %s10501_s10, %s10501_s10, %s10502_s11  }
  0x12   :  { %s10503_s14 = smov [#allocation2]   ;;  %s49_s17 = sshll.u32 %s10856_s2, 4  ;;  %s50_s17 = int_to_ptr.hbm [resolvable:$true] %s49_s17 }
  0x13   :  { %s27_s15 = sshll.u32 %s10503_s14, 4  ;;  %s10504_s18 = smov [#allocation7]   ;;  %s28_s15 = int_to_ptr.vmem [resolvable:$true] %s27_s15 }
  0x14   :  { %30 = dma.hbm_to_vmem [thread:$0]  %s26_s13, 256, %s28_s15, [#allocation3]  }
  0x15   :  { %s51_s19 = sshll.u32 %s10504_s18, 4  ;;  %s73_s22 = sshll.u32 %s10858_s4, 4  ;;  %s52_s19 = int_to_ptr.vmem [resolvable:$true] %s51_s19  ;;  %s74_s22 = int_to_ptr.hbm [resolvable:$true] %s73_s22 }
  0x16   :  { %54 = dma.hbm_to_vmem [thread:$0]  %s50_s17, 128, %s52_s19, [#allocation6]  }
  0x17   :  { %s97_s1 = sshll.u32 %s10860_s6, 4  ;;  %s10505_s24 = smov [#allocation10]   ;;  %s98_s1 = int_to_ptr.hbm [resolvable:$true] %s97_s1 }
  0x18   :  { %s75_s25 = sshll.u32 %s10505_s24, 4  ;;  %s10506_s2 = smov [#allocation13]   ;;  %s76_s25 = int_to_ptr.vmem [resolvable:$true] %s75_s25 }
  0x19   :  { %78 = dma.hbm_to_vmem [thread:$0]  %s74_s22, 128, %s76_s25, [#allocation9]  }
  0x1a   :  { %s99_s26 = sshll.u32 %s10506_s2, 4  ;;  %s121_s28 = sshll.u32 %s10862_s8, 4  ;;  %s100_s26 = int_to_ptr.vmem [resolvable:$true] %s99_s26  ;;  %s122_s28 = int_to_ptr.hbm [resolvable:$true] %s121_s28 }
  0x1b   :  { %102 = dma.hbm_to_vmem [thread:$0]  %s98_s1, 32, %s100_s26, [#allocation12]  }
  0x1c   :  { %s10507_s4 = smov [#allocation16]  }
  0x1d   :  { %s123_s29 = sshll.u32 %s10507_s4, 4  ;;  %s124_s29 = int_to_ptr.vmem [resolvable:$true] %s123_s29 }
  0x1e   :  { %126 = dma.hbm_to_vmem [thread:$0]  %s122_s28, 16, %s124_s29, [#allocation15]  }
  0x1f   :  { %10481 = dma.done.wait [#allocation3], 256  }
  0x20   :  { %10482 = vsyncadd [#allocation3], 4294967040 }
  0x21   :  { %10483 = dma.done.wait [#allocation6], 16512  }
  0x22   :  { %10484 = vsyncadd [#allocation6], 4294950784 }
  0x23   :  { %10485 = dma.done.wait [#allocation9], 65664  }
  0x24   :  { %10486 = vsyncadd [#allocation9], 4294901632 }
  0x25   :  { %10487 = dma.done.wait [#allocation12], 16416  }
  0x26   :  { %10488 = vsyncadd [#allocation12], 4294950880 }
  0x27   :  { %10489 = dma.done.wait [#allocation15], 2064  }
  0x28   :  { %10490 = vsyncadd [#allocation15], 4294965232  ;;  %v6523_v0 = vld [vmem:[#allocation5 + $0x1c0] sm:$0xf]  ;;  %v9489_v5 = vld [vmem:[#allocation5 + $0x1c4] sm:$0xf] }
  0x29   :  { %v9493_v1 = vld [vmem:[#allocation5 + $0x1dc] sm:$0xf0]  ;;  %v6525_v6 = vld [vmem:[#allocation5 + $0x1e0] sm:$0xf0]  ;;  %s10508_s6 = smov [#allocation17]   ;;  %s6283_s11 = sshll.u32 %s10863_s9, 4  ;;  %s6284_s11 = int_to_ptr.hbm [resolvable:$true] %s6283_s11 }
  0x2a   :  { %v6779_v2 = vld [vmem:[#allocation5 + $0x3c0] sm:$0xf]  ;;  %v6524_v3 = vor.u32 %v9493_v1, %v6523_v0  ;;  %v6528_v8 = vor.u32 %v9489_v5, %v6525_v6  ;;  %v9553_v9 = vld [vmem:[#allocation5 + $0x3c4] sm:$0xf]  ;;  %s6281_s8 = sshll.u32 %s10508_s6, 4  ;;  %s6282_s8 = int_to_ptr.vmem [resolvable:$true] %s6281_s8 }
  0x2b   :  { %v9557_v4 = vld [vmem:[#allocation5 + $0x3dc] sm:$0xf0]  ;;  %v6781_v10 = vld [vmem:[#allocation5 + $0x3e0] sm:$0xf0] }
  0x2c   :  { %v6780_v7 = vor.u32 %v9557_v4, %v6779_v2  ;;  %v6491_v11 = vld [vmem:[#allocation5 + $0x180] sm:$0xf]  ;;  %953 = vmatpush.bf16.msra.mxu0 %v6524_v3  ;;  %v6784_v12 = vor.u32 %v9553_v9, %v6781_v10  ;;  %979 = vmatpush.bf16.msra.mxu2 %v6528_v8  ;;  %v9481_v18 = vld [vmem:[#allocation5 + $0x184] sm:$0xf] }
  0x2d   :  { %v9485_v13 = vld [vmem:[#allocation5 + $0x19c] sm:$0xf0]  ;;  %v6493_v19 = vld [vmem:[#allocation5 + $0x1a0] sm:$0xf0] }
  0x2e   :  { %v6747_v14 = vld [vmem:[#allocation5 + $0x380] sm:$0xf]  ;;  %966 = vmatpush.bf16.msra.mxu1 %v6780_v7  ;;  %v6492_v16 = vor.u32 %v9485_v13, %v6491_v11  ;;  %v9545_v20 = vld [vmem:[#allocation5 + $0x384] sm:$0xf]  ;;  %992 = vmatpush.bf16.msra.mxu3 %v6784_v12  ;;  %v6496_v21 = vor.u32 %v9481_v18, %v6493_v19 }
  0x2f   :  { %v9549_v15 = vld [vmem:[#allocation5 + $0x39c] sm:$0xf0]  ;;  %v6749_v22 = vld [vmem:[#allocation5 + $0x3a0] sm:$0xf0] }
  0x30   :  { %v6748_v17 = vor.u32 %v9549_v15, %v6747_v14  ;;  %v6459_v23 = vld [vmem:[#allocation5 + $0x140] sm:$0xf]  ;;  %v6752_v25 = vor.u32 %v9545_v20, %v6749_v22  ;;  %v9473_v28 = vld [vmem:[#allocation5 + $0x144] sm:$0xf]  ;;  %954 = vmatpush.bf16.msra.mxu0 %v6492_v16  ;;  %980 = vmatpush.bf16.msra.mxu2 %v6496_v21 }
  0x31   :  { %v9477_v24 = vld [vmem:[#allocation5 + $0x15c] sm:$0xf0]  ;;  %v6461_v30 = vld [vmem:[#allocation5 + $0x160] sm:$0xf0] }
  0x32   :  { %v6715_v26 = vld [vmem:[#allocation5 + $0x340] sm:$0xf]  ;;  %v6460_v29 = vor.u32 %v9477_v24, %v6459_v23  ;;  %v9537_v31 = vld [vmem:[#allocation5 + $0x344] sm:$0xf]  ;;  %967 = vmatpush.bf16.msra.mxu1 %v6748_v17  ;;  %v6464_v34 = vor.u32 %v9473_v28, %v6461_v30  ;;  %993 = vmatpush.bf16.msra.mxu3 %v6752_v25  ;;  %v6531_v28 = vld [vmem:[#allocation5 + $0x1c8] sm:$0xf] }
  0x33   :  { %v9541_v27 = vld [vmem:[#allocation5 + $0x35c] sm:$0xf0]  ;;  %v6717_v32 = vld [vmem:[#allocation5 + $0x360] sm:$0xf0]  ;;  %v6787_v30 = vld [vmem:[#allocation5 + $0x3c8] sm:$0xf] }
  0x34   :  { %v6716_v33 = vor.u32 %v9541_v27, %v6715_v26  ;;  %v6427_v35 = vld [vmem:[#allocation5 + $0x100] sm:$0xf]  ;;  %v6720_v38 = vor.u32 %v9537_v31, %v6717_v32  ;;  %v9465_v40 = vld [vmem:[#allocation5 + $0x104] sm:$0xf]  ;;  %955 = vmatpush.bf16.msra.mxu0 %v6460_v29  ;;  %981 = vmatpush.bf16.msra.mxu2 %v6464_v34  ;;  %v9494_v29 = vld [vmem:[#allocation5 + $0x1e4] sm:$0xf0] }
  0x35   :  { %v9469_v36 = vld [vmem:[#allocation5 + $0x11c] sm:$0xf0]  ;;  %v6429_v41 = vld [vmem:[#allocation5 + $0x120] sm:$0xf0]  ;;  %v9558_v32 = vld [vmem:[#allocation5 + $0x3e4] sm:$0xf0] }
  0x36   :  { %v6683_v37 = vld [vmem:[#allocation5 + $0x300] sm:$0xf]  ;;  %v9529_v42 = vld [vmem:[#allocation5 + $0x304] sm:$0xf]  ;;  %v6428_v44 = vor.u32 %v9469_v36, %v6427_v35  ;;  %968 = vmatpush.bf16.msra.mxu1 %v6716_v33  ;;  %v6432_v46 = vor.u32 %v9465_v40, %v6429_v41  ;;  %994 = vmatpush.bf16.msra.mxu3 %v6720_v38  ;;  %v9490_v33 = vld [vmem:[#allocation5 + $0x1cc] sm:$0xf]  ;;  %v6532_v40 = vor.u32 %v9494_v29, %v6531_v28 }
  0x37   :  { %v9533_v39 = vld [vmem:[#allocation5 + $0x31c] sm:$0xf0]  ;;  %v6685_v43 = vld [vmem:[#allocation5 + $0x320] sm:$0xf0]  ;;  %v6533_v34 = vld [vmem:[#allocation5 + $0x1e8] sm:$0xf0]  ;;  %v6788_v41 = vor.u32 %v9558_v32, %v6787_v30 }
  0x38   :  { %v6684_v45 = vor.u32 %v9533_v39, %v6683_v37  ;;  %v6395_v47 = vld [vmem:[#allocation5 + $0xc0] sm:$0xf]  ;;  %v6688_v50 = vor.u32 %v9529_v42, %v6685_v43  ;;  %v9457_v52 = vld [vmem:[#allocation5 + $0xc4] sm:$0xf]  ;;  %956 = vmatpush.bf16.msra.mxu0 %v6428_v44  ;;  %982 = vmatpush.bf16.msra.mxu2 %v6432_v46  ;;  %v9554_v37 = vld [vmem:[#allocation5 + $0x3cc] sm:$0xf]  ;;  %v6536_v42 = vor.u32 %v9490_v33, %v6533_v34 }
  0x39   :  { %v9461_v48 = vld [vmem:[#allocation5 + $0xdc] sm:$0xf0]  ;;  %v6397_v53 = vld [vmem:[#allocation5 + $0xe0] sm:$0xf0]  ;;  %v6789_v38 = vld [vmem:[#allocation5 + $0x3e8] sm:$0xf0] }
  0x3a   :  { %v6651_v49 = vld [vmem:[#allocation5 + $0x2c0] sm:$0xf]  ;;  %v9521_v54 = vld [vmem:[#allocation5 + $0x2c4] sm:$0xf]  ;;  %v6396_v56 = vor.u32 %v9461_v48, %v6395_v47  ;;  %969 = vmatpush.bf16.msra.mxu1 %v6684_v45  ;;  %v6400_v58 = vor.u32 %v9457_v52, %v6397_v53  ;;  %995 = vmatpush.bf16.msra.mxu3 %v6688_v50  ;;  %v6499_v43 = vld [vmem:[#allocation5 + $0x188] sm:$0xf]  ;;  %v6792_v46 = vor.u32 %v9554_v37, %v6789_v38 }
  0x3b   :  { %v9525_v51 = vld [vmem:[#allocation5 + $0x2dc] sm:$0xf0]  ;;  %v6653_v55 = vld [vmem:[#allocation5 + $0x2e0] sm:$0xf0]  ;;  %v9486_v44 = vld [vmem:[#allocation5 + $0x1a4] sm:$0xf0] }
  0x3c   :  { %v6652_v57 = vor.u32 %v9525_v51, %v6651_v49  ;;  %v6363_v59 = vld [vmem:[#allocation5 + $0x80] sm:$0xf]  ;;  %v6656_v62 = vor.u32 %v9521_v54, %v6653_v55  ;;  %v9449_v0 = vld [vmem:[#allocation5 + $0x84] sm:$0xf]  ;;  %957 = vmatpush.bf16.msra.mxu0 %v6396_v56  ;;  %983 = vmatpush.bf16.msra.mxu2 %v6400_v58  ;;  %v6755_v45 = vld [vmem:[#allocation5 + $0x388] sm:$0xf]  ;;  %v6500_v53 = vor.u32 %v9486_v44, %v6499_v43 }
  0x3d   :  { %v9453_v60 = vld [vmem:[#allocation5 + $0x9c] sm:$0xf0]  ;;  %v6365_v1 = vld [vmem:[#allocation5 + $0xa0] sm:$0xf0]  ;;  %v9550_v47 = vld [vmem:[#allocation5 + $0x3a4] sm:$0xf0] }
  0x3e   :  { %v6619_v61 = vld [vmem:[#allocation5 + $0x280] sm:$0xf]  ;;  %v9513_v2 = vld [vmem:[#allocation5 + $0x284] sm:$0xf]  ;;  %v6364_v4 = vor.u32 %v9453_v60, %v6363_v59  ;;  %970 = vmatpush.bf16.msra.mxu1 %v6652_v57  ;;  %v6368_v6 = vor.u32 %v9449_v0, %v6365_v1  ;;  %996 = vmatpush.bf16.msra.mxu3 %v6656_v62  ;;  %v9482_v48 = vld [vmem:[#allocation5 + $0x18c] sm:$0xf]  ;;  %v6756_v56 = vor.u32 %v9550_v47, %v6755_v45 }
  0x3f   :  { %v9517_v63 = vld [vmem:[#allocation5 + $0x29c] sm:$0xf0]  ;;  %v6621_v3 = vld [vmem:[#allocation5 + $0x2a0] sm:$0xf0]  ;;  %v6501_v49 = vld [vmem:[#allocation5 + $0x1a8] sm:$0xf0] }
  0x40   :  { %v6620_v5 = vor.u32 %v9517_v63, %v6619_v61  ;;  %v6331_v7 = vld [vmem:[#allocation5 + $0x40] sm:$0xf]  ;;  %v6624_v10 = vor.u32 %v9513_v2, %v6621_v3  ;;  %v9441_v12 = vld [vmem:[#allocation5 + $0x44] sm:$0xf]  ;;  %958 = vmatpush.bf16.msra.mxu0 %v6364_v4  ;;  %984 = vmatpush.bf16.msra.mxu2 %v6368_v6  ;;  %v9546_v50 = vld [vmem:[#allocation5 + $0x38c] sm:$0xf]  ;;  %v6504_v57 = vor.u32 %v9482_v48, %v6501_v49 }
  0x41   :  { %v9445_v8 = vld [vmem:[#allocation5 + $0x5c] sm:$0xf0]  ;;  %v6333_v13 = vld [vmem:[#allocation5 + $0x60] sm:$0xf0]  ;;  %v6757_v51 = vld [vmem:[#allocation5 + $0x3a8] sm:$0xf0] }
  0x42   :  { %v6587_v9 = vld [vmem:[#allocation5 + $0x240] sm:$0xf]  ;;  %v9505_v14 = vld [vmem:[#allocation5 + $0x244] sm:$0xf]  ;;  %v6332_v16 = vor.u32 %v9445_v8, %v6331_v7  ;;  %971 = vmatpush.bf16.msra.mxu1 %v6620_v5  ;;  %v6336_v20 = vor.u32 %v9441_v12, %v6333_v13  ;;  %997 = vmatpush.bf16.msra.mxu3 %v6624_v10  ;;  %v163_v52 = vld [vmem:[#allocation2] sm:$0xff]  ;;  %v6760_v61 = vor.u32 %v9546_v50, %v6757_v51 }
  0x43   :  { %v9509_v11 = vld [vmem:[#allocation5 + $0x25c] sm:$0xf0]  ;;  %v6589_v15 = vld [vmem:[#allocation5 + $0x260] sm:$0xf0]  ;;  %v6467_v54 = vld [vmem:[#allocation5 + $0x148] sm:$0xf]  ;;  %v10586_v55 = vpack.c.bf16 %v163_v52, %v163_v52 }
  0x44   :  { %v6299_v17 = vld [vmem:[#allocation5] sm:$0xf]  ;;  %v6588_v19 = vor.u32 %v9509_v11, %v6587_v9  ;;  %v9433_v23 = vld [vmem:[#allocation5 + $0x4] sm:$0xf]  ;;  %v6592_v24 = vor.u32 %v9505_v14, %v6589_v15  ;;  %959 = vmatpush.bf16.msra.mxu0 %v6332_v16  ;;  %985 = vmatpush.bf16.msra.mxu2 %v6336_v20  ;;  %v9478_v58 = vld [vmem:[#allocation5 + $0x164] sm:$0xf0] }
  0x45   :  { %v9437_v18 = vld [vmem:[#allocation5 + $0x1c] sm:$0xf0]  ;;  %v6301_v25 = vld [vmem:[#allocation5 + $0x20] sm:$0xf0]  ;;  %v6723_v59 = vld [vmem:[#allocation5 + $0x348] sm:$0xf]  ;;  %v6468_v4 = vor.u32 %v9478_v58, %v6467_v54 }
  0x46   :  { %v6555_v21 = vld [vmem:[#allocation5 + $0x200] sm:$0xf]  ;;  %v9497_v26 = vld [vmem:[#allocation5 + $0x204] sm:$0xf]  ;;  %v6300_v31 = vor.u32 %v9437_v18, %v6299_v17  ;;  %972 = vmatpush.bf16.msra.mxu1 %v6588_v19  ;;  %v6304_v36 = vor.u32 %v9433_v23, %v6301_v25  ;;  %998 = vmatpush.bf16.msra.mxu3 %v6592_v24  ;;  %v9542_v60 = vld [vmem:[#allocation5 + $0x364] sm:$0xf0] }
  0x47   :  { %v9501_v22 = vld [vmem:[#allocation5 + $0x21c] sm:$0xf0]  ;;  %v6557_v27 = vld [vmem:[#allocation5 + $0x220] sm:$0xf0]  ;;  %v9474_v62 = vld [vmem:[#allocation5 + $0x14c] sm:$0xf]  ;;  %v6724_v5 = vor.u32 %v9542_v60, %v6723_v59 }
  0x48   :  { %v6556_v35 = vor.u32 %v9501_v22, %v6555_v21  ;;  %v6560_v39 = vor.u32 %v9497_v26, %v6557_v27  ;;  %960 = vmatpush.bf16.msra.mxu0 %v6300_v31  ;;  %986 = vmatpush.bf16.msra.mxu2 %v6304_v36  ;;  %v6469_v63 = vld [vmem:[#allocation5 + $0x168] sm:$0xf0]  ;;  %v164_v0 = vld [vmem:[#allocation2 + $0x8] sm:$0xff]  ;;  %v6435_v7 = vld [vmem:[#allocation5 + $0x108] sm:$0xf] }
  0x49   :  { %v9538_v1 = vld [vmem:[#allocation5 + $0x34c] sm:$0xf]  ;;  %v10590_v3 = vpack.c.bf16 %v164_v0, %v164_v0  ;;  %v6472_v6 = vor.u32 %v9474_v62, %v6469_v63  ;;  %v9470_v8 = vld [vmem:[#allocation5 + $0x124] sm:$0xf0] }
  0x4a   :  { %973 = vmatpush.bf16.msra.mxu1 %v6556_v35  ;;  %999 = vmatpush.bf16.msra.mxu3 %v6560_v39  ;;  %v6725_v2 = vld [vmem:[#allocation5 + $0x368] sm:$0xf0]  ;;  %v6691_v9 = vld [vmem:[#allocation5 + $0x308] sm:$0xf]  ;;  %v6436_v16 = vor.u32 %v9470_v8, %v6435_v7  ;;  %v9491_v7 = vld [vmem:[#allocation5 + $0x1d4] sm:$0xf] }
  0x4b   :  { %961 = vmatmul.bf16.vlgmr.msra.gmra.mxu0 %v10586_v55  ;;  %987 = vmatmul.bf16.vlgmr.msra.gmra.mxu2 %v10586_v55  ;;  %v6728_v10 = vor.u32 %v9538_v1, %v6725_v2  ;;  %v9534_v11 = vld [vmem:[#allocation5 + $0x324] sm:$0xf0]  ;;  %v9466_v12 = vld [vmem:[#allocation5 + $0x10c] sm:$0xf]  ;;  %v6539_v1 = vld [vmem:[#allocation5 + $0x1d0] sm:$0xf] }
  0x4c   :  { %1005 = vmatpush.bf16.msrb.mxu0 %v6532_v40  ;;  %1031 = vmatpush.bf16.msrb.mxu2 %v6536_v42  ;;  %v6437_v13 = vld [vmem:[#allocation5 + $0x128] sm:$0xf0]  ;;  %v6692_v17 = vor.u32 %v9534_v11, %v6691_v9  ;;  %v6403_v19 = vld [vmem:[#allocation5 + $0xc8] sm:$0xf]  ;;  %v9495_v2 = vld [vmem:[#allocation5 + $0x1ec] sm:$0xf0] }
  0x4d   :  { %974 = vmatmul.bf16.vlgmr.msra.gmra.mxu1 %v10590_v3  ;;  %v9530_v14 = vld [vmem:[#allocation5 + $0x30c] sm:$0xf]  ;;  %1000 = vmatmul.bf16.vlgmr.msra.gmra.mxu3 %v10590_v3  ;;  %v6440_v18 = vor.u32 %v9466_v12, %v6437_v13  ;;  %v9462_v20 = vld [vmem:[#allocation5 + $0xe4] sm:$0xf0]  ;;  %v6541_v8 = vld [vmem:[#allocation5 + $0x1f0] sm:$0xf0] }
  0x4e   :  { %1018 = vmatpush.bf16.msrb.mxu1 %v6788_v41  ;;  %1044 = vmatpush.bf16.msrb.mxu3 %v6792_v46  ;;  %v6693_v15 = vld [vmem:[#allocation5 + $0x328] sm:$0xf0]  ;;  %v6659_v21 = vld [vmem:[#allocation5 + $0x2c8] sm:$0xf]  ;;  %v6404_v28 = vor.u32 %v9462_v20, %v6403_v19  ;;  %v9555_v11 = vld [vmem:[#allocation5 + $0x3d4] sm:$0xf] }
  0x4f   :  { %v6696_v22 = vor.u32 %v9530_v14, %v6693_v15  ;;  %v9526_v23 = vld [vmem:[#allocation5 + $0x2e4] sm:$0xf0]  ;;  %v9458_v24 = vld [vmem:[#allocation5 + $0xcc] sm:$0xf]  ;;  %v6797_v12 = vld [vmem:[#allocation5 + $0x3f0] sm:$0xf0]  ;;  %v6540_v14 = vor.u32 %v9495_v2, %v6539_v1 }
  0x50   :  { %1006 = vmatpush.bf16.msrb.mxu0 %v6500_v53  ;;  %1032 = vmatpush.bf16.msrb.mxu2 %v6504_v57  ;;  %v6405_v25 = vld [vmem:[#allocation5 + $0xe8] sm:$0xf0]  ;;  %v6660_v29 = vor.u32 %v9526_v23, %v6659_v21  ;;  %v6371_v31 = vld [vmem:[#allocation5 + $0x88] sm:$0xf]  ;;  %v6763_v19 = vld [vmem:[#allocation5 + $0x390] sm:$0xf]  ;;  %v6800_v20 = vor.u32 %v9555_v11, %v6797_v12 }
  0x51   :  { %v9522_v26 = vld [vmem:[#allocation5 + $0x2cc] sm:$0xf]  ;;  %v6408_v30 = vor.u32 %v9458_v24, %v6405_v25  ;;  %v9454_v32 = vld [vmem:[#allocation5 + $0xa4] sm:$0xf0]  ;;  %v9551_v21 = vld [vmem:[#allocation5 + $0x3ac] sm:$0xf0] }
  0x52   :  { %1019 = vmatpush.bf16.msrb.mxu1 %v6756_v56  ;;  %1045 = vmatpush.bf16.msrb.mxu3 %v6760_v61  ;;  %v6661_v27 = vld [vmem:[#allocation5 + $0x2e8] sm:$0xf0]  ;;  %v6627_v33 = vld [vmem:[#allocation5 + $0x288] sm:$0xf]  ;;  %v6372_v40 = vor.u32 %v9454_v32, %v6371_v31  ;;  %v6509_v23 = vld [vmem:[#allocation5 + $0x1b0] sm:$0xf0] }
  0x53   :  { %v6664_v34 = vor.u32 %v9522_v26, %v6661_v27  ;;  %v9518_v35 = vld [vmem:[#allocation5 + $0x2a4] sm:$0xf0]  ;;  %v9450_v36 = vld [vmem:[#allocation5 + $0x8c] sm:$0xf]  ;;  %v9547_v24 = vld [vmem:[#allocation5 + $0x394] sm:$0xf]  ;;  %v6764_v27 = vor.u32 %v9551_v21, %v6763_v19 }
  0x54   :  { %1007 = vmatpush.bf16.msrb.mxu0 %v6468_v4  ;;  %1033 = vmatpush.bf16.msrb.mxu2 %v6472_v6  ;;  %v6373_v37 = vld [vmem:[#allocation5 + $0xa8] sm:$0xf0]  ;;  %v6628_v41 = vor.u32 %v9518_v35, %v6627_v33  ;;  %v6339_v43 = vld [vmem:[#allocation5 + $0x48] sm:$0xf]  ;;  %v6795_v4 = vld [vmem:[#allocation5 + $0x3d0] sm:$0xf] }
  0x55   :  { %v9514_v38 = vld [vmem:[#allocation5 + $0x28c] sm:$0xf]  ;;  %v6376_v42 = vor.u32 %v9450_v36, %v6373_v37  ;;  %v9446_v44 = vld [vmem:[#allocation5 + $0x64] sm:$0xf0]  ;;  %v9559_v6 = vld [vmem:[#allocation5 + $0x3ec] sm:$0xf0] }
  0x56   :  { %1020 = vmatpush.bf16.msrb.mxu1 %v6724_v5  ;;  %1046 = vmatpush.bf16.msrb.mxu3 %v6728_v10  ;;  %v6629_v39 = vld [vmem:[#allocation5 + $0x2a8] sm:$0xf0]  ;;  %v6595_v45 = vld [vmem:[#allocation5 + $0x248] sm:$0xf]  ;;  %v6340_v52 = vor.u32 %v9446_v44, %v6339_v43  ;;  %v6796_v15 = vor.u32 %v9559_v6, %v6795_v4  ;;  %v6765_v25 = vld [vmem:[#allocation5 + $0x3b0] sm:$0xf0] }
  0x57   :  { %v6632_v46 = vor.u32 %v9514_v38, %v6629_v39  ;;  %v9510_v47 = vld [vmem:[#allocation5 + $0x264] sm:$0xf0]  ;;  %v9442_v48 = vld [vmem:[#allocation5 + $0x4c] sm:$0xf]  ;;  %v6731_v31 = vld [vmem:[#allocation5 + $0x350] sm:$0xf]  ;;  %v6768_v32 = vor.u32 %v9547_v24, %v6765_v25 }
  0x58   :  { %1008 = vmatpush.bf16.msrb.mxu0 %v6436_v16  ;;  %1034 = vmatpush.bf16.msrb.mxu2 %v6440_v18  ;;  %v6341_v49 = vld [vmem:[#allocation5 + $0x68] sm:$0xf0]  ;;  %v6307_v53 = vld [vmem:[#allocation5 + $0x8] sm:$0xf]  ;;  %v6596_v56 = vor.u32 %v9510_v47, %v6595_v45  ;;  %v6544_v16 = vor.u32 %v9491_v7, %v6541_v8  ;;  %v9487_v18 = vld [vmem:[#allocation5 + $0x1ac] sm:$0xf0] }
  0x59   :  { %v9506_v50 = vld [vmem:[#allocation5 + $0x24c] sm:$0xf]  ;;  %v9438_v54 = vld [vmem:[#allocation5 + $0x24] sm:$0xf0]  ;;  %v6344_v57 = vor.u32 %v9442_v48, %v6341_v49  ;;  %v9543_v33 = vld [vmem:[#allocation5 + $0x36c] sm:$0xf0] }
  0x5a   :  { %1021 = vmatpush.bf16.msrb.mxu1 %v6692_v17  ;;  %1047 = vmatpush.bf16.msrb.mxu3 %v6696_v22  ;;  %v6597_v51 = vld [vmem:[#allocation5 + $0x268] sm:$0xf0]  ;;  %v6563_v58 = vld [vmem:[#allocation5 + $0x208] sm:$0xf]  ;;  %v6308_v5 = vor.u32 %v9438_v54, %v6307_v53  ;;  %v6507_v17 = vld [vmem:[#allocation5 + $0x190] sm:$0xf]  ;;  %v6732_v39 = vor.u32 %v9543_v33, %v6731_v31 }
  0x5b   :  { %v9502_v59 = vld [vmem:[#allocation5 + $0x224] sm:$0xf0]  ;;  %v9434_v60 = vld [vmem:[#allocation5 + $0xc] sm:$0xf]  ;;  %v6600_v61 = vor.u32 %v9506_v50, %v6597_v51  ;;  %v9483_v22 = vld [vmem:[#allocation5 + $0x194] sm:$0xf]  ;;  %v6508_v26 = vor.u32 %v9487_v18, %v6507_v17 }
  0x5c   :  { %1009 = vmatpush.bf16.msrb.mxu0 %v6404_v28  ;;  %1035 = vmatpush.bf16.msrb.mxu2 %v6408_v30  ;;  %v6309_v62 = vld [vmem:[#allocation5 + $0x28] sm:$0xf0]  ;;  %v6564_v9 = vor.u32 %v9502_v59, %v6563_v58  ;;  %v6512_v28 = vor.u32 %v9483_v22, %v6509_v23  ;;  %v9479_v30 = vld [vmem:[#allocation5 + $0x16c] sm:$0xf0]  ;;  %v6477_v35 = vld [vmem:[#allocation5 + $0x170] sm:$0xf0] }
  0x5d   :  { %v9498_v63 = vld [vmem:[#allocation5 + $0x20c] sm:$0xf]  ;;  %v6312_v10 = vor.u32 %v9434_v60, %v6309_v62  ;;  %v9539_v36 = vld [vmem:[#allocation5 + $0x354] sm:$0xf]  ;;  %v6699_v43 = vld [vmem:[#allocation5 + $0x310] sm:$0xf] }
  0x5e   :  { %1022 = vmatpush.bf16.msrb.mxu1 %v6660_v29  ;;  %1048 = vmatpush.bf16.msrb.mxu3 %v6664_v34  ;;  %v6565_v0 = vld [vmem:[#allocation5 + $0x228] sm:$0xf0]  ;;  %v6475_v29 = vld [vmem:[#allocation5 + $0x150] sm:$0xf]  ;;  %v9475_v34 = vld [vmem:[#allocation5 + $0x154] sm:$0xf] }
  0x5f   :  { %v6568_v13 = vor.u32 %v9498_v63, %v6565_v0  ;;  %v6733_v37 = vld [vmem:[#allocation5 + $0x370] sm:$0xf0]  ;;  %v6476_v38 = vor.u32 %v9479_v30, %v6475_v29  ;;  %v9535_v45 = vld [vmem:[#allocation5 + $0x32c] sm:$0xf0] }
  0x60   :  { %1010 = vmatpush.bf16.msrb.mxu0 %v6372_v40  ;;  %1036 = vmatpush.bf16.msrb.mxu2 %v6376_v42  ;;  %v6480_v40 = vor.u32 %v9475_v34, %v6477_v35  ;;  %v9471_v42 = vld [vmem:[#allocation5 + $0x12c] sm:$0xf0]  ;;  %v6736_v44 = vor.u32 %v9539_v36, %v6733_v37  ;;  %v6445_v47 = vld [vmem:[#allocation5 + $0x130] sm:$0xf0]  ;;  %v6700_v51 = vor.u32 %v9535_v45, %v6699_v43  ;;  %v6547_v36 = vld [vmem:[#allocation5 + $0x1d8] sm:$0xf] }
  0x61   :  { %v9531_v48 = vld [vmem:[#allocation5 + $0x314] sm:$0xf]  ;;  %v6411_v53 = vld [vmem:[#allocation5 + $0xd0] sm:$0xf]  ;;  %v9496_v37 = vld [vmem:[#allocation5 + $0x1f4] sm:$0xf0] }
  0x62   :  { %1023 = vmatpush.bf16.msrb.mxu1 %v6628_v41  ;;  %1049 = vmatpush.bf16.msrb.mxu3 %v6632_v46  ;;  %v6443_v41 = vld [vmem:[#allocation5 + $0x110] sm:$0xf]  ;;  %v9467_v46 = vld [vmem:[#allocation5 + $0x114] sm:$0xf]  ;;  %v9556_v45 = vld [vmem:[#allocation5 + $0x3dc] sm:$0xf] }
  0x63   :  { %v6701_v49 = vld [vmem:[#allocation5 + $0x330] sm:$0xf0]  ;;  %v6444_v50 = vor.u32 %v9471_v42, %v6443_v41  ;;  %v9463_v54 = vld [vmem:[#allocation5 + $0xec] sm:$0xf0]  ;;  %v9492_v41 = vld [vmem:[#allocation5 + $0x1dc] sm:$0xf] }
  0x64   :  { %1011 = vmatpush.bf16.msrb.mxu0 %v6340_v52  ;;  %1037 = vmatpush.bf16.msrb.mxu2 %v6344_v57  ;;  %v6448_v52 = vor.u32 %v9467_v46, %v6445_v47  ;;  %v6704_v57 = vor.u32 %v9531_v48, %v6701_v49  ;;  %v9527_v58 = vld [vmem:[#allocation5 + $0x2ec] sm:$0xf0]  ;;  %v9459_v59 = vld [vmem:[#allocation5 + $0xd4] sm:$0xf]  ;;  %v6412_v63 = vor.u32 %v9463_v54, %v6411_v53  ;;  %v6549_v42 = vld [vmem:[#allocation5 + $0x1f8] sm:$0xf0] }
  0x65   :  { %v6413_v60 = vld [vmem:[#allocation5 + $0xf0] sm:$0xf0]  ;;  %v6379_v2 = vld [vmem:[#allocation5 + $0x90] sm:$0xf]  ;;  %v6805_v46 = vld [vmem:[#allocation5 + $0x3f8] sm:$0xf0]  ;;  %v6548_v48 = vor.u32 %v9496_v37, %v6547_v36 }
  0x66   :  { %1024 = vmatpush.bf16.msrb.mxu1 %v6596_v56  ;;  %1050 = vmatpush.bf16.msrb.mxu3 %v6600_v61  ;;  %v6667_v56 = vld [vmem:[#allocation5 + $0x2d0] sm:$0xf]  ;;  %v9523_v61 = vld [vmem:[#allocation5 + $0x2d4] sm:$0xf]  ;;  %v6416_v1 = vor.u32 %v9459_v59, %v6413_v60  ;;  %v6771_v53 = vld [vmem:[#allocation5 + $0x398] sm:$0xf]  ;;  %v6808_v54 = vor.u32 %v9556_v45, %v6805_v46 }
  0x67   :  { %v6669_v62 = vld [vmem:[#allocation5 + $0x2f0] sm:$0xf0]  ;;  %v6668_v0 = vor.u32 %v9527_v58, %v6667_v56  ;;  %v9455_v4 = vld [vmem:[#allocation5 + $0xac] sm:$0xf0]  ;;  %v9552_v56 = vld [vmem:[#allocation5 + $0x3b4] sm:$0xf0] }
  0x68   :  { %1012 = vmatpush.bf16.msrb.mxu0 %v6308_v5  ;;  %1038 = vmatpush.bf16.msrb.mxu2 %v6312_v10  ;;  %v6635_v5 = vld [vmem:[#allocation5 + $0x290] sm:$0xf]  ;;  %v6672_v6 = vor.u32 %v9523_v61, %v6669_v62  ;;  %v9451_v8 = vld [vmem:[#allocation5 + $0x94] sm:$0xf]  ;;  %v6380_v12 = vor.u32 %v9455_v4, %v6379_v2  ;;  %v6517_v58 = vld [vmem:[#allocation5 + $0x1b8] sm:$0xf0]  ;;  %v6772_v62 = vor.u32 %v9552_v56, %v6771_v53 }
  0x69   :  { %v9519_v7 = vld [vmem:[#allocation5 + $0x2ac] sm:$0xf0]  ;;  %v9515_v10 = vld [vmem:[#allocation5 + $0x294] sm:$0xf]  ;;  %v9548_v59 = vld [vmem:[#allocation5 + $0x39c] sm:$0xf] }
  0x6a   :  { %1025 = vmatpush.bf16.msrb.mxu1 %v6564_v9  ;;  %1051 = vmatpush.bf16.msrb.mxu3 %v6568_v13  ;;  %v6381_v9 = vld [vmem:[#allocation5 + $0xb0] sm:$0xf0]  ;;  %v6636_v13 = vor.u32 %v9519_v7, %v6635_v5  ;;  %v6603_v17 = vld [vmem:[#allocation5 + $0x250] sm:$0xf]  ;;  %v6773_v60 = vld [vmem:[#allocation5 + $0x3b8] sm:$0xf0] }
  0x6b   :  { %1013 = vmatmul.bf16.vlgmr.msrb.gmra.mxu0 %v10586_v55  ;;  %1039 = vmatmul.bf16.vlgmr.msrb.gmra.mxu2 %v10586_v55  ;;  %v6637_v11 = vld [vmem:[#allocation5 + $0x2b0] sm:$0xf0]  ;;  %v9511_v19 = vld [vmem:[#allocation5 + $0x26c] sm:$0xf0]  ;;  %v6739_v2 = vld [vmem:[#allocation5 + $0x358] sm:$0xf]  ;;  %v6776_v4 = vor.u32 %v9548_v59, %v6773_v60 }
  0x6c   :  { %1057 = vmatpush.bf16.msra.mxu0 %v6540_v14  ;;  %1083 = vmatpush.bf16.msra.mxu2 %v6544_v16  ;;  %v6384_v14 = vor.u32 %v9451_v8, %v6381_v9  ;;  %v9447_v16 = vld [vmem:[#allocation5 + $0x6c] sm:$0xf0]  ;;  %v6640_v18 = vor.u32 %v9515_v10, %v6637_v11  ;;  %v6349_v21 = vld [vmem:[#allocation5 + $0x70] sm:$0xf0]  ;;  %v9544_v5 = vld [vmem:[#allocation5 + $0x374] sm:$0xf0] }
  0x6d   :  { %1026 = vmatmul.bf16.vlgmr.msrb.gmra.mxu1 %v10590_v3  ;;  %1052 = vmatmul.bf16.vlgmr.msrb.gmra.mxu3 %v10590_v3  ;;  %v9507_v22 = vld [vmem:[#allocation5 + $0x254] sm:$0xf]  ;;  %v6315_v25 = vld [vmem:[#allocation5 + $0x10] sm:$0xf]  ;;  %v6485_v7 = vld [vmem:[#allocation5 + $0x178] sm:$0xf0]  ;;  %v6740_v11 = vor.u32 %v9544_v5, %v6739_v2 }
  0x6e   :  { %1070 = vmatpush.bf16.msra.mxu1 %v6796_v15  ;;  %1096 = vmatpush.bf16.msra.mxu3 %v6800_v20  ;;  %v6347_v15 = vld [vmem:[#allocation5 + $0x50] sm:$0xf]  ;;  %v9443_v20 = vld [vmem:[#allocation5 + $0x54] sm:$0xf]  ;;  %v9540_v8 = vld [vmem:[#allocation5 + $0x35c] sm:$0xf] }
  0x6f   :  { %v6605_v23 = vld [vmem:[#allocation5 + $0x270] sm:$0xf0]  ;;  %v6348_v24 = vor.u32 %v9447_v16, %v6347_v15  ;;  %v6571_v29 = vld [vmem:[#allocation5 + $0x210] sm:$0xf]  ;;  %v6741_v9 = vld [vmem:[#allocation5 + $0x378] sm:$0xf0] }
  0x70   :  { %1058 = vmatpush.bf16.msra.mxu0 %v6508_v26  ;;  %1084 = vmatpush.bf16.msra.mxu2 %v6512_v28  ;;  %v9439_v26 = vld [vmem:[#allocation5 + $0x2c] sm:$0xf0]  ;;  %v6352_v28 = vor.u32 %v9443_v20, %v6349_v21  ;;  %v9435_v31 = vld [vmem:[#allocation5 + $0x14] sm:$0xf]  ;;  %v6707_v15 = vld [vmem:[#allocation5 + $0x318] sm:$0xf]  ;;  %v6744_v16 = vor.u32 %v9540_v8, %v6741_v9 }
  0x71   :  { %v9503_v30 = vld [vmem:[#allocation5 + $0x22c] sm:$0xf0]  ;;  %v6317_v33 = vld [vmem:[#allocation5 + $0x30] sm:$0xf0]  ;;  %v9532_v20 = vld [vmem:[#allocation5 + $0x31c] sm:$0xf] }
  0x72   :  { %1071 = vmatpush.bf16.msra.mxu1 %v6764_v27  ;;  %1097 = vmatpush.bf16.msra.mxu3 %v6768_v32  ;;  %v6604_v27 = vor.u32 %v9511_v19, %v6603_v17  ;;  %v6608_v32 = vor.u32 %v9507_v22, %v6605_v23  ;;  %v9499_v34 = vld [vmem:[#allocation5 + $0x214] sm:$0xf]  ;;  %v6572_v43 = vor.u32 %v9503_v30, %v6571_v29  ;;  %v9536_v17 = vld [vmem:[#allocation5 + $0x334] sm:$0xf0]  ;;  %v6453_v19 = vld [vmem:[#allocation5 + $0x138] sm:$0xf0] }
  0x73   :  { %v6573_v35 = vld [vmem:[#allocation5 + $0x230] sm:$0xf0]  ;;  %v6709_v21 = vld [vmem:[#allocation5 + $0x338] sm:$0xf0]  ;;  %v6708_v23 = vor.u32 %v9536_v17, %v6707_v15  ;;  %v9528_v29 = vld [vmem:[#allocation5 + $0x2f4] sm:$0xf0] }
  0x74   :  { %1059 = vmatpush.bf16.msra.mxu0 %v6476_v38  ;;  %1085 = vmatpush.bf16.msra.mxu2 %v6480_v40  ;;  %v6803_v38 = vld [vmem:[#allocation5 + $0x3d8] sm:$0xf]  ;;  %v6576_v47 = vor.u32 %v9499_v34, %v6573_v35  ;;  %v9460_v30 = vld [vmem:[#allocation5 + $0xdc] sm:$0xf]  ;;  %v7035_v8 = vld [vmem:[#allocation8 + $0x1c0] sm:$0xf] }
  0x75   :  { %v9560_v40 = vld [vmem:[#allocation5 + $0x3f4] sm:$0xf0]  ;;  %v6645_v45 = vld [vmem:[#allocation5 + $0x2b8] sm:$0xf0]  ;;  %v9621_v9 = vld [vmem:[#allocation8 + $0x1dc] sm:$0xf0] }
  0x76   :  { %1072 = vmatpush.bf16.msra.mxu1 %v6732_v39  ;;  %1098 = vmatpush.bf16.msra.mxu3 %v6736_v44  ;;  %v6316_v39 = vor.u32 %v9439_v26, %v6315_v25  ;;  %v6320_v44 = vor.u32 %v9435_v31, %v6317_v33  ;;  %v6804_v49 = vor.u32 %v9560_v40, %v6803_v38  ;;  %v6419_v25 = vld [vmem:[#allocation5 + $0xd8] sm:$0xf]  ;;  %v6421_v31 = vld [vmem:[#allocation5 + $0xf8] sm:$0xf0]  ;;  %v7547_v17 = vld [vmem:[#allocation8 + $0x5c0] sm:$0xf] }
  0x77   :  { %v9464_v26 = vld [vmem:[#allocation5 + $0xf4] sm:$0xf0]  ;;  %v6677_v33 = vld [vmem:[#allocation5 + $0x2f8] sm:$0xf0]  ;;  %v6424_v36 = vor.u32 %v9460_v30, %v6421_v31  ;;  %v7227_v31 = vld [vmem:[#allocation8 + $0x340] sm:$0xf] }
  0x78   :  { %1060 = vmatpush.bf16.msra.mxu0 %v6444_v50  ;;  %1086 = vmatpush.bf16.msra.mxu2 %v6448_v52  ;;  %v6552_v50 = vor.u32 %v9492_v41, %v6549_v42  ;;  %v9488_v52 = vld [vmem:[#allocation5 + $0x1b4] sm:$0xf0]  ;;  %v6420_v34 = vor.u32 %v9464_v26, %v6419_v25  ;;  %v9452_v42 = vld [vmem:[#allocation5 + $0x9c] sm:$0xf]  ;;  %v7515_v26 = vld [vmem:[#allocation8 + $0x580] sm:$0xf] }
  0x79   :  { %v6387_v37 = vld [vmem:[#allocation5 + $0x98] sm:$0xf]  ;;  %v6357_v56 = vld [vmem:[#allocation5 + $0x78] sm:$0xf0] }
  0x7a   :  { %1073 = vmatpush.bf16.msra.mxu1 %v6700_v51  ;;  %1099 = vmatpush.bf16.msra.mxu3 %v6704_v57  ;;  %v6515_v51 = vld [vmem:[#allocation5 + $0x198] sm:$0xf]  ;;  %v9484_v57 = vld [vmem:[#allocation5 + $0x19c] sm:$0xf] }
  0x7b   :  { %v6516_v61 = vor.u32 %v9488_v52, %v6515_v51  ;;  %v9456_v38 = vld [vmem:[#allocation5 + $0xb4] sm:$0xf0]  ;;  %v6325_v5 = vld [vmem:[#allocation5 + $0x38] sm:$0xf0] }
  0x7c   :  { %1061 = vmatpush.bf16.msra.mxu0 %v6412_v63  ;;  %1087 = vmatpush.bf16.msra.mxu2 %v6416_v1  ;;  %v6520_v63 = vor.u32 %v9484_v57, %v6517_v58  ;;  %v9480_v1 = vld [vmem:[#allocation5 + $0x174] sm:$0xf0]  ;;  %v6388_v46 = vor.u32 %v9456_v38, %v6387_v37  ;;  %v9508_v57 = vld [vmem:[#allocation5 + $0x25c] sm:$0xf]  ;;  %v7195_v38 = vld [vmem:[#allocation8 + $0x300] sm:$0xf] }
  0x7d   :  { %v9520_v41 = vld [vmem:[#allocation5 + $0x2b4] sm:$0xf0]  ;;  %v6613_v58 = vld [vmem:[#allocation5 + $0x278] sm:$0xf0] }
  0x7e   :  { %1074 = vmatpush.bf16.msra.mxu1 %v6668_v0  ;;  %1100 = vmatpush.bf16.msra.mxu3 %v6672_v6  ;;  %v6483_v0 = vld [vmem:[#allocation5 + $0x158] sm:$0xf]  ;;  %v9476_v6 = vld [vmem:[#allocation5 + $0x15c] sm:$0xf]  ;;  %v6616_v2 = vor.u32 %v9508_v57, %v6613_v58  ;;  %v7771_v57 = vld [vmem:[#allocation8 + $0x780] sm:$0xf] }
  0x7f   :  { %v6484_v10 = vor.u32 %v9480_v1, %v6483_v0  ;;  %v6611_v51 = vld [vmem:[#allocation5 + $0x258] sm:$0xf]  ;;  %v9805_v58 = vld [vmem:[#allocation8 + $0x79c] sm:$0xf0] }
  0x80   :  { %1062 = vmatpush.bf16.msra.mxu0 %v6380_v12  ;;  %1088 = vmatpush.bf16.msra.mxu2 %v6384_v14  ;;  %v6488_v12 = vor.u32 %v9476_v6, %v6485_v7  ;;  %v9472_v14 = vld [vmem:[#allocation5 + $0x134] sm:$0xf0]  ;;  %v9500_v6 = vld [vmem:[#allocation5 + $0x21c] sm:$0xf] }
  0x81   :  { %v9512_v53 = vld [vmem:[#allocation5 + $0x274] sm:$0xf0]  ;;  %v6581_v7 = vld [vmem:[#allocation5 + $0x238] sm:$0xf0] }
  0x82   :  { %1075 = vmatpush.bf16.msra.mxu1 %v6636_v13  ;;  %1101 = vmatpush.bf16.msra.mxu3 %v6640_v18  ;;  %v6451_v13 = vld [vmem:[#allocation5 + $0x118] sm:$0xf]  ;;  %v9468_v18 = vld [vmem:[#allocation5 + $0x11c] sm:$0xf]  ;;  %v6584_v15 = vor.u32 %v9500_v6, %v6581_v7  ;;  %v6811_v6 = vld [vmem:[#allocation8] sm:$0xf] }
  0x83   :  { %v6452_v22 = vor.u32 %v9472_v14, %v6451_v13  ;;  %v6323_v60 = vld [vmem:[#allocation5 + $0x18] sm:$0xf] }
  0x84   :  { %1063 = vmatpush.bf16.msra.mxu0 %v6348_v24  ;;  %1089 = vmatpush.bf16.msra.mxu2 %v6352_v28  ;;  %v6456_v24 = vor.u32 %v9468_v18, %v6453_v19  ;;  %v6712_v28 = vor.u32 %v9532_v20, %v6709_v21  ;;  %v6579_v0 = vld [vmem:[#allocation5 + $0x218] sm:$0xf]  ;;  %v9749_v18 = vld [vmem:[#allocation8 + $0x5dc] sm:$0xf0] }
  0x85   :  { %v9504_v1 = vld [vmem:[#allocation5 + $0x234] sm:$0xf0]  ;;  %v7003_v19 = vld [vmem:[#allocation8 + $0x180] sm:$0xf] }
  0x86   :  { %1076 = vmatpush.bf16.msra.mxu1 %v6604_v27  ;;  %1102 = vmatpush.bf16.msra.mxu3 %v6608_v32  ;;  %v6675_v27 = vld [vmem:[#allocation5 + $0x2d8] sm:$0xf]  ;;  %v9524_v32 = vld [vmem:[#allocation5 + $0x2dc] sm:$0xf]  ;;  %v6580_v13 = vor.u32 %v9504_v1, %v6579_v0  ;;  %v9613_v20 = vld [vmem:[#allocation8 + $0x19c] sm:$0xf0] }
  0x87   :  { %v6676_v35 = vor.u32 %v9528_v29, %v6675_v27  ;;  %v6680_v40 = vor.u32 %v9524_v32, %v6677_v33  ;;  %v7004_v25 = vor.u32 %v9613_v20, %v7003_v19  ;;  %v9741_v27 = vld [vmem:[#allocation8 + $0x59c] sm:$0xf0] }
  0x88   :  { %1064 = vmatpush.bf16.msra.mxu0 %v6316_v39  ;;  %1090 = vmatpush.bf16.msra.mxu2 %v6320_v44  ;;  %v6643_v39 = vld [vmem:[#allocation5 + $0x298] sm:$0xf]  ;;  %v9516_v44 = vld [vmem:[#allocation5 + $0x29c] sm:$0xf]  ;;  %v9605_v29 = vld [vmem:[#allocation8 + $0x15c] sm:$0xf0]  ;;  %v7516_v33 = vor.u32 %v9741_v27, %v7515_v26 }
  0x89   :  { %v6648_v52 = vor.u32 %v9516_v44, %v6645_v45  ;;  %v9669_v32 = vld [vmem:[#allocation8 + $0x35c] sm:$0xf0] }
  0x8a   :  { %1077 = vmatpush.bf16.msra.mxu1 %v6572_v43  ;;  %1103 = vmatpush.bf16.msra.mxu3 %v6576_v47  ;;  %v6389_v43 = vld [vmem:[#allocation5 + $0xb8] sm:$0xf0]  ;;  %v6644_v47 = vor.u32 %v9520_v41, %v6643_v39  ;;  %v7228_v37 = vor.u32 %v9669_v32, %v7227_v31  ;;  %v9661_v39 = vld [vmem:[#allocation8 + $0x31c] sm:$0xf0] }
  0x8b   :  { %1065 = vmatmul.bf16.vlgmr.msra.gmra.mxu0 %v10586_v55  ;;  %1091 = vmatmul.bf16.vlgmr.msra.gmra.mxu2 %v10586_v55  ;;  %v9813_v41 = vld [vmem:[#allocation8 + $0x7dc] sm:$0xf0] }
  0x8c   :  { %1109 = vmatpush.bf16.msrb.mxu0 %v6548_v48  ;;  %1135 = vmatpush.bf16.msrb.mxu2 %v6552_v50  ;;  %v6392_v48 = vor.u32 %v9452_v42, %v6389_v43  ;;  %v9448_v50 = vld [vmem:[#allocation5 + $0x74] sm:$0xf0]  ;;  %v6907_v43 = vld [vmem:[#allocation8 + $0xc0] sm:$0xf] }
  0x8d   :  { %1078 = vmatmul.bf16.vlgmr.msra.gmra.mxu1 %v10590_v3  ;;  %1104 = vmatmul.bf16.vlgmr.msra.gmra.mxu3 %v10590_v3  ;;  %v9589_v44 = vld [vmem:[#allocation8 + $0xdc] sm:$0xf0] }
  0x8e   :  { %1122 = vmatpush.bf16.msrb.mxu1 %v6804_v49  ;;  %1148 = vmatpush.bf16.msrb.mxu3 %v6808_v54  ;;  %v6355_v49 = vld [vmem:[#allocation5 + $0x58] sm:$0xf]  ;;  %v9444_v54 = vld [vmem:[#allocation5 + $0x5c] sm:$0xf]  ;;  %v7163_v45 = vld [vmem:[#allocation8 + $0x2c0] sm:$0xf] }
  0x8f   :  { %v6356_v59 = vor.u32 %v9448_v50, %v6355_v49  ;;  %v9581_v49 = vld [vmem:[#allocation8 + $0x9c] sm:$0xf0] }
  0x90   :  { %1110 = vmatpush.bf16.msrb.mxu0 %v6516_v61  ;;  %1136 = vmatpush.bf16.msrb.mxu2 %v6520_v63  ;;  %v6612_v61 = vor.u32 %v9512_v53, %v6611_v51  ;;  %v9440_v63 = vld [vmem:[#allocation5 + $0x34] sm:$0xf0]  ;;  %v7131_v51 = vld [vmem:[#allocation8 + $0x280] sm:$0xf] }
  0x91   :  { %v7483_v53 = vld [vmem:[#allocation8 + $0x540] sm:$0xf] }
  0x92   :  { %1123 = vmatpush.bf16.msrb.mxu1 %v6772_v62  ;;  %1149 = vmatpush.bf16.msrb.mxu3 %v6776_v4  ;;  %v6360_v62 = vor.u32 %v9444_v54, %v6357_v56  ;;  %v9436_v4 = vld [vmem:[#allocation5 + $0x1c] sm:$0xf]  ;;  %v9733_v54 = vld [vmem:[#allocation8 + $0x55c] sm:$0xf0] }
  0x93   :  { %v6328_v14 = vor.u32 %v9436_v4, %v6325_v5  ;;  %v7484_v56 = vor.u32 %v9733_v54, %v7483_v53  ;;  %v7451_v0 = vld [vmem:[#allocation8 + $0x500] sm:$0xf] }
  0x94   :  { %1111 = vmatpush.bf16.msrb.mxu0 %v6484_v10  ;;  %1137 = vmatpush.bf16.msrb.mxu2 %v6488_v12  ;;  %v6324_v10 = vor.u32 %v9440_v63, %v6323_v60  ;;  %v9685_v12 = vld [vmem:[#allocation8 + $0x3dc] sm:$0xf0] }
  0x95   :  { %v6843_v60 = vld [vmem:[#allocation8 + $0x40] sm:$0xf] }
  0x96   :  { %1124 = vmatpush.bf16.msrb.mxu1 %v6740_v11  ;;  %1150 = vmatpush.bf16.msrb.mxu3 %v6744_v16  ;;  %v7291_v11 = vld [vmem:[#allocation8 + $0x3c0] sm:$0xf]  ;;  %v7036_v16 = vor.u32 %v9621_v9, %v7035_v8 }
  0x97   :  { %v7292_v21 = vor.u32 %v9685_v12, %v7291_v11  ;;  %v9725_v1 = vld [vmem:[#allocation8 + $0x51c] sm:$0xf0] }
  0x98   :  { %1112 = vmatpush.bf16.msrb.mxu0 %v6452_v22  ;;  %1138 = vmatpush.bf16.msrb.mxu2 %v6456_v24  ;;  %v7259_v22 = vld [vmem:[#allocation8 + $0x380] sm:$0xf]  ;;  %v7548_v24 = vor.u32 %v9749_v18, %v7547_v17  ;;  %v7452_v5 = vor.u32 %v9725_v1, %v7451_v0 }
  0x99   :  { %v9637_v4 = vld [vmem:[#allocation8 + $0x25c] sm:$0xf0] }
  0x9a   :  { %1125 = vmatpush.bf16.msrb.mxu1 %v6708_v23  ;;  %1151 = vmatpush.bf16.msrb.mxu3 %v6712_v28  ;;  %v9677_v23 = vld [vmem:[#allocation8 + $0x39c] sm:$0xf0] }
  0x9b   :  { %v6971_v28 = vld [vmem:[#allocation8 + $0x140] sm:$0xf]  ;;  %v7260_v30 = vor.u32 %v9677_v23, %v7259_v22 }
  0x9c   :  { %1113 = vmatpush.bf16.msrb.mxu0 %v6420_v34  ;;  %1139 = vmatpush.bf16.msrb.mxu2 %v6424_v36  ;;  %v6972_v34 = vor.u32 %v9605_v29, %v6971_v28  ;;  %v9597_v36 = vld [vmem:[#allocation8 + $0x11c] sm:$0xf0] }
  0x9d   :  { %v9565_v8 = vld [vmem:[#allocation8 + $0x1c] sm:$0xf0] }
  0x9e   :  { %1126 = vmatpush.bf16.msrb.mxu1 %v6676_v35  ;;  %1152 = vmatpush.bf16.msrb.mxu3 %v6680_v40  ;;  %v6939_v35 = vld [vmem:[#allocation8 + $0x100] sm:$0xf]  ;;  %v6812_v23 = vor.u32 %v9565_v8, %v6811_v6 }
  0x9f   :  { %v7803_v40 = vld [vmem:[#allocation8 + $0x7c0] sm:$0xf] }
  0xa0   :  { %1114 = vmatpush.bf16.msrb.mxu0 %v6388_v46  ;;  %1140 = vmatpush.bf16.msrb.mxu2 %v6392_v48  ;;  %v7804_v42 = vor.u32 %v9813_v41, %v7803_v40  ;;  %v9653_v46 = vld [vmem:[#allocation8 + $0x2dc] sm:$0xf0] }
  0xa1   :  { %v6875_v48 = vld [vmem:[#allocation8 + $0x80] sm:$0xf]  ;;  %v7164_v50 = vor.u32 %v9653_v46, %v7163_v45 }
  0xa2   :  { %1127 = vmatpush.bf16.msrb.mxu1 %v6644_v47  ;;  %1153 = vmatpush.bf16.msrb.mxu3 %v6648_v52  ;;  %v6908_v47 = vor.u32 %v9589_v44, %v6907_v43  ;;  %v9645_v52 = vld [vmem:[#allocation8 + $0x29c] sm:$0xf0] }
  0xa3   :  { %v7132_v63 = vor.u32 %v9645_v52, %v7131_v51  ;;  %v8059_v9 = vld [vmem:[#allocation8 + $0x9c0] sm:$0xf] }
  0xa4   :  { %1115 = vmatpush.bf16.msrb.mxu0 %v6356_v59  ;;  %1141 = vmatpush.bf16.msrb.mxu2 %v6360_v62  ;;  %v6876_v59 = vor.u32 %v9581_v49, %v6875_v48  ;;  %v9573_v62 = vld [vmem:[#allocation8 + $0x5c] sm:$0xf0] }
  0xa5   :  { %v6844_v7 = vor.u32 %v9573_v62, %v6843_v60  ;;  %v7067_v12 = vld [vmem:[#allocation8 + $0x200] sm:$0xf] }
  0xa6   :  { %1128 = vmatpush.bf16.msrb.mxu1 %v6612_v61  ;;  %1154 = vmatpush.bf16.msrb.mxu3 %v6616_v2  ;;  %v7772_v61 = vor.u32 %v9805_v58, %v7771_v57  ;;  %v7099_v2 = vld [vmem:[#allocation8 + $0x240] sm:$0xf] }
  0xa7   :  { %v7100_v11 = vor.u32 %v9637_v4, %v7099_v2  ;;  %v7419_v17 = vld [vmem:[#allocation8 + $0x4c0] sm:$0xf] }
  0xa8   :  { %1116 = vmatpush.bf16.msrb.mxu0 %v6324_v10  ;;  %1142 = vmatpush.bf16.msrb.mxu2 %v6328_v14  ;;  %v9877_v10 = vld [vmem:[#allocation8 + $0x9dc] sm:$0xf0] }
  0xa9   :  { %v9797_v14 = vld [vmem:[#allocation8 + $0x75c] sm:$0xf0] }
  0xaa   :  { %1129 = vmatpush.bf16.msrb.mxu1 %v6580_v13  ;;  %1155 = vmatpush.bf16.msrb.mxu3 %v6584_v15  ;;  %v7739_v13 = vld [vmem:[#allocation8 + $0x740] sm:$0xf] }
  0xab   :  { %1117 = vmatmul.bf16.vlgmr.msrb.gmra.mxu0 %v10586_v55  ;;  %1143 = vmatmul.bf16.vlgmr.msrb.gmra.mxu2 %v10586_v55  ;;  %v6940_v55 = vor.u32 %v9597_v36, %v6939_v35  ;;  %v9629_v15 = vld [vmem:[#allocation8 + $0x21c] sm:$0xf0] }
  0xac   :  { %4267 = vmatpush.bf16.msra.mxu0 %v7036_v16  ;;  %4293 = vmatpush.bf16.msra.mxu2 %v7548_v24  ;;  %v7740_v16 = vor.u32 %v9797_v14, %v7739_v13  ;;  %v9717_v18 = vld [vmem:[#allocation8 + $0x4dc] sm:$0xf0]  ;;  %v7068_v26 = vor.u32 %v9629_v15, %v7067_v12 }
  0xad   :  { %1130 = vmatmul.bf16.vlgmr.msrb.gmra.mxu1 %v10590_v3  ;;  %1156 = vmatmul.bf16.vlgmr.msrb.gmra.mxu3 %v10590_v3  ;;  %v7196_v3 = vor.u32 %v9661_v39, %v7195_v38  ;;  %v8315_v19 = vld [vmem:[#allocation8 + $0xbc0] sm:$0xf] }
  0xae   :  { %4280 = vmatpush.bf16.msra.mxu1 %v7292_v21  ;;  %4306 = vmatpush.bf16.msra.mxu3 %v7804_v42  ;;  %v9941_v20 = vld [vmem:[#allocation8 + $0xbdc] sm:$0xf0]  ;;  %v7420_v21 = vor.u32 %v9717_v18, %v7419_v17 }
  0xaf   :  { %v7707_v22 = vld [vmem:[#allocation8 + $0x700] sm:$0xf]  ;;  %v8316_v32 = vor.u32 %v9941_v20, %v8315_v19 }
  0xb0   :  { %4268 = vmatpush.bf16.msra.mxu0 %v7004_v25  ;;  %4294 = vmatpush.bf16.msra.mxu2 %v7516_v33  ;;  %v9789_v24 = vld [vmem:[#allocation8 + $0x71c] sm:$0xf0]  ;;  %v8060_v25 = vor.u32 %v9877_v10, %v8059_v9 }
  0xb1   :  { %v7708_v27 = vor.u32 %v9789_v24, %v7707_v22  ;;  %v7387_v28 = vld [vmem:[#allocation8 + $0x480] sm:$0xf] }
  0xb2   :  { %4281 = vmatpush.bf16.msra.mxu1 %v7260_v30  ;;  %4307 = vmatpush.bf16.msra.mxu3 %v7772_v61  ;;  %v9709_v29 = vld [vmem:[#allocation8 + $0x49c] sm:$0xf0] }
  0xb3   :  { %v8027_v30 = vld [vmem:[#allocation8 + $0x980] sm:$0xf]  ;;  %v7388_v33 = vor.u32 %v9709_v29, %v7387_v28 }
  0xb4   :  { %4269 = vmatpush.bf16.msra.mxu0 %v6972_v34  ;;  %4295 = vmatpush.bf16.msra.mxu2 %v7484_v56  ;;  %v9869_v31 = vld [vmem:[#allocation8 + $0x99c] sm:$0xf0] }
  0xb5   :  { %v8283_v34 = vld [vmem:[#allocation8 + $0xb80] sm:$0xf]  ;;  %v8028_v36 = vor.u32 %v9869_v31, %v8027_v30 }
  0xb6   :  { %4282 = vmatpush.bf16.msra.mxu1 %v7228_v37  ;;  %4308 = vmatpush.bf16.msra.mxu3 %v7740_v16  ;;  %v9933_v35 = vld [vmem:[#allocation8 + $0xb9c] sm:$0xf0]  ;;  %v10606_v37 = vld [vmem:[#allocation7] sm:$0xff] }
  0xb7   :  { %v7995_v38 = vld [vmem:[#allocation8 + $0x940] sm:$0xf]  ;;  %v8284_v40 = vor.u32 %v9933_v35, %v8283_v34  ;;  %v298_v4 = vperm.slane %v10606_v37, 1 }
  0xb8   :  { %4270 = vmatpush.bf16.msra.mxu0 %v6940_v55  ;;  %4296 = vmatpush.bf16.msra.mxu2 %v7452_v5  ;;  %v9861_v39 = vld [vmem:[#allocation8 + $0x95c] sm:$0xf0]  ;;  %v297_v55 = vperm.slane %v10606_v37, 0 }
  0xb9   :  { %v8251_v41 = vld [vmem:[#allocation8 + $0xb40] sm:$0xf]  ;;  %v7996_v43 = vor.u32 %v9861_v39, %v7995_v38 }
  0xba   :  { %4283 = vmatpush.bf16.msra.mxu1 %v7196_v3  ;;  %4309 = vmatpush.bf16.msra.mxu3 %v7708_v27  ;;  %v9925_v42 = vld [vmem:[#allocation8 + $0xb5c] sm:$0xf0] }
  0xbb   :  { %v7963_v44 = vld [vmem:[#allocation8 + $0x900] sm:$0xf]  ;;  %v8252_v45 = vor.u32 %v9925_v42, %v8251_v41 }
  0xbc   :  { %4271 = vmatpush.bf16.msra.mxu0 %v6908_v47  ;;  %4297 = vmatpush.bf16.msra.mxu2 %v7420_v21  ;;  %v9853_v3 = vld [vmem:[#allocation8 + $0x91c] sm:$0xf0] }
  0xbd   :  { %v8219_v46 = vld [vmem:[#allocation8 + $0xb00] sm:$0xf]  ;;  %v7964_v52 = vor.u32 %v9853_v3, %v7963_v44  ;;  %v7037_v44 = vld [vmem:[#allocation8 + $0x1e0] sm:$0xf0] }
  0xbe   :  { %4284 = vmatpush.bf16.msra.mxu1 %v7164_v50  ;;  %v9917_v47 = vld [vmem:[#allocation8 + $0xb1c] sm:$0xf0] }
  0xbf   :  { %v7675_v48 = vld [vmem:[#allocation8 + $0x6c0] sm:$0xf] }
  0xc0   :  { %4272 = vmatpush.bf16.msra.mxu0 %v6876_v59  ;;  %4298 = vmatpush.bf16.msra.mxu2 %v7388_v33  ;;  %v9781_v49 = vld [vmem:[#allocation8 + $0x6dc] sm:$0xf0]  ;;  %v8220_v59 = vor.u32 %v9917_v47, %v8219_v46 }
  0xc1   :  { %v7676_v50 = vor.u32 %v9781_v49, %v7675_v48  ;;  %v7355_v53 = vld [vmem:[#allocation8 + $0x440] sm:$0xf] }
  0xc2   :  { %4285 = vmatpush.bf16.msra.mxu1 %v7132_v63  ;;  %v9701_v54 = vld [vmem:[#allocation8 + $0x45c] sm:$0xf0] }
  0xc3   :  { %v7931_v57 = vld [vmem:[#allocation8 + $0x8c0] sm:$0xf]  ;;  %4310 = vmatpush.bf16.msra.mxu3 %v7676_v50  ;;  %v7356_v60 = vor.u32 %v9701_v54, %v7355_v53  ;;  %v9681_v54 = vld [vmem:[#allocation8 + $0x3c4] sm:$0xf] }
  0xc4   :  { %4273 = vmatpush.bf16.msra.mxu0 %v6844_v7  ;;  %v9845_v58 = vld [vmem:[#allocation8 + $0x8dc] sm:$0xf0] }
  0xc5   :  { %v8187_v61 = vld [vmem:[#allocation8 + $0xac0] sm:$0xf]  ;;  %4299 = vmatpush.bf16.msra.mxu2 %v7356_v60  ;;  %v7932_v5 = vor.u32 %v9845_v58, %v7931_v57 }
  0xc6   :  { %4286 = vmatpush.bf16.msra.mxu1 %v7100_v11  ;;  %v9909_v62 = vld [vmem:[#allocation8 + $0xadc] sm:$0xf0] }
  0xc7   :  { %v7643_v63 = vld [vmem:[#allocation8 + $0x680] sm:$0xf]  ;;  %v8188_v11 = vor.u32 %v9909_v62, %v8187_v61 }
  0xc8   :  { %4274 = vmatpush.bf16.msra.mxu0 %v6812_v23  ;;  %v962_v51 = vpop.f32.mrf.mxu0  ;;  %v9773_v0 = vld [vmem:[#allocation8 + $0x69c] sm:$0xf0] }
  0xc9   :  { %v963_v56 = vadd.f32 %v962_v51, %v297_v55  ;;  %v7644_v1 = vor.u32 %v9773_v0, %v7643_v63  ;;  %v7323_v6 = vld [vmem:[#allocation8 + $0x400] sm:$0xf] }
  0xca   :  { %4287 = vmatpush.bf16.msra.mxu1 %v7068_v26  ;;  %v975_v2 = vpop.f32.mrf.mxu1  ;;  %v9693_v7 = vld [vmem:[#allocation8 + $0x41c] sm:$0xf0] }
  0xcb   :  { %v976_v8 = vadd.f32 %v975_v2, %v963_v56  ;;  %v7899_v9 = vld [vmem:[#allocation8 + $0x880] sm:$0xf]  ;;  %4311 = vmatpush.bf16.msra.mxu3 %v7644_v1  ;;  %v7324_v12 = vor.u32 %v9693_v7, %v7323_v6  ;;  %v7293_v56 = vld [vmem:[#allocation8 + $0x3e0] sm:$0xf0] }
  0xcc   :  { %4319 = vmatpush.bf16.msrb.mxu0 %v8060_v25  ;;  %v9837_v10 = vld [vmem:[#allocation8 + $0x89c] sm:$0xf0]  ;;  %v7005_v6 = vld [vmem:[#allocation8 + $0x1a0] sm:$0xf0]  ;;  %v7296_v7 = vor.u32 %v9681_v54, %v7293_v56 }
  0xcd   :  { %v8155_v13 = vld [vmem:[#allocation8 + $0xa80] sm:$0xf]  ;;  %v1161_v17 = vmax.f32 %v976_v8, 0.0  ;;  %4300 = vmatpush.bf16.msra.mxu2 %v7324_v12  ;;  %v7900_v23 = vor.u32 %v9837_v10, %v7899_v9  ;;  %v9673_v10 = vld [vmem:[#allocation8 + $0x384] sm:$0xf] }
  0xce   :  { %4332 = vmatpush.bf16.msrb.mxu1 %v8316_v32  ;;  %v9901_v14 = vld [vmem:[#allocation8 + $0xa9c] sm:$0xf0]  ;;  %v988_v18 = vpop.f32.mrf.mxu2  ;;  %v9577_v56 = vld [vmem:[#allocation8 + $0x84] sm:$0xf] }
  0xcf   :  { %v7611_v15 = vld [vmem:[#allocation8 + $0x640] sm:$0xf]  ;;  %v989_v21 = vadd.f32 %v988_v18, %v298_v4  ;;  %v10610_v25 = vpack.c.bf16 %v1161_v17, %v1161_v17  ;;  %v8156_v28 = vor.u32 %v9901_v14, %v8155_v13 }
  0xd0   :  { %4320 = vmatpush.bf16.msrb.mxu0 %v8028_v36  ;;  %v9765_v16 = vld [vmem:[#allocation8 + $0x65c] sm:$0xf0]  ;;  %v964_v22 = vpop.f32.mrf.mxu0  ;;  %v1001_v34 = vpop.f32.mrf.mxu3 }
  0xd1   :  { %v7612_v19 = vor.u32 %v9765_v16, %v7611_v15  ;;  %v8571_v20 = vld [vmem:[#allocation8 + $0xdc0] sm:$0xf]  ;;  %4275 = vmatmul.bf16.vlgmr.msra.gmra.mxu0 %v10610_v25 }
  0xd2   :  { %4333 = vmatpush.bf16.msrb.mxu1 %v8284_v40  ;;  %v10005_v24 = vld [vmem:[#allocation8 + $0xddc] sm:$0xf0]  ;;  %v1002_v40 = vadd.f32 %v1001_v34, %v989_v21  ;;  %v977_v41 = vpop.f32.mrf.mxu1  ;;  %v6973_v21 = vld [vmem:[#allocation8 + $0x160] sm:$0xf0] }
  0xd3   :  { %v7867_v26 = vld [vmem:[#allocation8 + $0x840] sm:$0xf]  ;;  %4312 = vmatpush.bf16.msra.mxu3 %v7612_v19  ;;  %v8572_v29 = vor.u32 %v10005_v24, %v8571_v20  ;;  %v9601_v20 = vld [vmem:[#allocation8 + $0x144] sm:$0xf] }
  0xd4   :  { %4321 = vmatpush.bf16.msrb.mxu0 %v7996_v43  ;;  %v9829_v27 = vld [vmem:[#allocation8 + $0x85c] sm:$0xf0]  ;;  %v9617_v43 = vld [vmem:[#allocation8 + $0x1c4] sm:$0xf]  ;;  %v1162_v49 = vmax.f32 %v1002_v40, 0.0 }
  0xd5   :  { %v8123_v30 = vld [vmem:[#allocation8 + $0xa40] sm:$0xf]  ;;  %4345 = vmatpush.bf16.msrb.mxu2 %v8572_v29  ;;  %v7868_v42 = vor.u32 %v9829_v27, %v7867_v26  ;;  %v7040_v63 = vor.u32 %v9617_v43, %v7037_v44  ;;  %v7229_v24 = vld [vmem:[#allocation8 + $0x360] sm:$0xf0]  ;;  %v6976_v29 = vor.u32 %v9601_v20, %v6973_v21 }
  0xd6   :  { %4334 = vmatpush.bf16.msrb.mxu1 %v8252_v45  ;;  %v9893_v31 = vld [vmem:[#allocation8 + $0xa5c] sm:$0xf0]  ;;  %v990_v53 = vpop.f32.mrf.mxu2  ;;  %v10613_v58 = vpack.c.bf16 %v1162_v49, %v1162_v49  ;;  %v7197_v34 = vld [vmem:[#allocation8 + $0x320] sm:$0xf0] }
  0xd7   :  { %v7579_v32 = vld [vmem:[#allocation8 + $0x600] sm:$0xf]  ;;  %v8124_v45 = vor.u32 %v9893_v31, %v8123_v30  ;;  %v9593_v30 = vld [vmem:[#allocation8 + $0x104] sm:$0xf] }
  0xd8   :  { %4322 = vmatpush.bf16.msrb.mxu0 %v7964_v52  ;;  %v9757_v33 = vld [vmem:[#allocation8 + $0x61c] sm:$0xf0]  ;;  %4288 = vmatmul.bf16.vlgmr.msra.gmra.mxu1 %v10613_v58  ;;  %v1003_v9 = vpop.f32.mrf.mxu3  ;;  %v6941_v31 = vld [vmem:[#allocation8 + $0x120] sm:$0xf0] }
  0xd9   :  { %v7835_v35 = vld [vmem:[#allocation8 + $0x800] sm:$0xf]  ;;  %v7580_v36 = vor.u32 %v9757_v33, %v7579_v32  ;;  %v9657_v33 = vld [vmem:[#allocation8 + $0x304] sm:$0xf] }
  0xda   :  { %4335 = vmatpush.bf16.msrb.mxu1 %v8220_v59  ;;  %v8539_v38 = vld [vmem:[#allocation8 + $0xd80] sm:$0xf]  ;;  %v6909_v43 = vld [vmem:[#allocation8 + $0xe0] sm:$0xf0]  ;;  %v7200_v44 = vor.u32 %v9657_v33, %v7197_v34 }
  0xdb   :  { %v9997_v39 = vld [vmem:[#allocation8 + $0xd9c] sm:$0xf0]  ;;  %4313 = vmatpush.bf16.msra.mxu3 %v7580_v36  ;;  %v6813_v34 = vld [vmem:[#allocation8 + $0x20] sm:$0xf0] }
  0xdc   :  { %4323 = vmatpush.bf16.msrb.mxu0 %v7932_v5  ;;  %v9821_v55 = vld [vmem:[#allocation8 + $0x81c] sm:$0xf0]  ;;  %v8540_v3 = vor.u32 %v9997_v39, %v8539_v38  ;;  %v9609_v5 = vld [vmem:[#allocation8 + $0x184] sm:$0xf]  ;;  %v6944_v39 = vor.u32 %v9593_v30, %v6941_v31 }
  0xdd   :  { %v8091_v46 = vld [vmem:[#allocation8 + $0xa00] sm:$0xf]  ;;  %v7836_v59 = vor.u32 %v9821_v55, %v7835_v35  ;;  %v7008_v17 = vor.u32 %v9609_v5, %v7005_v6  ;;  %v9585_v55 = vld [vmem:[#allocation8 + $0xc4] sm:$0xf] }
  0xde   :  { %4336 = vmatpush.bf16.msrb.mxu1 %v8188_v11  ;;  %v8827_v47 = vld [vmem:[#allocation8 + $0xfc0] sm:$0xf]  ;;  %4346 = vmatpush.bf16.msrb.mxu2 %v8540_v3  ;;  %v7261_v11 = vld [vmem:[#allocation8 + $0x3a0] sm:$0xf0]  ;;  %v6912_v54 = vor.u32 %v9585_v55, %v6909_v43 }
  0xdf   :  { %v10069_v48 = vld [vmem:[#allocation8 + $0xfdc] sm:$0xf0]  ;;  %v7264_v22 = vor.u32 %v9673_v10, %v7261_v11  ;;  %v9745_v6 = vld [vmem:[#allocation8 + $0x5c4] sm:$0xf] }
  0xe0   :  { %4324 = vmatpush.bf16.msrb.mxu0 %v7900_v23  ;;  %v9885_v50 = vld [vmem:[#allocation8 + $0xa1c] sm:$0xf0]  ;;  %v8828_v51 = vor.u32 %v10069_v48, %v8827_v47  ;;  %v9665_v23 = vld [vmem:[#allocation8 + $0x344] sm:$0xf] }
  0xe1   :  { %v8507_v52 = vld [vmem:[#allocation8 + $0xd40] sm:$0xf]  ;;  %v8092_v0 = vor.u32 %v9885_v50, %v8091_v46  ;;  %v7232_v32 = vor.u32 %v9665_v23, %v7229_v24  ;;  %v7165_v48 = vld [vmem:[#allocation8 + $0x2e0] sm:$0xf0] }
  0xe2   :  { %4337 = vmatpush.bf16.msrb.mxu1 %v8156_v28  ;;  %v9989_v57 = vld [vmem:[#allocation8 + $0xd5c] sm:$0xf0]  ;;  %4358 = vmatpush.bf16.msrb.mxu3 %v8828_v51  ;;  %v299_v28 = vperm.slane %v10606_v37, 2  ;;  %v300_v51 = vperm.slane %v10606_v37, 3  ;;  %v9569_v10 = vld [vmem:[#allocation8 + $0x44] sm:$0xf] }
  0xe3   :  { %v8508_v60 = vor.u32 %v9989_v57, %v8507_v52  ;;  %v8795_v61 = vld [vmem:[#allocation8 + $0xf80] sm:$0xf]  ;;  %v7549_v11 = vld [vmem:[#allocation8 + $0x5e0] sm:$0xf0] }
  0xe4   :  { %4325 = vmatpush.bf16.msrb.mxu0 %v7868_v42  ;;  %v10061_v62 = vld [vmem:[#allocation8 + $0xf9c] sm:$0xf0]  ;;  %v7101_v23 = vld [vmem:[#allocation8 + $0x260] sm:$0xf0] }
  0xe5   :  { %v8796_v1 = vor.u32 %v10061_v62, %v8795_v61  ;;  %v8475_v2 = vld [vmem:[#allocation8 + $0xd00] sm:$0xf]  ;;  %4347 = vmatpush.bf16.msrb.mxu2 %v8508_v60  ;;  %v6877_v60 = vld [vmem:[#allocation8 + $0xa0] sm:$0xf0] }
  0xe6   :  { %4338 = vmatpush.bf16.msrb.mxu1 %v8124_v45  ;;  %v9981_v4 = vld [vmem:[#allocation8 + $0xd1c] sm:$0xf0]  ;;  %v9649_v45 = vld [vmem:[#allocation8 + $0x2c4] sm:$0xf]  ;;  %v6880_v9 = vor.u32 %v9577_v56, %v6877_v60 }
  0xe7   :  { %v8763_v8 = vld [vmem:[#allocation8 + $0xf40] sm:$0xf]  ;;  %v8476_v12 = vor.u32 %v9981_v4, %v8475_v2  ;;  %4359 = vmatpush.bf16.msrb.mxu3 %v8796_v1  ;;  %v7168_v61 = vor.u32 %v9649_v45, %v7165_v48  ;;  %v9729_v43 = vld [vmem:[#allocation8 + $0x544] sm:$0xf] }
  0xe8   :  { %v10053_v13 = vld [vmem:[#allocation8 + $0xf5c] sm:$0xf0]  ;;  %4326 = vmatpush.bf16.msrb.mxu0 %v7836_v59  ;;  %v1014_v42 = vpop.f32.mrf.mxu0  ;;  %v9793_v56 = vld [vmem:[#allocation8 + $0x744] sm:$0xf] }
  0xe9   :  { %v8764_v14 = vor.u32 %v10053_v13, %v8763_v8  ;;  %v8443_v15 = vld [vmem:[#allocation8 + $0xcc0] sm:$0xf]  ;;  %4348 = vmatpush.bf16.msrb.mxu2 %v8476_v12  ;;  %v1015_v46 = vadd.f32 %v1014_v42, %v299_v28  ;;  %v9713_v60 = vld [vmem:[#allocation8 + $0x4c4] sm:$0xf] }
  0xea   :  { %v9973_v16 = vld [vmem:[#allocation8 + $0xcdc] sm:$0xf0]  ;;  %4339 = vmatpush.bf16.msrb.mxu1 %v8092_v0  ;;  %v1027_v47 = vpop.f32.mrf.mxu1  ;;  %v7133_v0 = vld [vmem:[#allocation8 + $0x2a0] sm:$0xf0] }
  0xeb   :  { %v8731_v18 = vld [vmem:[#allocation8 + $0xf00] sm:$0xf]  ;;  %v8444_v26 = vor.u32 %v9973_v16, %v8443_v15  ;;  %4360 = vmatpush.bf16.msrb.mxu3 %v8764_v14  ;;  %v1028_v53 = vadd.f32 %v1027_v47, %v1015_v46  ;;  %v6845_v15 = vld [vmem:[#allocation8 + $0x60] sm:$0xf0] }
  0xec   :  { %4371 = vmatpush.bf16.msra.mxu0 %v7040_v63  ;;  %v10045_v19 = vld [vmem:[#allocation8 + $0xf1c] sm:$0xf0]  ;;  %v9641_v63 = vld [vmem:[#allocation8 + $0x284] sm:$0xf]  ;;  %v6848_v28 = vor.u32 %v9569_v10, %v6845_v15 }
  0xed   :  { %v8732_v27 = vor.u32 %v10045_v19, %v8731_v18  ;;  %4349 = vmatpush.bf16.msrb.mxu2 %v8444_v26  ;;  %v8411_v35 = vld [vmem:[#allocation8 + $0xc80] sm:$0xf]  ;;  %v1163_v1 = vmax.f32 %v1028_v53, 0.0  ;;  %v7136_v16 = vor.u32 %v9641_v63, %v7133_v0  ;;  %v9737_v26 = vld [vmem:[#allocation8 + $0x584] sm:$0xf] }
  0xee   :  { %4384 = vmatpush.bf16.msra.mxu1 %v7296_v7  ;;  %v9965_v36 = vld [vmem:[#allocation8 + $0xc9c] sm:$0xf0]  ;;  %v1040_v8 = vpop.f32.mrf.mxu2  ;;  %v7453_v53 = vld [vmem:[#allocation8 + $0x520] sm:$0xf0] }
  0xef   :  { %4361 = vmatpush.bf16.msrb.mxu3 %v8732_v27  ;;  %v8412_v38 = vor.u32 %v9965_v36, %v8411_v35  ;;  %v8699_v40 = vld [vmem:[#allocation8 + $0xec0] sm:$0xf]  ;;  %v10618_v7 = vpack.c.bf16 %v1163_v1, %v1163_v1  ;;  %v1041_v12 = vadd.f32 %v1040_v8, %v300_v51  ;;  %v7517_v27 = vld [vmem:[#allocation8 + $0x5a0] sm:$0xf0] }
  0xf0   :  { %4372 = vmatpush.bf16.msra.mxu0 %v7008_v17  ;;  %v10037_v41 = vld [vmem:[#allocation8 + $0xedc] sm:$0xf0]  ;;  %v1053_v13 = vpop.f32.mrf.mxu3  ;;  %v1016_v14 = vpop.f32.mrf.mxu0  ;;  %v7552_v17 = vor.u32 %v9745_v6, %v7549_v11  ;;  %v7520_v30 = vor.u32 %v9737_v26, %v7517_v27  ;;  %v9625_v36 = vld [vmem:[#allocation8 + $0x204] sm:$0xf] }
  0xf1   :  { %v8700_v3 = vor.u32 %v10037_v41, %v8699_v40  ;;  %4350 = vmatpush.bf16.msrb.mxu2 %v8412_v38  ;;  %v8379_v49 = vld [vmem:[#allocation8 + $0xc40] sm:$0xf]  ;;  %v1054_v24 = vadd.f32 %v1053_v13, %v1041_v12  ;;  %v9809_v40 = vld [vmem:[#allocation8 + $0x7c4] sm:$0xf] }
  0xf2   :  { %4385 = vmatpush.bf16.msra.mxu1 %v7264_v22  ;;  %v9957_v50 = vld [vmem:[#allocation8 + $0xc5c] sm:$0xf0]  ;;  %4301 = vmatmul.bf16.vlgmr.msra.gmra.mxu2 %v10618_v7  ;;  %v1029_v20 = vpop.f32.mrf.mxu1  ;;  %v9633_v22 = vld [vmem:[#allocation8 + $0x244] sm:$0xf] }
  0xf3   :  { %4362 = vmatpush.bf16.msrb.mxu3 %v8700_v3  ;;  %v8380_v52 = vor.u32 %v9957_v50, %v8379_v49  ;;  %v8667_v57 = vld [vmem:[#allocation8 + $0xe80] sm:$0xf]  ;;  %v1164_v33 = vmax.f32 %v1054_v24, 0.0  ;;  %v7104_v35 = vor.u32 %v9633_v22, %v7101_v23  ;;  %v7805_v41 = vld [vmem:[#allocation8 + $0x7e0] sm:$0xf0]  ;;  %v302_v22 = vperm.slane %v10606_v37, 5 }
  0xf4   :  { %4373 = vmatpush.bf16.msra.mxu0 %v6976_v29  ;;  %v10029_v59 = vld [vmem:[#allocation8 + $0xe9c] sm:$0xf0]  ;;  %v9561_v29 = vld [vmem:[#allocation8 + $0x4] sm:$0xf]  ;;  %v7808_v55 = vor.u32 %v9809_v40, %v7805_v41 }
  0xf5   :  { %v8668_v62 = vor.u32 %v10029_v59, %v8667_v57  ;;  %4351 = vmatpush.bf16.msrb.mxu2 %v8380_v52  ;;  %v8347_v2 = vld [vmem:[#allocation8 + $0xc00] sm:$0xf]  ;;  %v10621_v42 = vpack.c.bf16 %v1164_v33, %v1164_v33  ;;  %v6816_v45 = vor.u32 %v9561_v29, %v6813_v34  ;;  %v9801_v49 = vld [vmem:[#allocation8 + $0x784] sm:$0xf] }
  0xf6   :  { %4386 = vmatpush.bf16.msra.mxu1 %v7232_v32  ;;  %v9949_v4 = vld [vmem:[#allocation8 + $0xc1c] sm:$0xf0]  ;;  %v1042_v3 = vpop.f32.mrf.mxu2  ;;  %v7773_v50 = vld [vmem:[#allocation8 + $0x7a0] sm:$0xf0] }
  0xf7   :  { %4363 = vmatpush.bf16.msrb.mxu3 %v8668_v62  ;;  %v8348_v5 = vor.u32 %v9949_v4, %v8347_v2  ;;  %v8635_v18 = vld [vmem:[#allocation8 + $0xe40] sm:$0xf]  ;;  %v7776_v51 = vor.u32 %v9801_v49, %v7773_v50  ;;  %v9721_v52 = vld [vmem:[#allocation8 + $0x504] sm:$0xf] }
  0xf8   :  { %4374 = vmatpush.bf16.msra.mxu0 %v6944_v39  ;;  %v10021_v19 = vld [vmem:[#allocation8 + $0xe5c] sm:$0xf0]  ;;  %v7069_v39 = vld [vmem:[#allocation8 + $0x220] sm:$0xf0]  ;;  %4314 = vmatmul.bf16.vlgmr.msra.gmra.mxu3 %v10621_v42  ;;  %v1055_v47 = vpop.f32.mrf.mxu3 }
  0xf9   :  { %v8636_v21 = vor.u32 %v10021_v19, %v8635_v18  ;;  %4352 = vmatpush.bf16.msrb.mxu2 %v8348_v5  ;;  %v8603_v31 = vld [vmem:[#allocation8 + $0xe00] sm:$0xf]  ;;  %v7072_v48 = vor.u32 %v9625_v36, %v7069_v39  ;;  %v7741_v57 = vld [vmem:[#allocation8 + $0x760] sm:$0xf0]  ;;  %v301_v5 = vperm.slane %v10606_v37, 4 }
  0xfa   :  { %4387 = vmatpush.bf16.msra.mxu1 %v7200_v44  ;;  %v10013_v32 = vld [vmem:[#allocation8 + $0xe1c] sm:$0xf0]  ;;  %v7485_v44 = vld [vmem:[#allocation8 + $0x560] sm:$0xf0]  ;;  %v7744_v59 = vor.u32 %v9793_v56, %v7741_v57 }
  0xfb   :  { %4364 = vmatpush.bf16.msrb.mxu3 %v8636_v21  ;;  %v8604_v38 = vor.u32 %v10013_v32, %v8603_v31  ;;  %v7488_v46 = vor.u32 %v9729_v43, %v7485_v44  ;;  %v9785_v63 = vld [vmem:[#allocation8 + $0x704] sm:$0xf] }
  0xfc   :  { %4375 = vmatpush.bf16.msra.mxu0 %v6912_v54  ;;  %v7456_v54 = vor.u32 %v9721_v52, %v7453_v53  ;;  %v7709_v0 = vld [vmem:[#allocation8 + $0x720] sm:$0xf0] }
  0xfd   :  { %4397 = vmatpush.bf16.msra.mxu2 %v7552_v17  ;;  %v7712_v1 = vor.u32 %v9785_v63, %v7709_v0  ;;  %v9705_v2 = vld [vmem:[#allocation8 + $0x484] sm:$0xf] }
  0xfe   :  { %4388 = vmatpush.bf16.msra.mxu1 %v7168_v61  ;;  %v7421_v61 = vld [vmem:[#allocation8 + $0x4e0] sm:$0xf0] }
  0xff   :  { %4365 = vmatpush.bf16.msrb.mxu3 %v8604_v38  ;;  %v7424_v62 = vor.u32 %v9713_v60, %v7421_v61  ;;  %v7389_v4 = vld [vmem:[#allocation8 + $0x4a0] sm:$0xf0] }
 0x100   :  { %4376 = vmatpush.bf16.msra.mxu0 %v6880_v9  ;;  %v7392_v6 = vor.u32 %v9705_v2, %v7389_v4  ;;  %v9777_v8 = vld [vmem:[#allocation8 + $0x6c4] sm:$0xf] }
 0x101   :  { %4398 = vmatpush.bf16.msra.mxu2 %v7520_v30  ;;  %v7677_v9 = vld [vmem:[#allocation8 + $0x6e0] sm:$0xf0] }
 0x102   :  { %4389 = vmatpush.bf16.msra.mxu1 %v7136_v16  ;;  %v7680_v11 = vor.u32 %v9777_v8, %v7677_v9  ;;  %v9697_v12 = vld [vmem:[#allocation8 + $0x444] sm:$0xf] }
 0x103   :  { %4410 = vmatpush.bf16.msra.mxu3 %v7808_v55  ;;  %v7357_v13 = vld [vmem:[#allocation8 + $0x460] sm:$0xf0] }
 0x104   :  { %4377 = vmatpush.bf16.msra.mxu0 %v6848_v28  ;;  %v7360_v16 = vor.u32 %v9697_v12, %v7357_v13  ;;  %v9769_v17 = vld [vmem:[#allocation8 + $0x684] sm:$0xf]  ;;  %v303_v13 = vperm.slane %v10606_v37, 6 }
 0x105   :  { %4399 = vmatpush.bf16.msra.mxu2 %v7488_v46  ;;  %v7645_v18 = vld [vmem:[#allocation8 + $0x6a0] sm:$0xf0] }
 0x106   :  { %4390 = vmatpush.bf16.msra.mxu1 %v7104_v35  ;;  %v9873_v20 = vld [vmem:[#allocation8 + $0x9c4] sm:$0xf]  ;;  %v7648_v23 = vor.u32 %v9769_v17, %v7645_v18 }
 0x107   :  { %4411 = vmatpush.bf16.msra.mxu3 %v7776_v51  ;;  %v8061_v21 = vld [vmem:[#allocation8 + $0x9e0] sm:$0xf0] }
 0x108   :  { %4378 = vmatpush.bf16.msra.mxu0 %v6816_v45  ;;  %v1066_v10 = vpop.f32.mrf.mxu0  ;;  %v9689_v24 = vld [vmem:[#allocation8 + $0x404] sm:$0xf]  ;;  %v8064_v29 = vor.u32 %v9873_v20, %v8061_v21 }
 0x109   :  { %4400 = vmatpush.bf16.msra.mxu2 %v7456_v54  ;;  %v1067_v14 = vadd.f32 %v1066_v10, %v301_v5  ;;  %v7325_v26 = vld [vmem:[#allocation8 + $0x420] sm:$0xf0] }
 0x10a   :  { %4391 = vmatpush.bf16.msra.mxu1 %v7072_v48  ;;  %v1079_v15 = vpop.f32.mrf.mxu1  ;;  %v7328_v28 = vor.u32 %v9689_v24, %v7325_v26  ;;  %v9865_v30 = vld [vmem:[#allocation8 + $0x984] sm:$0xf] }
 0x10b   :  { %4412 = vmatpush.bf16.msra.mxu3 %v7744_v59  ;;  %v1080_v19 = vadd.f32 %v1079_v15, %v1067_v14  ;;  %v8029_v33 = vld [vmem:[#allocation8 + $0x9a0] sm:$0xf0] }
 0x10c   :  { %v9761_v34 = vld [vmem:[#allocation8 + $0x644] sm:$0xf]  ;;  %v8032_v44 = vor.u32 %v9865_v30, %v8029_v33  ;;  %v7043_v33 = vld [vmem:[#allocation8 + $0x1c8] sm:$0xf] }
 0x10d   :  { %4401 = vmatpush.bf16.msra.mxu2 %v7424_v62  ;;  %v1165_v27 = vmax.f32 %v1080_v19, 0.0  ;;  %v7613_v35 = vld [vmem:[#allocation8 + $0x660] sm:$0xf0] }
 0x10e   :  { %v1092_v32 = vpop.f32.mrf.mxu2  ;;  %v7616_v40 = vor.u32 %v9761_v34, %v7613_v35  ;;  %v9937_v41 = vld [vmem:[#allocation8 + $0xbc4] sm:$0xf]  ;;  %v9622_v34 = vld [vmem:[#allocation8 + $0x1e4] sm:$0xf0]  ;;  %v304_v35 = vperm.slane %v10606_v37, 7 }
 0x10f   :  { %4413 = vmatpush.bf16.msra.mxu3 %v7712_v1  ;;  %v10626_v31 = vpack.c.bf16 %v1165_v27, %v1165_v27  ;;  %v1093_v36 = vadd.f32 %v1092_v32, %v302_v22  ;;  %v8317_v3 = vld [vmem:[#allocation8 + $0xbe0] sm:$0xf0] }
 0x110   :  { %v1105_v38 = vpop.f32.mrf.mxu3  ;;  %v1068_v39 = vpop.f32.mrf.mxu0  ;;  %v9753_v45 = vld [vmem:[#allocation8 + $0x604] sm:$0xf]  ;;  %v8320_v51 = vor.u32 %v9937_v41, %v8317_v3 }
 0x111   :  { %4402 = vmatpush.bf16.msra.mxu2 %v7392_v6  ;;  %4327 = vmatmul.bf16.vlgmr.msrb.gmra.mxu0 %v10626_v31  ;;  %v1106_v43 = vadd.f32 %v1105_v38, %v1093_v36  ;;  %v7581_v46 = vld [vmem:[#allocation8 + $0x620] sm:$0xf0] }
 0x112   :  { %v1081_v55 = vpop.f32.mrf.mxu1  ;;  %4423 = vmatpush.bf16.msrb.mxu0 %v8064_v29  ;;  %v9857_v47 = vld [vmem:[#allocation8 + $0x944] sm:$0xf]  ;;  %v7584_v50 = vor.u32 %v9753_v45, %v7581_v46 }
 0x113   :  { %4414 = vmatpush.bf16.msra.mxu3 %v7680_v11  ;;  %v7997_v48 = vld [vmem:[#allocation8 + $0x960] sm:$0xf0]  ;;  %v1166_v49 = vmax.f32 %v1106_v43, 0.0  ;;  %v7044_v43 = vor.u32 %v9622_v34, %v7043_v33  ;;  %v9670_v33 = vld [vmem:[#allocation8 + $0x364] sm:$0xf0] }
 0x114   :  { %v8000_v53 = vor.u32 %v9857_v47, %v7997_v48  ;;  %v9929_v54 = vld [vmem:[#allocation8 + $0xb84] sm:$0xf]  ;;  %v7011_v47 = vld [vmem:[#allocation8 + $0x188] sm:$0xf] }
 0x115   :  { %4403 = vmatpush.bf16.msra.mxu2 %v7360_v16  ;;  %v10629_v52 = vpack.c.bf16 %v1166_v49, %v1166_v49  ;;  %v8285_v56 = vld [vmem:[#allocation8 + $0xba0] sm:$0xf0]  ;;  %v9614_v48 = vld [vmem:[#allocation8 + $0x1a4] sm:$0xf0] }
 0x116   :  { %4424 = vmatpush.bf16.msrb.mxu0 %v8032_v44  ;;  %v1094_v57 = vpop.f32.mrf.mxu2  ;;  %v9849_v59 = vld [vmem:[#allocation8 + $0x904] sm:$0xf]  ;;  %v8288_v62 = vor.u32 %v9929_v54, %v8285_v56  ;;  %v6915_v34 = vld [vmem:[#allocation8 + $0xc8] sm:$0xf] }
 0x117   :  { %4415 = vmatpush.bf16.msra.mxu3 %v7648_v23  ;;  %v7965_v60 = vld [vmem:[#allocation8 + $0x920] sm:$0xf0]  ;;  %4340 = vmatmul.bf16.vlgmr.msrb.gmra.mxu1 %v10629_v52 }
 0x118   :  { %v1107_v61 = vpop.f32.mrf.mxu3  ;;  %4436 = vmatpush.bf16.msrb.mxu1 %v8320_v51  ;;  %v7968_v63 = vor.u32 %v9849_v59, %v7965_v60  ;;  %v9921_v0 = vld [vmem:[#allocation8 + $0xb44] sm:$0xf] }
 0x119   :  { %4404 = vmatpush.bf16.msra.mxu2 %v7328_v28  ;;  %v8253_v1 = vld [vmem:[#allocation8 + $0xb60] sm:$0xf0] }
 0x11a   :  { %4425 = vmatpush.bf16.msrb.mxu0 %v8000_v53  ;;  %v9841_v2 = vld [vmem:[#allocation8 + $0x8c4] sm:$0xf]  ;;  %v8256_v5 = vor.u32 %v9921_v0, %v8253_v1  ;;  %v9686_v0 = vld [vmem:[#allocation8 + $0x3e4] sm:$0xf0] }
 0x11b   :  { %4416 = vmatpush.bf16.msra.mxu3 %v7616_v40  ;;  %v7933_v4 = vld [vmem:[#allocation8 + $0x8e0] sm:$0xf0] }
 0x11c   :  { %4437 = vmatpush.bf16.msrb.mxu1 %v8288_v62  ;;  %v7936_v6 = vor.u32 %v9841_v2, %v7933_v4  ;;  %v9913_v8 = vld [vmem:[#allocation8 + $0xb04] sm:$0xf]  ;;  %v7012_v62 = vor.u32 %v9614_v48, %v7011_v47  ;;  %v6979_v4 = vld [vmem:[#allocation8 + $0x148] sm:$0xf] }
 0x11d   :  { %v8221_v9 = vld [vmem:[#allocation8 + $0xb20] sm:$0xf0]  ;;  %v6883_v47 = vld [vmem:[#allocation8 + $0x88] sm:$0xf] }
 0x11e   :  { %4426 = vmatpush.bf16.msrb.mxu0 %v7968_v63  ;;  %v9833_v10 = vld [vmem:[#allocation8 + $0x884] sm:$0xf]  ;;  %v8224_v12 = vor.u32 %v9913_v8, %v8221_v9  ;;  %v7299_v63 = vld [vmem:[#allocation8 + $0x3c8] sm:$0xf] }
 0x11f   :  { %4417 = vmatpush.bf16.msra.mxu3 %v7584_v50  ;;  %v7901_v11 = vld [vmem:[#allocation8 + $0x8a0] sm:$0xf0]  ;;  %v9582_v48 = vld [vmem:[#allocation8 + $0xa4] sm:$0xf0] }
 0x120   :  { %4438 = vmatpush.bf16.msrb.mxu1 %v8256_v5  ;;  %v7904_v14 = vor.u32 %v9833_v10, %v7901_v11  ;;  %v9905_v15 = vld [vmem:[#allocation8 + $0xac4] sm:$0xf]  ;;  %v9606_v5 = vld [vmem:[#allocation8 + $0x164] sm:$0xf0]  ;;  %v7300_v10 = vor.u32 %v9686_v0, %v7299_v63 }
 0x121   :  { %4379 = vmatmul.bf16.vlgmr.msra.gmra.mxu0 %v10610_v25  ;;  %v8189_v16 = vld [vmem:[#allocation8 + $0xae0] sm:$0xf0] }
 0x122   :  { %4427 = vmatpush.bf16.msrb.mxu0 %v7936_v6  ;;  %v9825_v17 = vld [vmem:[#allocation8 + $0x844] sm:$0xf]  ;;  %v8192_v20 = vor.u32 %v9905_v15, %v8189_v16  ;;  %v6980_v15 = vor.u32 %v9606_v5, %v6979_v4  ;;  %v7267_v16 = vld [vmem:[#allocation8 + $0x388] sm:$0xf] }
 0x123   :  { %v7869_v18 = vld [vmem:[#allocation8 + $0x860] sm:$0xf0] }
 0x124   :  { %4439 = vmatpush.bf16.msrb.mxu1 %v8224_v12  ;;  %v7872_v23 = vor.u32 %v9825_v17, %v7869_v18  ;;  %v9897_v24 = vld [vmem:[#allocation8 + $0xa84] sm:$0xf]  ;;  %v9678_v17 = vld [vmem:[#allocation8 + $0x3a4] sm:$0xf0] }
 0x125   :  { %v8157_v26 = vld [vmem:[#allocation8 + $0xaa0] sm:$0xf0] }
 0x126   :  { %4428 = vmatpush.bf16.msrb.mxu0 %v7904_v14  ;;  %v9817_v27 = vld [vmem:[#allocation8 + $0x804] sm:$0xf]  ;;  %v8160_v36 = vor.u32 %v9897_v24, %v8157_v26  ;;  %v7268_v26 = vor.u32 %v9678_v17, %v7267_v16  ;;  %v8067_v16 = vld [vmem:[#allocation8 + $0x9c8] sm:$0xf] }
 0x127   :  { %v7837_v28 = vld [vmem:[#allocation8 + $0x820] sm:$0xf0]  ;;  %4392 = vmatmul.bf16.vlgmr.msra.gmra.mxu1 %v10613_v58  ;;  %v9878_v17 = vld [vmem:[#allocation8 + $0x9e4] sm:$0xf0] }
 0x128   :  { %v1118_v19 = vpop.f32.mrf.mxu0  ;;  %v10001_v29 = vld [vmem:[#allocation8 + $0xdc4] sm:$0xf]  ;;  %4440 = vmatpush.bf16.msrb.mxu1 %v8192_v20  ;;  %v7840_v39 = vor.u32 %v9817_v27, %v7837_v28 }
 0x129   :  { %v1119_v21 = vadd.f32 %v1118_v19, %v303_v13  ;;  %v8573_v32 = vld [vmem:[#allocation8 + $0xde0] sm:$0xf0] }
 0x12a   :  { %v1131_v22 = vpop.f32.mrf.mxu1  ;;  %4429 = vmatpush.bf16.msrb.mxu0 %v7872_v23  ;;  %v9889_v40 = vld [vmem:[#allocation8 + $0xa44] sm:$0xf]  ;;  %v8576_v55 = vor.u32 %v10001_v29, %v8573_v32  ;;  %v7235_v32 = vld [vmem:[#allocation8 + $0x348] sm:$0xf] }
 0x12b   :  { %v1132_v30 = vadd.f32 %v1131_v22, %v1119_v21  ;;  %v8125_v41 = vld [vmem:[#allocation8 + $0xa60] sm:$0xf0]  ;;  %v6947_v21 = vld [vmem:[#allocation8 + $0x108] sm:$0xf] }
 0x12c   :  { %v9993_v44 = vld [vmem:[#allocation8 + $0xd84] sm:$0xf]  ;;  %4441 = vmatpush.bf16.msrb.mxu1 %v8160_v36  ;;  %v8128_v37 = vor.u32 %v9889_v40, %v8125_v41  ;;  %v9598_v22 = vld [vmem:[#allocation8 + $0x124] sm:$0xf0]  ;;  %v7236_v40 = vor.u32 %v9670_v33, %v7235_v32 }
 0x12d   :  { %v1167_v38 = vmax.f32 %v1132_v30, 0.0  ;;  %v8541_v46 = vld [vmem:[#allocation8 + $0xda0] sm:$0xf0]  ;;  %v6948_v29 = vor.u32 %v9598_v22, %v6947_v21  ;;  %v9750_v21 = vld [vmem:[#allocation8 + $0x5e4] sm:$0xf0] }
 0x12e   :  { %v1144_v45 = vpop.f32.mrf.mxu2  ;;  %v9881_v53 = vld [vmem:[#allocation8 + $0xa04] sm:$0xf]  ;;  %4430 = vmatpush.bf16.msrb.mxu0 %v7840_v39  ;;  %v8544_v61 = vor.u32 %v9993_v44, %v8541_v46  ;;  %v7203_v44 = vld [vmem:[#allocation8 + $0x308] sm:$0xf] }
 0x12f   :  { %v10636_v3 = vpack.c.bf16 %v1167_v38, %v1167_v38  ;;  %v1145_v49 = vadd.f32 %v1144_v45, %v304_v35  ;;  %v8093_v56 = vld [vmem:[#allocation8 + $0xa20] sm:$0xf0]  ;;  %v9590_v35 = vld [vmem:[#allocation8 + $0xe4] sm:$0xf0] }
 0x130   :  { %v1157_v50 = vpop.f32.mrf.mxu3  ;;  %v1120_v51 = vpop.f32.mrf.mxu0  ;;  %v10065_v57 = vld [vmem:[#allocation8 + $0xfc4] sm:$0xf]  ;;  %4442 = vmatpush.bf16.msrb.mxu1 %v8128_v37  ;;  %v8096_v8 = vor.u32 %v9881_v53, %v8093_v56  ;;  %v9662_v45 = vld [vmem:[#allocation8 + $0x324] sm:$0xf0] }
 0x131   :  { %4353 = vmatmul.bf16.vlgmr.msrb.gmra.mxu2 %v10636_v3  ;;  %v8829_v59 = vld [vmem:[#allocation8 + $0xfe0] sm:$0xf0]  ;;  %v1158_v60 = vadd.f32 %v1157_v50, %v1145_v49  ;;  %4431 = vmatmul.bf16.vlgmr.msrb.gmra.mxu0 %v10626_v31  ;;  %v7204_v37 = vor.u32 %v9662_v45, %v7203_v44  ;;  %v7523_v32 = vld [vmem:[#allocation8 + $0x588] sm:$0xf] }
 0x132   :  { %v1133_v54 = vpop.f32.mrf.mxu1  ;;  %4449 = vmatpush.bf16.msrb.mxu2 %v8576_v55  ;;  %4475 = vmatpush.bf16.msra.mxu0 %v7044_v43  ;;  %v9985_v1 = vld [vmem:[#allocation8 + $0xd44] sm:$0xf]  ;;  %v8832_v9 = vor.u32 %v10065_v57, %v8829_v59  ;;  %v6916_v55 = vor.u32 %v9590_v35, %v6915_v34  ;;  %v7171_v57 = vld [vmem:[#allocation8 + $0x2c8] sm:$0xf] }
 0x133   :  { %v8509_v2 = vld [vmem:[#allocation8 + $0xd60] sm:$0xf0]  ;;  %v1168_v6 = vmax.f32 %v1158_v60, 0.0  ;;  %v6884_v54 = vor.u32 %v9582_v48, %v6883_v47  ;;  %v9654_v59 = vld [vmem:[#allocation8 + $0x2e4] sm:$0xf0] }
 0x134   :  { %v10057_v11 = vld [vmem:[#allocation8 + $0xf84] sm:$0xf]  ;;  %v8512_v14 = vor.u32 %v9985_v1, %v8509_v2  ;;  %4443 = vmatpush.bf16.msrb.mxu1 %v8096_v8  ;;  %v7172_v2 = vor.u32 %v9654_v59, %v7171_v57  ;;  %v7139_v8 = vld [vmem:[#allocation8 + $0x288] sm:$0xf] }
 0x135   :  { %v8797_v12 = vld [vmem:[#allocation8 + $0xfa0] sm:$0xf0]  ;;  %v10640_v13 = vpack.c.bf16 %v1168_v6, %v1168_v6  ;;  %v8035_v33 = vld [vmem:[#allocation8 + $0x988] sm:$0xf] }
 0x136   :  { %4450 = vmatpush.bf16.msrb.mxu2 %v8544_v61  ;;  %4476 = vmatpush.bf16.msra.mxu0 %v7012_v62  ;;  %v9977_v18 = vld [vmem:[#allocation8 + $0xd04] sm:$0xf]  ;;  %v1146_v19 = vpop.f32.mrf.mxu2  ;;  %v8800_v24 = vor.u32 %v10057_v11, %v8797_v12  ;;  %v6851_v61 = vld [vmem:[#allocation8 + $0x48] sm:$0xf] }
 0x137   :  { %v8477_v20 = vld [vmem:[#allocation8 + $0xd20] sm:$0xf0]  ;;  %4366 = vmatmul.bf16.vlgmr.msrb.gmra.mxu3 %v10640_v13  ;;  %4444 = vmatmul.bf16.vlgmr.msrb.gmra.mxu1 %v10629_v52  ;;  %v9574_v62 = vld [vmem:[#allocation8 + $0x64] sm:$0xf0] }
 0x138   :  { %v1159_v23 = vpop.f32.mrf.mxu3  ;;  %4462 = vmatpush.bf16.msrb.mxu3 %v8832_v9  ;;  %4488 = vmatpush.bf16.msra.mxu1 %v7300_v10  ;;  %v10049_v27 = vld [vmem:[#allocation8 + $0xf44] sm:$0xf]  ;;  %v8480_v28 = vor.u32 %v9977_v18, %v8477_v20  ;;  %v6852_v5 = vor.u32 %v9574_v62, %v6851_v61  ;;  %v9646_v9 = vld [vmem:[#allocation8 + $0x2a4] sm:$0xf0] }
 0x139   :  { %v8765_v30 = vld [vmem:[#allocation8 + $0xf60] sm:$0xf0]  ;;  %v6819_v12 = vld [vmem:[#allocation8 + $0x8] sm:$0xf]  ;;  %v7140_v19 = vor.u32 %v9646_v9, %v7139_v8 }
 0x13a   :  { %4451 = vmatpush.bf16.msrb.mxu2 %v8512_v14  ;;  %4477 = vmatpush.bf16.msra.mxu0 %v6980_v15  ;;  %v9969_v36 = vld [vmem:[#allocation8 + $0xcc4] sm:$0xf]  ;;  %v8768_v39 = vor.u32 %v10049_v27, %v8765_v30  ;;  %v9566_v14 = vld [vmem:[#allocation8 + $0x24] sm:$0xf0] }
 0x13b   :  { %v8445_v38 = vld [vmem:[#allocation8 + $0xce0] sm:$0xf0]  ;;  %v7555_v20 = vld [vmem:[#allocation8 + $0x5c8] sm:$0xf]  ;;  %v6820_v23 = vor.u32 %v9566_v14, %v6819_v12 }
 0x13c   :  { %4463 = vmatpush.bf16.msrb.mxu3 %v8800_v24  ;;  %4489 = vmatpush.bf16.msra.mxu1 %v7268_v26  ;;  %v10041_v41 = vld [vmem:[#allocation8 + $0xf04] sm:$0xf]  ;;  %v8448_v46 = vor.u32 %v9969_v36, %v8445_v38  ;;  %v7107_v26 = vld [vmem:[#allocation8 + $0x248] sm:$0xf]  ;;  %v7556_v30 = vor.u32 %v9750_v21, %v7555_v20 }
 0x13d   :  { %v8733_v43 = vld [vmem:[#allocation8 + $0xf20] sm:$0xf0]  ;;  %v9638_v27 = vld [vmem:[#allocation8 + $0x264] sm:$0xf0] }
 0x13e   :  { %4452 = vmatpush.bf16.msrb.mxu2 %v8480_v28  ;;  %4478 = vmatpush.bf16.msra.mxu0 %v6948_v29  ;;  %v9961_v49 = vld [vmem:[#allocation8 + $0xc84] sm:$0xf]  ;;  %v8736_v51 = vor.u32 %v10041_v41, %v8733_v43  ;;  %v8068_v29 = vor.u32 %v9878_v17, %v8067_v16  ;;  %v9870_v34 = vld [vmem:[#allocation8 + $0x9a4] sm:$0xf0]  ;;  %v7108_v36 = vor.u32 %v9638_v27, %v7107_v26 }
 0x13f   :  { %v8413_v50 = vld [vmem:[#allocation8 + $0xca0] sm:$0xf0]  ;;  %v9742_v38 = vld [vmem:[#allocation8 + $0x5a4] sm:$0xf0]  ;;  %v8036_v44 = vor.u32 %v9870_v34, %v8035_v33 }
 0x140   :  { %4464 = vmatpush.bf16.msrb.mxu3 %v8768_v39  ;;  %4490 = vmatpush.bf16.msra.mxu1 %v7236_v40  ;;  %v10033_v53 = vld [vmem:[#allocation8 + $0xec4] sm:$0xf]  ;;  %v8416_v60 = vor.u32 %v9961_v49, %v8413_v50  ;;  %v7075_v41 = vld [vmem:[#allocation8 + $0x208] sm:$0xf]  ;;  %v7524_v48 = vor.u32 %v9742_v38, %v7523_v32 }
 0x141   :  { %4405 = vmatmul.bf16.vlgmr.msra.gmra.mxu2 %v10618_v7  ;;  %v8701_v56 = vld [vmem:[#allocation8 + $0xee0] sm:$0xf0]  ;;  %v7811_v43 = vld [vmem:[#allocation8 + $0x7c8] sm:$0xf] }
 0x142   :  { %4479 = vmatpush.bf16.msra.mxu0 %v6916_v55  ;;  %4453 = vmatpush.bf16.msrb.mxu2 %v8448_v46  ;;  %v9953_v63 = vld [vmem:[#allocation8 + $0xc44] sm:$0xf]  ;;  %v8704_v1 = vor.u32 %v10033_v53, %v8701_v56  ;;  %v9630_v55 = vld [vmem:[#allocation8 + $0x224] sm:$0xf0] }
 0x143   :  { %v8381_v0 = vld [vmem:[#allocation8 + $0xc60] sm:$0xf0]  ;;  %v9814_v45 = vld [vmem:[#allocation8 + $0x7e4] sm:$0xf0] }
 0x144   :  { %4465 = vmatpush.bf16.msrb.mxu3 %v8736_v51  ;;  %4491 = vmatpush.bf16.msra.mxu1 %v7204_v37  ;;  %v10025_v4 = vld [vmem:[#allocation8 + $0xe84] sm:$0xf]  ;;  %v8384_v10 = vor.u32 %v9953_v63, %v8381_v0  ;;  %v8323_v46 = vld [vmem:[#allocation8 + $0xbc8] sm:$0xf]  ;;  %v7076_v37 = vor.u32 %v9630_v55, %v7075_v41  ;;  %v7812_v56 = vor.u32 %v9814_v45, %v7811_v43 }
 0x145   :  { %v8669_v6 = vld [vmem:[#allocation8 + $0xea0] sm:$0xf0]  ;;  %v9942_v47 = vld [vmem:[#allocation8 + $0xbe4] sm:$0xf0] }
 0x146   :  { %4480 = vmatpush.bf16.msra.mxu0 %v6884_v54  ;;  %4454 = vmatpush.bf16.msrb.mxu2 %v8416_v60  ;;  %v9945_v11 = vld [vmem:[#allocation8 + $0xc04] sm:$0xf]  ;;  %v8672_v18 = vor.u32 %v10025_v4, %v8669_v6  ;;  %v8003_v49 = vld [vmem:[#allocation8 + $0x948] sm:$0xf]  ;;  %v8324_v57 = vor.u32 %v9942_v47, %v8323_v46 }
 0x147   :  { %4418 = vmatmul.bf16.vlgmr.msra.gmra.mxu3 %v10621_v42  ;;  %v8349_v15 = vld [vmem:[#allocation8 + $0xc20] sm:$0xf0]  ;;  %v9862_v50 = vld [vmem:[#allocation8 + $0x964] sm:$0xf0] }
 0x148   :  { %4466 = vmatpush.bf16.msrb.mxu3 %v8704_v1  ;;  %4492 = vmatpush.bf16.msra.mxu1 %v7172_v2  ;;  %v10017_v22 = vld [vmem:[#allocation8 + $0xe44] sm:$0xf]  ;;  %v8352_v28 = vor.u32 %v9945_v11, %v8349_v15  ;;  %v7491_v53 = vld [vmem:[#allocation8 + $0x548] sm:$0xf]  ;;  %v8004_v60 = vor.u32 %v9862_v50, %v8003_v49 }
 0x149   :  { %v8637_v24 = vld [vmem:[#allocation8 + $0xe60] sm:$0xf0]  ;;  %v9734_v54 = vld [vmem:[#allocation8 + $0x564] sm:$0xf0] }
 0x14a   :  { %4481 = vmatpush.bf16.msra.mxu0 %v6852_v5  ;;  %4455 = vmatpush.bf16.msrb.mxu2 %v8384_v10  ;;  %v8640_v35 = vor.u32 %v10017_v22, %v8637_v24  ;;  %v10009_v39 = vld [vmem:[#allocation8 + $0xe04] sm:$0xf]  ;;  %v7779_v59 = vld [vmem:[#allocation8 + $0x788] sm:$0xf]  ;;  %v7492_v0 = vor.u32 %v9734_v54, %v7491_v53 }
 0x14b   :  { %v8605_v40 = vld [vmem:[#allocation8 + $0xe20] sm:$0xf0]  ;;  %v9806_v61 = vld [vmem:[#allocation8 + $0x7a4] sm:$0xf0] }
 0x14c   :  { %4467 = vmatpush.bf16.msrb.mxu3 %v8672_v18  ;;  %4493 = vmatpush.bf16.msra.mxu1 %v7140_v19  ;;  %v8608_v51 = vor.u32 %v10009_v39, %v8605_v40  ;;  %v8291_v62 = vld [vmem:[#allocation8 + $0xb88] sm:$0xf]  ;;  %v10648_v4 = vld [vmem:[#allocation10] sm:$0xff]  ;;  %v7780_v8 = vor.u32 %v9806_v61, %v7779_v59 }
 0x14d   :  { %v9934_v63 = vld [vmem:[#allocation8 + $0xba4] sm:$0xf0]  ;;  %v1691_v16 = vperm.slane %v10648_v4, 0 }
 0x14e   :  { %4482 = vmatpush.bf16.msra.mxu0 %v6820_v23  ;;  %4456 = vmatpush.bf16.msrb.mxu2 %v8352_v28  ;;  %v7971_v1 = vld [vmem:[#allocation8 + $0x908] sm:$0xf]  ;;  %v8292_v9 = vor.u32 %v9934_v63, %v8291_v62  ;;  %v4276_v17 = vpop.f32.mrf.mxu0 }
 0x14f   :  { %v9854_v2 = vld [vmem:[#allocation8 + $0x924] sm:$0xf0]  ;;  %v4277_v32 = vadd.f32 %v4276_v17, %v1691_v16 }
 0x150   :  { %4468 = vmatpush.bf16.msrb.mxu3 %v8640_v35  ;;  %4494 = vmatpush.bf16.msra.mxu1 %v7108_v36  ;;  %v7459_v5 = vld [vmem:[#allocation8 + $0x508] sm:$0xf]  ;;  %v7972_v12 = vor.u32 %v9854_v2, %v7971_v1 }
 0x151   :  { %4483 = vmatmul.bf16.vlgmr.msra.gmra.mxu0 %v10610_v25  ;;  %4457 = vmatmul.bf16.vlgmr.msrb.gmra.mxu2 %v10636_v3  ;;  %v9726_v6 = vld [vmem:[#allocation8 + $0x524] sm:$0xf0] }
 0x152   :  { %4527 = vmatpush.bf16.msrb.mxu0 %v8068_v29  ;;  %4501 = vmatpush.bf16.msra.mxu2 %v7556_v30  ;;  %v7747_v10 = vld [vmem:[#allocation8 + $0x748] sm:$0xf]  ;;  %v7460_v18 = vor.u32 %v9726_v6, %v7459_v5  ;;  %v9618_v6 = vld [vmem:[#allocation8 + $0x1cc] sm:$0xf] }
 0x153   :  { %v9798_v11 = vld [vmem:[#allocation8 + $0x764] sm:$0xf0] }
 0x154   :  { %4469 = vmatpush.bf16.msrb.mxu3 %v8608_v51  ;;  %4495 = vmatpush.bf16.msra.mxu1 %v7076_v37  ;;  %v8259_v14 = vld [vmem:[#allocation8 + $0xb48] sm:$0xf]  ;;  %v7748_v23 = vor.u32 %v9798_v11, %v7747_v10 }
 0x155   :  { %v9926_v15 = vld [vmem:[#allocation8 + $0xb64] sm:$0xf0]  ;;  %v4289_v55 = vpop.f32.mrf.mxu1 }
 0x156   :  { %4528 = vmatpush.bf16.msrb.mxu0 %v8036_v44  ;;  %4502 = vmatpush.bf16.msra.mxu2 %v7524_v48  ;;  %v7939_v19 = vld [vmem:[#allocation8 + $0x8c8] sm:$0xf]  ;;  %v8260_v24 = vor.u32 %v9926_v15, %v8259_v14  ;;  %v10653_v47 = vadd.f32 %v4289_v55, %v4277_v32  ;;  %v4278_v48 = vpop.f32.mrf.mxu0  ;;  %v9602_v55 = vld [vmem:[#allocation8 + $0x14c] sm:$0xf] }
 0x157   :  { %4496 = vmatmul.bf16.vlgmr.msra.gmra.mxu1 %v10613_v58  ;;  %v9846_v20 = vld [vmem:[#allocation8 + $0x8e4] sm:$0xf0]  ;;  %4470 = vmatmul.bf16.vlgmr.msrb.gmra.mxu3 %v10640_v13 }
 0x158   :  { %4514 = vmatpush.bf16.msra.mxu3 %v7812_v56  ;;  %4540 = vmatpush.bf16.msrb.mxu1 %v8324_v57  ;;  %v7427_v21 = vld [vmem:[#allocation8 + $0x4c8] sm:$0xf]  ;;  %v7940_v27 = vor.u32 %v9846_v20, %v7939_v19 }
 0x159   :  { %v9718_v22 = vld [vmem:[#allocation8 + $0x4e4] sm:$0xf0] }
 0x15a   :  { %4529 = vmatpush.bf16.msrb.mxu0 %v8004_v60  ;;  %4503 = vmatpush.bf16.msra.mxu2 %v7492_v0  ;;  %v7715_v26 = vld [vmem:[#allocation8 + $0x708] sm:$0xf]  ;;  %v7428_v33 = vor.u32 %v9718_v22, %v7427_v21 }
 0x15b   :  { %v9790_v28 = vld [vmem:[#allocation8 + $0x724] sm:$0xf0] }
 0x15c   :  { %4515 = vmatpush.bf16.msra.mxu3 %v7780_v8  ;;  %4541 = vmatpush.bf16.msrb.mxu1 %v8292_v9  ;;  %v8227_v29 = vld [vmem:[#allocation8 + $0xb08] sm:$0xf]  ;;  %v7716_v39 = vor.u32 %v9790_v28, %v7715_v26  ;;  %v7045_v8 = vld [vmem:[#allocation8 + $0x1e8] sm:$0xf0] }
 0x15d   :  { %v9918_v30 = vld [vmem:[#allocation8 + $0xb24] sm:$0xf0]  ;;  %v4291_v15 = vpop.f32.mrf.mxu1  ;;  %v7048_v21 = vor.u32 %v9618_v6, %v7045_v8  ;;  %v7013_v26 = vld [vmem:[#allocation8 + $0x1a8] sm:$0xf0] }
 0x15e   :  { %4530 = vmatpush.bf16.msrb.mxu0 %v7972_v12  ;;  %4504 = vmatpush.bf16.msra.mxu2 %v7460_v18  ;;  %v7907_v34 = vld [vmem:[#allocation8 + $0x888] sm:$0xf]  ;;  %v8228_v40 = vor.u32 %v9918_v30, %v8227_v29  ;;  %v9666_v6 = vld [vmem:[#allocation8 + $0x34c] sm:$0xf] }
 0x15f   :  { %v9838_v35 = vld [vmem:[#allocation8 + $0x8a4] sm:$0xf0]  ;;  %v7237_v8 = vld [vmem:[#allocation8 + $0x368] sm:$0xf0] }
 0x160   :  { %v7395_v36 = vld [vmem:[#allocation8 + $0x488] sm:$0xf]  ;;  %4516 = vmatpush.bf16.msra.mxu3 %v7748_v23  ;;  %4542 = vmatpush.bf16.msrb.mxu1 %v8260_v24  ;;  %v7908_v43 = vor.u32 %v9838_v35, %v7907_v34  ;;  %v9610_v24 = vld [vmem:[#allocation8 + $0x18c] sm:$0xf] }
 0x161   :  { %v9710_v38 = vld [vmem:[#allocation8 + $0x4a4] sm:$0xf0] }
 0x162   :  { %v7683_v41 = vld [vmem:[#allocation8 + $0x6c8] sm:$0xf]  ;;  %4531 = vmatpush.bf16.msrb.mxu0 %v7940_v27  ;;  %4505 = vmatpush.bf16.msra.mxu2 %v7428_v33  ;;  %v7396_v49 = vor.u32 %v9710_v38, %v7395_v36  ;;  %v7016_v36 = vor.u32 %v9610_v24, %v7013_v26  ;;  %v6885_v24 = vld [vmem:[#allocation8 + $0xa8] sm:$0xf0] }
 0x163   :  { %v9782_v44 = vld [vmem:[#allocation8 + $0x6e4] sm:$0xf0] }
 0x164   :  { %v8195_v45 = vld [vmem:[#allocation8 + $0xac8] sm:$0xf]  ;;  %4517 = vmatpush.bf16.msra.mxu3 %v7716_v39  ;;  %4543 = vmatpush.bf16.msrb.mxu1 %v8228_v40  ;;  %v7684_v54 = vor.u32 %v9782_v44, %v7683_v41  ;;  %v9682_v39 = vld [vmem:[#allocation8 + $0x3cc] sm:$0xf] }
 0x165   :  { %v9910_v46 = vld [vmem:[#allocation8 + $0xae4] sm:$0xf0]  ;;  %v7301_v40 = vld [vmem:[#allocation8 + $0x3e8] sm:$0xf0] }
 0x166   :  { %v7875_v50 = vld [vmem:[#allocation8 + $0x848] sm:$0xf]  ;;  %v8196_v56 = vor.u32 %v9910_v46, %v8195_v45  ;;  %4532 = vmatpush.bf16.msrb.mxu0 %v7908_v43  ;;  %4506 = vmatpush.bf16.msra.mxu2 %v7396_v49  ;;  %v6981_v43 = vld [vmem:[#allocation8 + $0x168] sm:$0xf0]  ;;  %v7304_v48 = vor.u32 %v9682_v39, %v7301_v40 }
 0x167   :  { %v9830_v51 = vld [vmem:[#allocation8 + $0x864] sm:$0xf0]  ;;  %v9570_v39 = vld [vmem:[#allocation8 + $0x4c] sm:$0xf] }
 0x168   :  { %v7363_v37 = vld [vmem:[#allocation8 + $0x448] sm:$0xf]  ;;  %v7876_v59 = vor.u32 %v9830_v51, %v7875_v50  ;;  %4518 = vmatpush.bf16.msra.mxu3 %v7684_v54  ;;  %4544 = vmatpush.bf16.msrb.mxu1 %v8196_v56  ;;  %v9674_v54 = vld [vmem:[#allocation8 + $0x38c] sm:$0xf] }
 0x169   :  { %v9702_v53 = vld [vmem:[#allocation8 + $0x464] sm:$0xf0]  ;;  %v7269_v56 = vld [vmem:[#allocation8 + $0x3a8] sm:$0xf0] }
 0x16a   :  { %v7651_v57 = vld [vmem:[#allocation8 + $0x688] sm:$0xf]  ;;  %v7364_v63 = vor.u32 %v9702_v53, %v7363_v37  ;;  %4533 = vmatpush.bf16.msrb.mxu0 %v7876_v59  ;;  %v6984_v37 = vor.u32 %v9602_v55, %v6981_v43  ;;  %v6949_v59 = vld [vmem:[#allocation8 + $0x128] sm:$0xf0] }
 0x16b   :  { %v9774_v60 = vld [vmem:[#allocation8 + $0x6a4] sm:$0xf0]  ;;  %v6853_v40 = vld [vmem:[#allocation8 + $0x68] sm:$0xf0] }
 0x16c   :  { %v8163_v61 = vld [vmem:[#allocation8 + $0xa88] sm:$0xf]  ;;  %v7652_v9 = vor.u32 %v9774_v60, %v7651_v57  ;;  %4507 = vmatpush.bf16.msra.mxu2 %v7364_v63  ;;  %v9594_v57 = vld [vmem:[#allocation8 + $0x10c] sm:$0xf] }
 0x16d   :  { %v9902_v62 = vld [vmem:[#allocation8 + $0xaa4] sm:$0xf0] }
 0x16e   :  { %v7331_v0 = vld [vmem:[#allocation8 + $0x408] sm:$0xf]  ;;  %v8164_v10 = vor.u32 %v9902_v62, %v8163_v61  ;;  %4519 = vmatpush.bf16.msra.mxu3 %v7652_v9  ;;  %v7272_v62 = vor.u32 %v9674_v54, %v7269_v56  ;;  %v9586_v9 = vld [vmem:[#allocation8 + $0xcc] sm:$0xf] }
 0x16f   :  { %v7843_v1 = vld [vmem:[#allocation8 + $0x808] sm:$0xf]  ;;  %v6821_v54 = vld [vmem:[#allocation8 + $0x28] sm:$0xf0] }
 0x170   :  { %v9822_v2 = vld [vmem:[#allocation8 + $0x824] sm:$0xf0]  ;;  %4545 = vmatpush.bf16.msrb.mxu1 %v8164_v10  ;;  %v6917_v10 = vld [vmem:[#allocation8 + $0xe8] sm:$0xf0] }
 0x171   :  { %v9694_v5 = vld [vmem:[#allocation8 + $0x424] sm:$0xf0]  ;;  %v7844_v16 = vor.u32 %v9822_v2, %v7843_v1  ;;  %v6952_v2 = vor.u32 %v9594_v57, %v6949_v59  ;;  %v9874_v59 = vld [vmem:[#allocation8 + $0x9cc] sm:$0xf] }
 0x172   :  { %v8579_v11 = vld [vmem:[#allocation8 + $0xdc8] sm:$0xf]  ;;  %v7332_v20 = vor.u32 %v9694_v5, %v7331_v0 }
 0x173   :  { %v10006_v12 = vld [vmem:[#allocation8 + $0xde4] sm:$0xf0]  ;;  %4534 = vmatpush.bf16.msrb.mxu0 %v7844_v16 }
 0x174   :  { %v7619_v14 = vld [vmem:[#allocation8 + $0x648] sm:$0xf]  ;;  %v8580_v22 = vor.u32 %v10006_v12, %v8579_v11  ;;  %4508 = vmatpush.bf16.msra.mxu2 %v7332_v20  ;;  %v9658_v20 = vld [vmem:[#allocation8 + $0x30c] sm:$0xf] }
 0x175   :  { %v9766_v17 = vld [vmem:[#allocation8 + $0x664] sm:$0xf0] }
 0x176   :  { %v8131_v18 = vld [vmem:[#allocation8 + $0xa48] sm:$0xf]  ;;  %v7620_v27 = vor.u32 %v9766_v17, %v7619_v14  ;;  %4535 = vmatmul.bf16.vlgmr.msrb.gmra.mxu0 %v10626_v31  ;;  %v7240_v14 = vor.u32 %v9666_v6, %v7237_v8 }
 0x177   :  { %v9894_v19 = vld [vmem:[#allocation8 + $0xa64] sm:$0xf0]  ;;  %4579 = vmatpush.bf16.msra.mxu0 %v7048_v21  ;;  %4509 = vmatmul.bf16.vlgmr.msra.gmra.mxu2 %v10618_v7  ;;  %v7205_v21 = vld [vmem:[#allocation8 + $0x328] sm:$0xf0] }
 0x178   :  { %v8547_v23 = vld [vmem:[#allocation8 + $0xd88] sm:$0xf]  ;;  %v8132_v28 = vor.u32 %v9894_v19, %v8131_v18  ;;  %4553 = vmatpush.bf16.msrb.mxu2 %v8580_v22  ;;  %4520 = vmatpush.bf16.msra.mxu3 %v7620_v27  ;;  %v6920_v18 = vor.u32 %v9586_v9, %v6917_v10  ;;  %v4302_v22 = vpop.f32.mrf.mxu2  ;;  %v9634_v10 = vld [vmem:[#allocation8 + $0x24c] sm:$0xf] }
 0x179   :  { %v9998_v29 = vld [vmem:[#allocation8 + $0xda4] sm:$0xf0]  ;;  %v4303_v26 = vadd.f32 %v4302_v22, %v10653_v47 }
 0x17a   :  { %v7587_v30 = vld [vmem:[#allocation8 + $0x608] sm:$0xf]  ;;  %v8548_v41 = vor.u32 %v9998_v29, %v8547_v23  ;;  %4546 = vmatpush.bf16.msrb.mxu1 %v8132_v28  ;;  %v9578_v23 = vld [vmem:[#allocation8 + $0x8c] sm:$0xf]  ;;  %v7208_v29 = vor.u32 %v9658_v20, %v7205_v21 }
 0x17b   :  { %v9758_v32 = vld [vmem:[#allocation8 + $0x624] sm:$0xf0]  ;;  %4580 = vmatpush.bf16.msra.mxu0 %v7016_v36  ;;  %v9650_v36 = vld [vmem:[#allocation8 + $0x2cc] sm:$0xf] }
 0x17c   :  { %v8099_v33 = vld [vmem:[#allocation8 + $0xa08] sm:$0xf]  ;;  %v7588_v44 = vor.u32 %v9758_v32, %v7587_v30  ;;  %4554 = vmatpush.bf16.msrb.mxu2 %v8548_v41 }
 0x17d   :  { %v9886_v34 = vld [vmem:[#allocation8 + $0xa24] sm:$0xf0] }
 0x17e   :  { %v8835_v35 = vld [vmem:[#allocation8 + $0xfc8] sm:$0xf]  ;;  %v8100_v45 = vor.u32 %v9886_v34, %v8099_v33  ;;  %4521 = vmatpush.bf16.msra.mxu3 %v7588_v44  ;;  %v6888_v34 = vor.u32 %v9578_v23, %v6885_v24  ;;  %v9626_v23 = vld [vmem:[#allocation8 + $0x20c] sm:$0xf] }
 0x17f   :  { %v10070_v38 = vld [vmem:[#allocation8 + $0xfe4] sm:$0xf0]  ;;  %4581 = vmatpush.bf16.msra.mxu0 %v6984_v37  ;;  %v7077_v24 = vld [vmem:[#allocation8 + $0x228] sm:$0xf0] }
 0x180   :  { %v8836_v46 = vor.u32 %v10070_v38, %v8835_v35  ;;  %v8515_v49 = vld [vmem:[#allocation8 + $0xd48] sm:$0xf]  ;;  %4547 = vmatpush.bf16.msrb.mxu1 %v8100_v45  ;;  %v7173_v38 = vld [vmem:[#allocation8 + $0x2e8] sm:$0xf0]  ;;  %v4304_v56 = vpop.f32.mrf.mxu2 }
 0x181   :  { %v9990_v50 = vld [vmem:[#allocation8 + $0xd64] sm:$0xf0]  ;;  %4522 = vmatmul.bf16.vlgmr.msra.gmra.mxu3 %v10621_v42  ;;  %v7176_v55 = vor.u32 %v9650_v36, %v7173_v38  ;;  %v7080_v38 = vor.u32 %v9626_v23, %v7077_v24 }
 0x182   :  { %v8803_v51 = vld [vmem:[#allocation8 + $0xf88] sm:$0xf]  ;;  %v8516_v60 = vor.u32 %v9990_v50, %v8515_v49  ;;  %4566 = vmatpush.bf16.msrb.mxu3 %v8836_v46  ;;  %v4315_v46 = vpop.f32.mrf.mxu3  ;;  %v9642_v50 = vld [vmem:[#allocation8 + $0x28c] sm:$0xf] }
 0x183   :  { %v10062_v53 = vld [vmem:[#allocation8 + $0xfa4] sm:$0xf0]  ;;  %4548 = vmatmul.bf16.vlgmr.msrb.gmra.mxu1 %v10629_v52  ;;  %4582 = vmatpush.bf16.msra.mxu0 %v6952_v2  ;;  %v10660_v37 = vadd.f32 %v4315_v46, %v4303_v26  ;;  %v8293_v46 = vld [vmem:[#allocation8 + $0xba8] sm:$0xf0] }
 0x184   :  { %4592 = vmatpush.bf16.msra.mxu1 %v7304_v48  ;;  %v8804_v61 = vor.u32 %v10062_v53, %v8803_v51  ;;  %v8483_v63 = vld [vmem:[#allocation8 + $0xd08] sm:$0xf]  ;;  %4555 = vmatpush.bf16.msrb.mxu2 %v8516_v60  ;;  %v6856_v48 = vor.u32 %v9570_v39, %v6853_v40  ;;  %v7141_v51 = vld [vmem:[#allocation8 + $0x2a8] sm:$0xf0] }
 0x185   :  { %v9982_v0 = vld [vmem:[#allocation8 + $0xd24] sm:$0xf0]  ;;  %v9562_v53 = vld [vmem:[#allocation8 + $0xc] sm:$0xf] }
 0x186   :  { %v8771_v1 = vld [vmem:[#allocation8 + $0xf48] sm:$0xf]  ;;  %v8484_v11 = vor.u32 %v9982_v0, %v8483_v63  ;;  %4567 = vmatpush.bf16.msrb.mxu3 %v8804_v61  ;;  %v8069_v60 = vld [vmem:[#allocation8 + $0x9e8] sm:$0xf0]  ;;  %v6824_v2 = vor.u32 %v9562_v53, %v6821_v54 }
 0x187   :  { %v10054_v5 = vld [vmem:[#allocation8 + $0xf64] sm:$0xf0]  ;;  %4583 = vmatpush.bf16.msra.mxu0 %v6920_v18  ;;  %v8072_v9 = vor.u32 %v9874_v59, %v8069_v60  ;;  %v9738_v18 = vld [vmem:[#allocation8 + $0x58c] sm:$0xf] }
 0x188   :  { %4593 = vmatpush.bf16.msra.mxu1 %v7272_v62  ;;  %v8772_v12 = vor.u32 %v10054_v5, %v8771_v1  ;;  %v8451_v15 = vld [vmem:[#allocation8 + $0xcc8] sm:$0xf]  ;;  %4556 = vmatpush.bf16.msrb.mxu2 %v8484_v11  ;;  %v7144_v62 = vor.u32 %v9642_v50, %v7141_v51  ;;  %v9746_v1 = vld [vmem:[#allocation8 + $0x5cc] sm:$0xf] }
 0x189   :  { %v9974_v16 = vld [vmem:[#allocation8 + $0xce4] sm:$0xf0]  ;;  %v7557_v5 = vld [vmem:[#allocation8 + $0x5e8] sm:$0xf0] }
 0x18a   :  { %v8739_v17 = vld [vmem:[#allocation8 + $0xf08] sm:$0xf]  ;;  %v8452_v27 = vor.u32 %v9974_v16, %v8451_v15  ;;  %4568 = vmatpush.bf16.msrb.mxu3 %v8772_v12  ;;  %v7109_v11 = vld [vmem:[#allocation8 + $0x268] sm:$0xf0]  ;;  %v7560_v16 = vor.u32 %v9746_v1, %v7557_v5  ;;  %v4317_v26 = vpop.f32.mrf.mxu3 }
 0x18b   :  { %v10046_v19 = vld [vmem:[#allocation8 + $0xf24] sm:$0xf0]  ;;  %4584 = vmatpush.bf16.msra.mxu0 %v6888_v34  ;;  %v8037_v15 = vld [vmem:[#allocation8 + $0x9a8] sm:$0xf0]  ;;  %v7112_v21 = vor.u32 %v9634_v10, %v7109_v11 }
 0x18c   :  { %4594 = vmatpush.bf16.msra.mxu1 %v7240_v14  ;;  %v8740_v28 = vor.u32 %v10046_v19, %v8739_v17  ;;  %v8419_v30 = vld [vmem:[#allocation8 + $0xc88] sm:$0xf]  ;;  %4557 = vmatpush.bf16.msrb.mxu2 %v8452_v27  ;;  %v9866_v14 = vld [vmem:[#allocation8 + $0x98c] sm:$0xf] }
 0x18d   :  { %v9966_v32 = vld [vmem:[#allocation8 + $0xca4] sm:$0xf0]  ;;  %v7525_v19 = vld [vmem:[#allocation8 + $0x5a8] sm:$0xf0]  ;;  %v8040_v27 = vor.u32 %v9866_v14, %v8037_v15 }
 0x18e   :  { %v8707_v33 = vld [vmem:[#allocation8 + $0xec8] sm:$0xf]  ;;  %v8420_v41 = vor.u32 %v9966_v32, %v8419_v30  ;;  %4569 = vmatpush.bf16.msrb.mxu3 %v8740_v28  ;;  %v9810_v28 = vld [vmem:[#allocation8 + $0x7cc] sm:$0xf]  ;;  %v4328_v56 = vpop.f32.mrf.mxu0 }
 0x18f   :  { %v10038_v35 = vld [vmem:[#allocation8 + $0xee4] sm:$0xf0]  ;;  %4585 = vmatpush.bf16.msra.mxu0 %v6856_v48  ;;  %v9938_v30 = vld [vmem:[#allocation8 + $0xbcc] sm:$0xf] }
 0x190   :  { %4595 = vmatpush.bf16.msra.mxu1 %v7208_v29  ;;  %v8708_v47 = vor.u32 %v10038_v35, %v8707_v33  ;;  %v8387_v43 = vld [vmem:[#allocation8 + $0xc48] sm:$0xf]  ;;  %4558 = vmatpush.bf16.msrb.mxu2 %v8420_v41  ;;  %v7813_v29 = vld [vmem:[#allocation8 + $0x7e8] sm:$0xf0]  ;;  %v7528_v35 = vor.u32 %v9738_v18, %v7525_v19 }
 0x191   :  { %v9958_v44 = vld [vmem:[#allocation8 + $0xc64] sm:$0xf0]  ;;  %v8325_v32 = vld [vmem:[#allocation8 + $0xbe8] sm:$0xf0]  ;;  %v7816_v39 = vor.u32 %v9810_v28, %v7813_v29 }
 0x192   :  { %v8675_v45 = vld [vmem:[#allocation8 + $0xe88] sm:$0xf]  ;;  %v8388_v57 = vor.u32 %v9958_v44, %v8387_v43  ;;  %4570 = vmatpush.bf16.msrb.mxu3 %v8708_v47  ;;  %v9858_v33 = vld [vmem:[#allocation8 + $0x94c] sm:$0xf]  ;;  %v8328_v47 = vor.u32 %v9938_v30, %v8325_v32 }
 0x193   :  { %v10030_v49 = vld [vmem:[#allocation8 + $0xea4] sm:$0xf0]  ;;  %4586 = vmatpush.bf16.msra.mxu0 %v6824_v2  ;;  %v8005_v34 = vld [vmem:[#allocation8 + $0x968] sm:$0xf0] }
 0x194   :  { %4596 = vmatpush.bf16.msra.mxu1 %v7176_v55  ;;  %v8676_v61 = vor.u32 %v10030_v49, %v8675_v45  ;;  %v8355_v63 = vld [vmem:[#allocation8 + $0xc08] sm:$0xf]  ;;  %4559 = vmatpush.bf16.msrb.mxu2 %v8388_v57  ;;  %v9730_v40 = vld [vmem:[#allocation8 + $0x54c] sm:$0xf]  ;;  %v8008_v55 = vor.u32 %v9858_v33, %v8005_v34  ;;  %v4341_v19 = vpop.f32.mrf.mxu1 }
 0x195   :  { %v9950_v0 = vld [vmem:[#allocation8 + $0xc24] sm:$0xf0]  ;;  %v7493_v41 = vld [vmem:[#allocation8 + $0x568] sm:$0xf0] }
 0x196   :  { %v8643_v6 = vld [vmem:[#allocation8 + $0xe48] sm:$0xf]  ;;  %v8356_v12 = vor.u32 %v9950_v0, %v8355_v63  ;;  %4571 = vmatpush.bf16.msrb.mxu3 %v8676_v61  ;;  %4587 = vmatmul.bf16.vlgmr.msra.gmra.mxu0 %v10610_v25  ;;  %v9802_v43 = vld [vmem:[#allocation8 + $0x78c] sm:$0xf]  ;;  %v7496_v50 = vor.u32 %v9730_v40, %v7493_v41  ;;  %v4329_v63 = vadd.f32 %v4328_v56, %v10660_v37  ;;  %v4330_v24 = vpop.f32.mrf.mxu0 }
 0x197   :  { %v10022_v8 = vld [vmem:[#allocation8 + $0xe64] sm:$0xf0]  ;;  %4631 = vmatpush.bf16.msrb.mxu0 %v8072_v9  ;;  %v7781_v44 = vld [vmem:[#allocation8 + $0x7a8] sm:$0xf0] }
 0x198   :  { %4597 = vmatpush.bf16.msra.mxu1 %v7144_v62  ;;  %v8644_v17 = vor.u32 %v10022_v8, %v8643_v6  ;;  %v8611_v20 = vld [vmem:[#allocation8 + $0xe08] sm:$0xf]  ;;  %4560 = vmatpush.bf16.msrb.mxu2 %v8356_v12  ;;  %v9930_v45 = vld [vmem:[#allocation8 + $0xb8c] sm:$0xf]  ;;  %v7784_v51 = vor.u32 %v9802_v43, %v7781_v44  ;;  %v10667_v23 = vadd.f32 %v4341_v19, %v4329_v63 }
 0x199   :  { %v10014_v22 = vld [vmem:[#allocation8 + $0xe24] sm:$0xf0]  ;;  %v9850_v48 = vld [vmem:[#allocation8 + $0x90c] sm:$0xf]  ;;  %v8296_v57 = vor.u32 %v9930_v45, %v8293_v46 }
 0x19a   :  { %4572 = vmatpush.bf16.msrb.mxu3 %v8644_v17  ;;  %v8612_v36 = vor.u32 %v10014_v22, %v8611_v20  ;;  %v7973_v49 = vld [vmem:[#allocation8 + $0x928] sm:$0xf0] }
 0x19b   :  { %4561 = vmatmul.bf16.vlgmr.msrb.gmra.mxu2 %v10636_v3  ;;  %4632 = vmatpush.bf16.msrb.mxu0 %v8040_v27  ;;  %v9722_v53 = vld [vmem:[#allocation8 + $0x50c] sm:$0xf]  ;;  %v7976_v59 = vor.u32 %v9850_v48, %v7973_v49  ;;  %v7051_v49 = vld [vmem:[#allocation8 + $0x1d0] sm:$0xf] }
 0x19c   :  { %4605 = vmatpush.bf16.msra.mxu2 %v7560_v16  ;;  %4598 = vmatpush.bf16.msra.mxu1 %v7112_v21  ;;  %v7461_v54 = vld [vmem:[#allocation8 + $0x528] sm:$0xf0] }
 0x19d   :  { %v9794_v60 = vld [vmem:[#allocation8 + $0x74c] sm:$0xf]  ;;  %v7464_v5 = vor.u32 %v9722_v53, %v7461_v54 }
 0x19e   :  { %4573 = vmatpush.bf16.msrb.mxu3 %v8612_v36  ;;  %v7749_v61 = vld [vmem:[#allocation8 + $0x768] sm:$0xf0] }
 0x19f   :  { %4633 = vmatpush.bf16.msrb.mxu0 %v8008_v55  ;;  %v9922_v62 = vld [vmem:[#allocation8 + $0xb4c] sm:$0xf]  ;;  %v7752_v6 = vor.u32 %v9794_v60, %v7749_v61 }
 0x1a0   :  { %4606 = vmatpush.bf16.msra.mxu2 %v7528_v35  ;;  %4599 = vmatpush.bf16.msra.mxu1 %v7080_v38  ;;  %v8261_v0 = vld [vmem:[#allocation8 + $0xb68] sm:$0xf0] }
 0x1a1   :  { %4574 = vmatmul.bf16.vlgmr.msrb.gmra.mxu3 %v10640_v13  ;;  %v9842_v1 = vld [vmem:[#allocation8 + $0x8cc] sm:$0xf]  ;;  %v8264_v10 = vor.u32 %v9922_v62, %v8261_v0 }
 0x1a2   :  { %4618 = vmatpush.bf16.msra.mxu3 %v7816_v39  ;;  %v7941_v2 = vld [vmem:[#allocation8 + $0x8e8] sm:$0xf0] }
 0x1a3   :  { %4600 = vmatmul.bf16.vlgmr.msra.gmra.mxu1 %v10613_v58  ;;  %v9714_v8 = vld [vmem:[#allocation8 + $0x4cc] sm:$0xf]  ;;  %4634 = vmatpush.bf16.msrb.mxu0 %v7976_v59  ;;  %v7944_v11 = vor.u32 %v9842_v1, %v7941_v2  ;;  %v4380_v59 = vpop.f32.mrf.mxu0 }
 0x1a4   :  { %4644 = vmatpush.bf16.msrb.mxu1 %v8328_v47  ;;  %4607 = vmatpush.bf16.msra.mxu2 %v7496_v50  ;;  %v7429_v9 = vld [vmem:[#allocation8 + $0x4e8] sm:$0xf0]  ;;  %v9623_v50 = vld [vmem:[#allocation8 + $0x1ec] sm:$0xf0] }
 0x1a5   :  { %v9786_v12 = vld [vmem:[#allocation8 + $0x70c] sm:$0xf]  ;;  %v7432_v18 = vor.u32 %v9714_v8, %v7429_v9  ;;  %v7052_v1 = vor.u32 %v9623_v50, %v7051_v49  ;;  %v7019_v9 = vld [vmem:[#allocation8 + $0x190] sm:$0xf] }
 0x1a6   :  { %4619 = vmatpush.bf16.msra.mxu3 %v7784_v51  ;;  %v7717_v14 = vld [vmem:[#allocation8 + $0x728] sm:$0xf0]  ;;  %v4343_v51 = vpop.f32.mrf.mxu1 }
 0x1a7   :  { %v9914_v15 = vld [vmem:[#allocation8 + $0xb0c] sm:$0xf]  ;;  %v7720_v20 = vor.u32 %v9786_v12, %v7717_v14  ;;  %4635 = vmatpush.bf16.msrb.mxu0 %v7944_v11 }
 0x1a8   :  { %4645 = vmatpush.bf16.msrb.mxu1 %v8296_v57  ;;  %v8229_v16 = vld [vmem:[#allocation8 + $0xb28] sm:$0xf0]  ;;  %4608 = vmatpush.bf16.msra.mxu2 %v7464_v5 }
 0x1a9   :  { %v9834_v37 = vld [vmem:[#allocation8 + $0x88c] sm:$0xf]  ;;  %v8232_v26 = vor.u32 %v9914_v15, %v8229_v16 }
 0x1aa   :  { %v7909_v17 = vld [vmem:[#allocation8 + $0x8a8] sm:$0xf0]  ;;  %4620 = vmatpush.bf16.msra.mxu3 %v7752_v6  ;;  %v1692_v6 = vperm.slane %v10648_v4, 1  ;;  %v7307_v4 = vld [vmem:[#allocation8 + $0x3d0] sm:$0xf] }
 0x1ab   :  { %v9706_v21 = vld [vmem:[#allocation8 + $0x48c] sm:$0xf]  ;;  %v7912_v27 = vor.u32 %v9834_v37, %v7909_v17 }
 0x1ac   :  { %v7397_v22 = vld [vmem:[#allocation8 + $0x4a8] sm:$0xf0]  ;;  %4646 = vmatpush.bf16.msrb.mxu1 %v8264_v10  ;;  %4609 = vmatpush.bf16.msra.mxu2 %v7432_v18  ;;  %v9615_v10 = vld [vmem:[#allocation8 + $0x1ac] sm:$0xf0]  ;;  %v4381_v24 = vadd.f32 %v4380_v59, %v1692_v6 }
 0x1ad   :  { %v9778_v28 = vld [vmem:[#allocation8 + $0x6cc] sm:$0xf]  ;;  %v7400_v35 = vor.u32 %v9706_v21, %v7397_v22  ;;  %4636 = vmatpush.bf16.msrb.mxu0 %v7912_v27  ;;  %v6987_v27 = vld [vmem:[#allocation8 + $0x150] sm:$0xf] }
 0x1ae   :  { %v7685_v29 = vld [vmem:[#allocation8 + $0x6e8] sm:$0xf0]  ;;  %4621 = vmatpush.bf16.msra.mxu3 %v7720_v20  ;;  %v7020_v20 = vor.u32 %v9615_v10, %v7019_v9  ;;  %v7243_v59 = vld [vmem:[#allocation8 + $0x350] sm:$0xf] }
 0x1af   :  { %v9906_v30 = vld [vmem:[#allocation8 + $0xacc] sm:$0xf]  ;;  %v7688_v36 = vor.u32 %v9778_v28, %v7685_v29  ;;  %v9607_v28 = vld [vmem:[#allocation8 + $0x16c] sm:$0xf0]  ;;  %v4393_v29 = vpop.f32.mrf.mxu1 }
 0x1b0   :  { %v8197_v32 = vld [vmem:[#allocation8 + $0xae8] sm:$0xf0]  ;;  %4647 = vmatpush.bf16.msrb.mxu1 %v8232_v26  ;;  %4610 = vmatpush.bf16.msra.mxu2 %v7400_v35  ;;  %v9687_v26 = vld [vmem:[#allocation8 + $0x3ec] sm:$0xf0] }
 0x1b1   :  { %v9826_v33 = vld [vmem:[#allocation8 + $0x84c] sm:$0xf]  ;;  %v8200_v40 = vor.u32 %v9906_v30, %v8197_v32 }
 0x1b2   :  { %v7877_v34 = vld [vmem:[#allocation8 + $0x868] sm:$0xf0]  ;;  %4622 = vmatpush.bf16.msra.mxu3 %v7688_v36 }
 0x1b3   :  { %v9698_v38 = vld [vmem:[#allocation8 + $0x44c] sm:$0xf]  ;;  %v7880_v41 = vor.u32 %v9826_v33, %v7877_v34  ;;  %v10670_v33 = vadd.f32 %v4393_v29, %v4381_v24  ;;  %v4382_v34 = vpop.f32.mrf.mxu0  ;;  %v6859_v29 = vld [vmem:[#allocation8 + $0x50] sm:$0xf] }
 0x1b4   :  { %v7365_v39 = vld [vmem:[#allocation8 + $0x468] sm:$0xf0]  ;;  %4648 = vmatpush.bf16.msrb.mxu1 %v8200_v40  ;;  %v7308_v40 = vor.u32 %v9687_v26, %v7307_v4 }
 0x1b5   :  { %v9770_v47 = vld [vmem:[#allocation8 + $0x68c] sm:$0xf]  ;;  %v7368_v48 = vor.u32 %v9698_v38, %v7365_v39  ;;  %4637 = vmatpush.bf16.msrb.mxu0 %v7880_v41  ;;  %v6988_v41 = vor.u32 %v9607_v28, %v6987_v27  ;;  %v7179_v27 = vld [vmem:[#allocation8 + $0x2d0] sm:$0xf] }
 0x1b6   :  { %v7653_v55 = vld [vmem:[#allocation8 + $0x6a8] sm:$0xf0]  ;;  %v9655_v28 = vld [vmem:[#allocation8 + $0x2ec] sm:$0xf0] }
 0x1b7   :  { %v9898_v43 = vld [vmem:[#allocation8 + $0xa8c] sm:$0xf]  ;;  %v7656_v53 = vor.u32 %v9770_v47, %v7653_v55  ;;  %4611 = vmatpush.bf16.msra.mxu2 %v7368_v48 }
 0x1b8   :  { %v8165_v44 = vld [vmem:[#allocation8 + $0xaa8] sm:$0xf0] }
 0x1b9   :  { %v9818_v45 = vld [vmem:[#allocation8 + $0x80c] sm:$0xf]  ;;  %v8168_v60 = vor.u32 %v9898_v43, %v8165_v44  ;;  %4623 = vmatpush.bf16.msra.mxu3 %v7656_v53  ;;  %v7275_v43 = vld [vmem:[#allocation8 + $0x390] sm:$0xf] }
 0x1ba   :  { %v7845_v46 = vld [vmem:[#allocation8 + $0x828] sm:$0xf0]  ;;  %v9679_v44 = vld [vmem:[#allocation8 + $0x3ac] sm:$0xf0] }
 0x1bb   :  { %v9690_v54 = vld [vmem:[#allocation8 + $0x40c] sm:$0xf]  ;;  %v7848_v61 = vor.u32 %v9818_v45, %v7845_v46  ;;  %4649 = vmatpush.bf16.msrb.mxu1 %v8168_v60  ;;  %v6955_v45 = vld [vmem:[#allocation8 + $0x110] sm:$0xf]  ;;  %v7276_v53 = vor.u32 %v9679_v44, %v7275_v43  ;;  %v4367_v43 = vpop.f32.mrf.mxu3 }
 0x1bc   :  { %v7333_v56 = vld [vmem:[#allocation8 + $0x428] sm:$0xf0]  ;;  %v9599_v46 = vld [vmem:[#allocation8 + $0x12c] sm:$0xf0] }
 0x1bd   :  { %v10002_v57 = vld [vmem:[#allocation8 + $0xdcc] sm:$0xf]  ;;  %v7336_v8 = vor.u32 %v9690_v54, %v7333_v56  ;;  %4638 = vmatpush.bf16.msrb.mxu0 %v7848_v61  ;;  %v6956_v54 = vor.u32 %v9599_v46, %v6955_v45  ;;  %v9671_v60 = vld [vmem:[#allocation8 + $0x36c] sm:$0xf0] }
 0x1be   :  { %v8581_v62 = vld [vmem:[#allocation8 + $0xde8] sm:$0xf0]  ;;  %v6923_v61 = vld [vmem:[#allocation8 + $0xd0] sm:$0xf] }
 0x1bf   :  { %v9762_v63 = vld [vmem:[#allocation8 + $0x64c] sm:$0xf]  ;;  %v8584_v11 = vor.u32 %v10002_v57, %v8581_v62  ;;  %4612 = vmatpush.bf16.msra.mxu2 %v7336_v8  ;;  %v9591_v62 = vld [vmem:[#allocation8 + $0xec] sm:$0xf0]  ;;  %v7244_v8 = vor.u32 %v9671_v60, %v7243_v59 }
 0x1c0   :  { %v7621_v0 = vld [vmem:[#allocation8 + $0x668] sm:$0xf0]  ;;  %4639 = vmatmul.bf16.vlgmr.msrb.gmra.mxu0 %v10626_v31  ;;  %v6924_v9 = vor.u32 %v9591_v62, %v6923_v61  ;;  %v9647_v44 = vld [vmem:[#allocation8 + $0x2ac] sm:$0xf0] }
 0x1c1   :  { %v9890_v2 = vld [vmem:[#allocation8 + $0xa4c] sm:$0xf]  ;;  %v7624_v12 = vor.u32 %v9762_v63, %v7621_v0  ;;  %4683 = vmatpush.bf16.msra.mxu0 %v7052_v1  ;;  %v4395_v63 = vpop.f32.mrf.mxu1  ;;  %v10676_v1 = vpop.f32.mrf.mxu0  ;;  %v6827_v45 = vld [vmem:[#allocation8 + $0x10] sm:$0xf] }
 0x1c2   :  { %v8133_v5 = vld [vmem:[#allocation8 + $0xa68] sm:$0xf0]  ;;  %4613 = vmatmul.bf16.vlgmr.msra.gmra.mxu2 %v10618_v7  ;;  %v9567_v46 = vld [vmem:[#allocation8 + $0x2c] sm:$0xf0] }
 0x1c3   :  { %v9994_v14 = vld [vmem:[#allocation8 + $0xd8c] sm:$0xf]  ;;  %v8136_v37 = vor.u32 %v9890_v2, %v8133_v5  ;;  %4657 = vmatpush.bf16.msrb.mxu2 %v8584_v11  ;;  %4624 = vmatpush.bf16.msra.mxu3 %v7624_v12  ;;  %v7211_v12 = vld [vmem:[#allocation8 + $0x310] sm:$0xf]  ;;  %v6828_v61 = vor.u32 %v9567_v46, %v6827_v45 }
 0x1c4   :  { %v8549_v15 = vld [vmem:[#allocation8 + $0xda8] sm:$0xf0]  ;;  %v7563_v59 = vld [vmem:[#allocation8 + $0x5d0] sm:$0xf] }
 0x1c5   :  { %v9754_v16 = vld [vmem:[#allocation8 + $0x60c] sm:$0xf]  ;;  %v8552_v30 = vor.u32 %v9994_v14, %v8549_v15  ;;  %4650 = vmatpush.bf16.msrb.mxu1 %v8136_v37  ;;  %4684 = vmatpush.bf16.msra.mxu0 %v7020_v20  ;;  %v9663_v14 = vld [vmem:[#allocation8 + $0x32c] sm:$0xf0]  ;;  %v4354_v37 = vpop.f32.mrf.mxu2 }
 0x1c6   :  { %v7589_v17 = vld [vmem:[#allocation8 + $0x628] sm:$0xf0]  ;;  %v6891_v15 = vld [vmem:[#allocation8 + $0x90] sm:$0xf] }
 0x1c7   :  { %v9882_v18 = vld [vmem:[#allocation8 + $0xa0c] sm:$0xf]  ;;  %v7592_v32 = vor.u32 %v9754_v16, %v7589_v17  ;;  %4658 = vmatpush.bf16.msrb.mxu2 %v8552_v30  ;;  %v9583_v16 = vld [vmem:[#allocation8 + $0xac] sm:$0xf0] }
 0x1c8   :  { %v8101_v19 = vld [vmem:[#allocation8 + $0xa28] sm:$0xf0]  ;;  %v6892_v4 = vor.u32 %v9583_v16, %v6891_v15  ;;  %v9575_v30 = vld [vmem:[#allocation8 + $0x6c] sm:$0xf0] }
 0x1c9   :  { %v10066_v21 = vld [vmem:[#allocation8 + $0xfcc] sm:$0xf]  ;;  %v8104_v35 = vor.u32 %v9882_v18, %v8101_v19  ;;  %4625 = vmatpush.bf16.msra.mxu3 %v7592_v32  ;;  %4685 = vmatpush.bf16.msra.mxu0 %v6988_v41  ;;  %v4355_v18 = vadd.f32 %v4354_v37, %v10667_v23  ;;  %v10679_v32 = vpop.f32.mrf.mxu1  ;;  %v9751_v62 = vld [vmem:[#allocation8 + $0x5ec] sm:$0xf0] }
 0x1ca   :  { %v8837_v22 = vld [vmem:[#allocation8 + $0xfe8] sm:$0xf0]  ;;  %v7531_v15 = vld [vmem:[#allocation8 + $0x590] sm:$0xf] }
 0x1cb   :  { %v8840_v36 = vor.u32 %v10066_v21, %v8837_v22  ;;  %v9986_v38 = vld [vmem:[#allocation8 + $0xd4c] sm:$0xf]  ;;  %4651 = vmatpush.bf16.msrb.mxu1 %v8104_v35  ;;  %v7212_v22 = vor.u32 %v9663_v14, %v7211_v12  ;;  %v4434_v35 = vpop.f32.mrf.mxu0  ;;  %v7564_v12 = vor.u32 %v9751_v62, %v7563_v59  ;;  %v9743_v16 = vld [vmem:[#allocation8 + $0x5ac] sm:$0xf0] }
 0x1cc   :  { %v8517_v39 = vld [vmem:[#allocation8 + $0xd68] sm:$0xf0]  ;;  %4626 = vmatmul.bf16.vlgmr.msra.gmra.mxu3 %v10621_v42  ;;  %v9935_v45 = vld [vmem:[#allocation8 + $0xbac] sm:$0xf0] }
 0x1cd   :  { %v10058_v47 = vld [vmem:[#allocation8 + $0xf8c] sm:$0xf]  ;;  %v8520_v48 = vor.u32 %v9986_v38, %v8517_v39  ;;  %4670 = vmatpush.bf16.msrb.mxu3 %v8840_v36  ;;  %4686 = vmatpush.bf16.msra.mxu0 %v6956_v54  ;;  %v7180_v39 = vor.u32 %v9655_v28, %v7179_v27  ;;  %v9943_v27 = vld [vmem:[#allocation8 + $0xbec] sm:$0xf0] }
 0x1ce   :  { %v8805_v55 = vld [vmem:[#allocation8 + $0xfa8] sm:$0xf0]  ;;  %4652 = vmatmul.bf16.vlgmr.msrb.gmra.mxu1 %v10629_v52  ;;  %v8011_v28 = vld [vmem:[#allocation8 + $0x950] sm:$0xf] }
 0x1cf   :  { %v8808_v49 = vor.u32 %v10058_v47, %v8805_v55  ;;  %v9978_v50 = vld [vmem:[#allocation8 + $0xd0c] sm:$0xf]  ;;  %4696 = vmatpush.bf16.msra.mxu1 %v7308_v40  ;;  %4659 = vmatpush.bf16.msrb.mxu2 %v8520_v48  ;;  %v6860_v40 = vor.u32 %v9575_v30, %v6859_v29  ;;  %v7147_v55 = vld [vmem:[#allocation8 + $0x290] sm:$0xf]  ;;  %v10681_v48 = vadd.f32 %v4367_v43, %v4355_v18 }
 0x1d0   :  { %v8485_v51 = vld [vmem:[#allocation8 + $0xd28] sm:$0xf0]  ;;  %v7148_v60 = vor.u32 %v9647_v44, %v7147_v55  ;;  %v9863_v29 = vld [vmem:[#allocation8 + $0x96c] sm:$0xf0] }
 0x1d1   :  { %v10050_v56 = vld [vmem:[#allocation8 + $0xf4c] sm:$0xf]  ;;  %v8488_v0 = vor.u32 %v9978_v50, %v8485_v51  ;;  %4671 = vmatpush.bf16.msrb.mxu3 %v8808_v49  ;;  %4687 = vmatpush.bf16.msra.mxu0 %v6924_v9  ;;  %v4356_v49 = vpop.f32.mrf.mxu2  ;;  %v8075_v51 = vld [vmem:[#allocation8 + $0x9d0] sm:$0xf] }
 0x1d2   :  { %v8773_v57 = vld [vmem:[#allocation8 + $0xf68] sm:$0xf0]  ;;  %v7787_v55 = vld [vmem:[#allocation8 + $0x790] sm:$0xf] }
 0x1d3   :  { %v8776_v2 = vor.u32 %v10050_v56, %v8773_v57  ;;  %v9970_v5 = vld [vmem:[#allocation8 + $0xccc] sm:$0xf]  ;;  %4697 = vmatpush.bf16.msra.mxu1 %v7276_v53  ;;  %4660 = vmatpush.bf16.msrb.mxu2 %v8488_v0  ;;  %v9879_v53 = vld [vmem:[#allocation8 + $0x9ec] sm:$0xf0] }
 0x1d4   :  { %v8453_v6 = vld [vmem:[#allocation8 + $0xce8] sm:$0xf0]  ;;  %v9807_v43 = vld [vmem:[#allocation8 + $0x7ac] sm:$0xf0] }
 0x1d5   :  { %v10042_v10 = vld [vmem:[#allocation8 + $0xf0c] sm:$0xf]  ;;  %v8456_v17 = vor.u32 %v9970_v5, %v8453_v6  ;;  %4672 = vmatpush.bf16.msrb.mxu3 %v8776_v2  ;;  %4688 = vmatpush.bf16.msra.mxu0 %v6892_v4  ;;  %v8076_v2 = vor.u32 %v9879_v53, %v8075_v51  ;;  %v7115_v5 = vld [vmem:[#allocation8 + $0x250] sm:$0xf] }
 0x1d6   :  { %v8741_v11 = vld [vmem:[#allocation8 + $0xf28] sm:$0xf0]  ;;  %v9639_v6 = vld [vmem:[#allocation8 + $0x26c] sm:$0xf0] }
 0x1d7   :  { %v8744_v19 = vor.u32 %v10042_v10, %v8741_v11  ;;  %v9962_v20 = vld [vmem:[#allocation8 + $0xc8c] sm:$0xf]  ;;  %4698 = vmatpush.bf16.msra.mxu1 %v7244_v8  ;;  %4661 = vmatpush.bf16.msrb.mxu2 %v8456_v17  ;;  %v4447_v8 = vpop.f32.mrf.mxu1  ;;  %v8043_v10 = vld [vmem:[#allocation8 + $0x990] sm:$0xf]  ;;  %v7116_v17 = vor.u32 %v9639_v6, %v7115_v5 }
 0x1d8   :  { %v8421_v21 = vld [vmem:[#allocation8 + $0xca8] sm:$0xf0]  ;;  %v9871_v11 = vld [vmem:[#allocation8 + $0x9ac] sm:$0xf0] }
 0x1d9   :  { %v10034_v24 = vld [vmem:[#allocation8 + $0xecc] sm:$0xf]  ;;  %v8424_v34 = vor.u32 %v9962_v20, %v8421_v21  ;;  %4673 = vmatpush.bf16.msrb.mxu3 %v8744_v19  ;;  %4689 = vmatpush.bf16.msra.mxu0 %v6860_v40  ;;  %v7083_v19 = vld [vmem:[#allocation8 + $0x210] sm:$0xf]  ;;  %v4369_v21 = vpop.f32.mrf.mxu3  ;;  %v4406_v30 = vpop.f32.mrf.mxu2 }
 0x1da   :  { %v8709_v26 = vld [vmem:[#allocation8 + $0xee8] sm:$0xf0]  ;;  %v9631_v20 = vld [vmem:[#allocation8 + $0x22c] sm:$0xf0] }
 0x1db   :  { %v8712_v23 = vor.u32 %v10034_v24, %v8709_v26  ;;  %v9954_v36 = vld [vmem:[#allocation8 + $0xc4c] sm:$0xf]  ;;  %4699 = vmatpush.bf16.msra.mxu1 %v7212_v22  ;;  %4662 = vmatpush.bf16.msrb.mxu2 %v8424_v34  ;;  %v8044_v22 = vor.u32 %v9871_v11, %v8043_v10  ;;  %v7819_v4 = vld [vmem:[#allocation8 + $0x7d0] sm:$0xf]  ;;  %v7532_v34 = vor.u32 %v9743_v16, %v7531_v15  ;;  %v4484_v15 = vpop.f32.mrf.mxu0 }
 0x1dc   :  { %v8389_v38 = vld [vmem:[#allocation8 + $0xc68] sm:$0xf0]  ;;  %v9815_v24 = vld [vmem:[#allocation8 + $0x7ec] sm:$0xf0] }
 0x1dd   :  { %v10026_v41 = vld [vmem:[#allocation8 + $0xe8c] sm:$0xf]  ;;  %v8392_v50 = vor.u32 %v9954_v36, %v8389_v38  ;;  %4674 = vmatpush.bf16.msrb.mxu3 %v8712_v23  ;;  %4690 = vmatpush.bf16.msra.mxu0 %v6828_v61  ;;  %v8331_v26 = vld [vmem:[#allocation8 + $0xbd0] sm:$0xf]  ;;  %v4407_v23 = vadd.f32 %v4406_v30, %v10670_v33  ;;  %v7084_v36 = vor.u32 %v9631_v20, %v7083_v19 }
 0x1de   :  { %v8677_v47 = vld [vmem:[#allocation8 + $0xea8] sm:$0xf0]  ;;  %v7820_v38 = vor.u32 %v9815_v24, %v7819_v4  ;;  %v9735_v40 = vld [vmem:[#allocation8 + $0x56c] sm:$0xf0] }
 0x1df   :  { %v8680_v54 = vor.u32 %v10026_v41, %v8677_v47  ;;  %v9946_v56 = vld [vmem:[#allocation8 + $0xc0c] sm:$0xf]  ;;  %4700 = vmatpush.bf16.msra.mxu1 %v7180_v39  ;;  %4663 = vmatpush.bf16.msrb.mxu2 %v8392_v50  ;;  %v7499_v39 = vld [vmem:[#allocation8 + $0x550] sm:$0xf]  ;;  %v8332_v41 = vor.u32 %v9943_v27, %v8331_v26  ;;  %v8012_v47 = vor.u32 %v9863_v29, %v8011_v28 }
 0x1e0   :  { %v8357_v57 = vld [vmem:[#allocation8 + $0xc28] sm:$0xf0]  ;;  %4691 = vmatmul.bf16.vlgmr.msra.gmra.mxu0 %v10610_v25  ;;  %v8299_v44 = vld [vmem:[#allocation8 + $0xb90] sm:$0xf]  ;;  %v7500_v33 = vor.u32 %v9735_v40, %v7499_v39  ;;  %v7788_v50 = vor.u32 %v9807_v43, %v7787_v55  ;;  %v4497_v40 = vpop.f32.mrf.mxu1 }
 0x1e1   :  { %v10018_v63 = vld [vmem:[#allocation8 + $0xe4c] sm:$0xf]  ;;  %v8360_v9 = vor.u32 %v9946_v56, %v8357_v57  ;;  %4675 = vmatpush.bf16.msrb.mxu3 %v8680_v54  ;;  %4735 = vmatpush.bf16.msrb.mxu0 %v8076_v2  ;;  %v7979_v46 = vld [vmem:[#allocation8 + $0x910] sm:$0xf]  ;;  %v4419_v54 = vpop.f32.mrf.mxu3  ;;  %v8300_v56 = vor.u32 %v9935_v45, %v8299_v44  ;;  %v4408_v5 = vpop.f32.mrf.mxu2 }
 0x1e2   :  { %v8645_v0 = vld [vmem:[#allocation8 + $0xe68] sm:$0xf0]  ;;  %v9855_v49 = vld [vmem:[#allocation8 + $0x92c] sm:$0xf0]  ;;  %v4420_v62 = vadd.f32 %v4419_v54, %v4407_v23 }
 0x1e3   :  { %v8648_v14 = vor.u32 %v10018_v63, %v8645_v0  ;;  %v10010_v37 = vld [vmem:[#allocation8 + $0xe0c] sm:$0xf]  ;;  %4701 = vmatpush.bf16.msra.mxu1 %v7148_v60  ;;  %4664 = vmatpush.bf16.msrb.mxu2 %v8360_v9  ;;  %v7467_v51 = vld [vmem:[#allocation8 + $0x510] sm:$0xf]  ;;  %v7980_v57 = vor.u32 %v9855_v49, %v7979_v46  ;;  %v10689_v9 = vld [vmem:[#allocation10] sm:$0xff]  ;;  %v4486_v49 = vpop.f32.mrf.mxu0 }
 0x1e4   :  { %v8613_v18 = vld [vmem:[#allocation8 + $0xe28] sm:$0xf0]  ;;  %v9727_v53 = vld [vmem:[#allocation8 + $0x52c] sm:$0xf0]  ;;  %v4433_v8 = vadd.f32 %v10676_v1, %v4420_v62  ;;  %v1693_v10 = vperm.slane %v10689_v9, 2 }
 0x1e5   :  { %4676 = vmatpush.bf16.msrb.mxu3 %v8648_v14  ;;  %v8616_v35 = vor.u32 %v10010_v37, %v8613_v18  ;;  %4736 = vmatpush.bf16.msrb.mxu0 %v8044_v22  ;;  %v7755_v59 = vld [vmem:[#allocation8 + $0x750] sm:$0xf]  ;;  %v7468_v6 = vor.u32 %v9727_v53, %v7467_v51  ;;  %v7053_v62 = vld [vmem:[#allocation8 + $0x1f0] sm:$0xf0] }
 0x1e6   :  { %4665 = vmatmul.bf16.vlgmr.msrb.gmra.mxu2 %v10636_v3  ;;  %v9799_v60 = vld [vmem:[#allocation8 + $0x76c] sm:$0xf0]  ;;  %v4446_v20 = vadd.f32 %v10679_v32, %v4433_v8 }
 0x1e7   :  { %4709 = vmatpush.bf16.msra.mxu2 %v7564_v12  ;;  %4702 = vmatpush.bf16.msra.mxu1 %v7116_v17  ;;  %v8267_v61 = vld [vmem:[#allocation8 + $0xb50] sm:$0xf]  ;;  %v7756_v11 = vor.u32 %v9799_v60, %v7755_v59 }
 0x1e8   :  { %v9927_v63 = vld [vmem:[#allocation8 + $0xb6c] sm:$0xf0] }
 0x1e9   :  { %4677 = vmatpush.bf16.msrb.mxu3 %v8616_v35  ;;  %4737 = vmatpush.bf16.msrb.mxu0 %v8012_v47  ;;  %v7947_v0 = vld [vmem:[#allocation8 + $0x8d0] sm:$0xf]  ;;  %v8268_v16 = vor.u32 %v9927_v63, %v8267_v61  ;;  %v4421_v28 = vpop.f32.mrf.mxu3  ;;  %v9619_v61 = vld [vmem:[#allocation8 + $0x1d4] sm:$0xf] }
 0x1ea   :  { %v9847_v2 = vld [vmem:[#allocation8 + $0x8ec] sm:$0xf0] }
 0x1eb   :  { %4710 = vmatpush.bf16.msra.mxu2 %v7532_v34  ;;  %4703 = vmatpush.bf16.msra.mxu1 %v7084_v36  ;;  %v7435_v12 = vld [vmem:[#allocation8 + $0x4d0] sm:$0xf]  ;;  %v7948_v37 = vor.u32 %v9847_v2, %v7947_v0  ;;  %v4485_v36 = vadd.f32 %v4484_v15, %v1693_v10  ;;  %v7056_v15 = vor.u32 %v9619_v61, %v7053_v62 }
 0x1ec   :  { %4678 = vmatmul.bf16.vlgmr.msrb.gmra.mxu3 %v10640_v13  ;;  %v9719_v14 = vld [vmem:[#allocation8 + $0x4ec] sm:$0xf0] }
 0x1ed   :  { %4722 = vmatpush.bf16.msra.mxu3 %v7820_v38  ;;  %4738 = vmatpush.bf16.msrb.mxu0 %v7980_v57  ;;  %v7723_v17 = vld [vmem:[#allocation8 + $0x710] sm:$0xf]  ;;  %v7436_v4 = vor.u32 %v9719_v14, %v7435_v12  ;;  %v10693_v55 = vadd.f32 %v4497_v40, %v4485_v36  ;;  %v6989_v40 = vld [vmem:[#allocation8 + $0x170] sm:$0xf0] }
 0x1ee   :  { %4704 = vmatmul.bf16.vlgmr.msra.gmra.mxu1 %v10613_v58  ;;  %v9791_v18 = vld [vmem:[#allocation8 + $0x72c] sm:$0xf0] }
 0x1ef   :  { %4748 = vmatpush.bf16.msrb.mxu1 %v8332_v41  ;;  %4711 = vmatpush.bf16.msra.mxu2 %v7500_v33  ;;  %v8235_v19 = vld [vmem:[#allocation8 + $0xb10] sm:$0xf]  ;;  %v7724_v24 = vor.u32 %v9791_v18, %v7723_v17  ;;  %v4458_v41 = vpop.f32.mrf.mxu2  ;;  %v4499_v18 = vpop.f32.mrf.mxu1 }
 0x1f0   :  { %v9919_v21 = vld [vmem:[#allocation8 + $0xb2c] sm:$0xf0]  ;;  %v4459_v43 = vadd.f32 %v4458_v41, %v4446_v20 }
 0x1f1   :  { %4723 = vmatpush.bf16.msra.mxu3 %v7788_v50  ;;  %v7915_v1 = vld [vmem:[#allocation8 + $0x890] sm:$0xf]  ;;  %4739 = vmatpush.bf16.msrb.mxu0 %v7948_v37  ;;  %v8236_v29 = vor.u32 %v9919_v21, %v8235_v19  ;;  %v4471_v14 = vpop.f32.mrf.mxu3  ;;  %v9611_v21 = vld [vmem:[#allocation8 + $0x194] sm:$0xf] }
 0x1f2   :  { %v9839_v22 = vld [vmem:[#allocation8 + $0x8ac] sm:$0xf0]  ;;  %v10695_v17 = vadd.f32 %v4471_v14, %v4459_v43 }
 0x1f3   :  { %4749 = vmatpush.bf16.msrb.mxu1 %v8300_v56  ;;  %4712 = vmatpush.bf16.msra.mxu2 %v7468_v6  ;;  %v7403_v26 = vld [vmem:[#allocation8 + $0x490] sm:$0xf]  ;;  %v7916_v30 = vor.u32 %v9839_v22, %v7915_v1  ;;  %v7021_v1 = vld [vmem:[#allocation8 + $0x1b0] sm:$0xf0]  ;;  %v10701_v18 = vpop.f32.mrf.mxu0 }
 0x1f4   :  { %v9711_v27 = vld [vmem:[#allocation8 + $0x4ac] sm:$0xf0] }
 0x1f5   :  { %4724 = vmatpush.bf16.msra.mxu3 %v7756_v11  ;;  %v7691_v34 = vld [vmem:[#allocation8 + $0x6d0] sm:$0xf]  ;;  %v7404_v47 = vor.u32 %v9711_v27, %v7403_v26  ;;  %4740 = vmatpush.bf16.msrb.mxu0 %v7916_v30 }
 0x1f6   :  { %v9783_v35 = vld [vmem:[#allocation8 + $0x6ec] sm:$0xf0] }
 0x1f7   :  { %4750 = vmatpush.bf16.msrb.mxu1 %v8268_v16  ;;  %v8203_v23 = vld [vmem:[#allocation8 + $0xad0] sm:$0xf]  ;;  %4713 = vmatpush.bf16.msra.mxu2 %v7436_v4  ;;  %v7692_v44 = vor.u32 %v9783_v35, %v7691_v34  ;;  %v4460_v19 = vpop.f32.mrf.mxu2  ;;  %v7024_v35 = vor.u32 %v9611_v21, %v7021_v1 }
 0x1f8   :  { %v9911_v38 = vld [vmem:[#allocation8 + $0xaec] sm:$0xf0] }
 0x1f9   :  { %v7883_v32 = vld [vmem:[#allocation8 + $0x850] sm:$0xf]  ;;  %4725 = vmatpush.bf16.msra.mxu3 %v7724_v24  ;;  %v8204_v33 = vor.u32 %v9911_v38, %v8203_v23  ;;  %v9683_v38 = vld [vmem:[#allocation8 + $0x3d4] sm:$0xf]  ;;  %v4473_v49 = vpop.f32.mrf.mxu3 }
 0x1fa   :  { %v9831_v39 = vld [vmem:[#allocation8 + $0x86c] sm:$0xf0] }
 0x1fb   :  { %v7371_v45 = vld [vmem:[#allocation8 + $0x450] sm:$0xf]  ;;  %4751 = vmatpush.bf16.msrb.mxu1 %v8236_v29  ;;  %v7884_v50 = vor.u32 %v9831_v39, %v7883_v32  ;;  %4714 = vmatpush.bf16.msra.mxu2 %v7404_v47  ;;  %v7309_v32 = vld [vmem:[#allocation8 + $0x3f0] sm:$0xf0] }
 0x1fc   :  { %v9703_v46 = vld [vmem:[#allocation8 + $0x46c] sm:$0xf0]  ;;  %v9603_v39 = vld [vmem:[#allocation8 + $0x154] sm:$0xf] }
 0x1fd   :  { %v7659_v51 = vld [vmem:[#allocation8 + $0x690] sm:$0xf]  ;;  %v7372_v60 = vor.u32 %v9703_v46, %v7371_v45  ;;  %4726 = vmatpush.bf16.msra.mxu3 %v7692_v44  ;;  %4741 = vmatpush.bf16.msrb.mxu0 %v7884_v50  ;;  %v6992_v50 = vor.u32 %v9603_v39, %v6989_v40  ;;  %v9571_v39 = vld [vmem:[#allocation8 + $0x54] sm:$0xf] }
 0x1fe   :  { %v9775_v53 = vld [vmem:[#allocation8 + $0x6ac] sm:$0xf0]  ;;  %v6861_v40 = vld [vmem:[#allocation8 + $0x70] sm:$0xf0] }
 0x1ff   :  { %v8171_v54 = vld [vmem:[#allocation8 + $0xa90] sm:$0xf]  ;;  %v7660_v63 = vor.u32 %v9775_v53, %v7659_v51  ;;  %4752 = vmatpush.bf16.msrb.mxu1 %v8204_v33  ;;  %4715 = vmatpush.bf16.msra.mxu2 %v7372_v60  ;;  %v7312_v33 = vor.u32 %v9683_v38, %v7309_v32  ;;  %v9651_v38 = vld [vmem:[#allocation8 + $0x2d4] sm:$0xf] }
 0x200   :  { %v9903_v56 = vld [vmem:[#allocation8 + $0xaac] sm:$0xf0]  ;;  %v7181_v32 = vld [vmem:[#allocation8 + $0x2f0] sm:$0xf0] }
 0x201   :  { %v7851_v57 = vld [vmem:[#allocation8 + $0x810] sm:$0xf]  ;;  %v8172_v6 = vor.u32 %v9903_v56, %v8171_v54  ;;  %4727 = vmatpush.bf16.msra.mxu3 %v7660_v63  ;;  %v9675_v54 = vld [vmem:[#allocation8 + $0x394] sm:$0xf] }
 0x202   :  { %v9823_v59 = vld [vmem:[#allocation8 + $0x82c] sm:$0xf0]  ;;  %v7277_v56 = vld [vmem:[#allocation8 + $0x3b0] sm:$0xf0] }
 0x203   :  { %v7339_v0 = vld [vmem:[#allocation8 + $0x410] sm:$0xf]  ;;  %v7852_v8 = vor.u32 %v9823_v59, %v7851_v57  ;;  %4753 = vmatpush.bf16.msrb.mxu1 %v8172_v6  ;;  %v9595_v57 = vld [vmem:[#allocation8 + $0x114] sm:$0xf] }
 0x204   :  { %v9695_v2 = vld [vmem:[#allocation8 + $0x42c] sm:$0xf0]  ;;  %v6957_v59 = vld [vmem:[#allocation8 + $0x130] sm:$0xf0] }
 0x205   :  { %v8587_v5 = vld [vmem:[#allocation8 + $0xdd0] sm:$0xf]  ;;  %v7340_v20 = vor.u32 %v9695_v2, %v7339_v0  ;;  %4742 = vmatpush.bf16.msrb.mxu0 %v7852_v8  ;;  %v7280_v0 = vor.u32 %v9675_v54, %v7277_v56  ;;  %v6960_v2 = vor.u32 %v9595_v57, %v6957_v59  ;;  %v9667_v8 = vld [vmem:[#allocation8 + $0x354] sm:$0xf] }
 0x206   :  { %v10007_v10 = vld [vmem:[#allocation8 + $0xdec] sm:$0xf0]  ;;  %v9643_v56 = vld [vmem:[#allocation8 + $0x294] sm:$0xf] }
 0x207   :  { %v7627_v11 = vld [vmem:[#allocation8 + $0x650] sm:$0xf]  ;;  %v8588_v22 = vor.u32 %v10007_v10, %v8587_v5  ;;  %4716 = vmatpush.bf16.msra.mxu2 %v7340_v20  ;;  %v7245_v10 = vld [vmem:[#allocation8 + $0x370] sm:$0xf0] }
 0x208   :  { %v9767_v12 = vld [vmem:[#allocation8 + $0x66c] sm:$0xf0]  ;;  %4743 = vmatmul.bf16.vlgmr.msrb.gmra.mxu0 %v10626_v31  ;;  %v7248_v19 = vor.u32 %v9667_v8, %v7245_v10  ;;  %v7149_v57 = vld [vmem:[#allocation8 + $0x2b0] sm:$0xf0] }
 0x209   :  { %v8139_v16 = vld [vmem:[#allocation8 + $0xa50] sm:$0xf]  ;;  %v7628_v4 = vor.u32 %v9767_v12, %v7627_v11  ;;  %4787 = vmatpush.bf16.msra.mxu0 %v7056_v15  ;;  %v9587_v11 = vld [vmem:[#allocation8 + $0xd4] sm:$0xf]  ;;  %v7152_v8 = vor.u32 %v9643_v56, %v7149_v57 }
 0x20a   :  { %v9895_v37 = vld [vmem:[#allocation8 + $0xa6c] sm:$0xf0]  ;;  %4717 = vmatmul.bf16.vlgmr.msra.gmra.mxu2 %v10618_v7  ;;  %v6925_v12 = vld [vmem:[#allocation8 + $0xf0] sm:$0xf0] }
 0x20b   :  { %v8555_v24 = vld [vmem:[#allocation8 + $0xd90] sm:$0xf]  ;;  %v8140_v28 = vor.u32 %v9895_v37, %v8139_v16  ;;  %4761 = vmatpush.bf16.msrb.mxu2 %v8588_v22  ;;  %4728 = vmatpush.bf16.msra.mxu3 %v7628_v4  ;;  %v6928_v20 = vor.u32 %v9587_v11, %v6925_v12  ;;  %v9659_v22 = vld [vmem:[#allocation8 + $0x314] sm:$0xf] }
 0x20c   :  { %v9999_v26 = vld [vmem:[#allocation8 + $0xdac] sm:$0xf0]  ;;  %v7213_v4 = vld [vmem:[#allocation8 + $0x330] sm:$0xf0] }
 0x20d   :  { %v7595_v27 = vld [vmem:[#allocation8 + $0x610] sm:$0xf]  ;;  %v8556_v41 = vor.u32 %v9999_v26, %v8555_v24  ;;  %4754 = vmatpush.bf16.msrb.mxu1 %v8140_v28  ;;  %4788 = vmatpush.bf16.msra.mxu0 %v7024_v35  ;;  %v9579_v24 = vld [vmem:[#allocation8 + $0x94] sm:$0xf] }
 0x20e   :  { %v9759_v29 = vld [vmem:[#allocation8 + $0x62c] sm:$0xf0]  ;;  %v6893_v26 = vld [vmem:[#allocation8 + $0xb0] sm:$0xf0] }
 0x20f   :  { %v8107_v30 = vld [vmem:[#allocation8 + $0xa10] sm:$0xf]  ;;  %v7596_v47 = vor.u32 %v9759_v29, %v7595_v27  ;;  %4762 = vmatpush.bf16.msrb.mxu2 %v8556_v41  ;;  %v6896_v35 = vor.u32 %v9579_v24, %v6893_v26  ;;  %v4510_v41 = vpop.f32.mrf.mxu2  ;;  %v9563_v59 = vld [vmem:[#allocation8 + $0x14] sm:$0xf] }
 0x210   :  { %v9887_v34 = vld [vmem:[#allocation8 + $0xa2c] sm:$0xf0]  ;;  %v7565_v11 = vld [vmem:[#allocation8 + $0x5f0] sm:$0xf0] }
 0x211   :  { %v8843_v23 = vld [vmem:[#allocation8 + $0xfd0] sm:$0xf]  ;;  %v8108_v43 = vor.u32 %v9887_v34, %v8107_v30  ;;  %4729 = vmatpush.bf16.msra.mxu3 %v7596_v47  ;;  %4789 = vmatpush.bf16.msra.mxu0 %v6992_v50  ;;  %v7216_v34 = vor.u32 %v9659_v22, %v7213_v4  ;;  %v10703_v47 = vpop.f32.mrf.mxu1  ;;  %v7184_v50 = vor.u32 %v9651_v38, %v7181_v32  ;;  %v9867_v22 = vld [vmem:[#allocation8 + $0x994] sm:$0xf] }
 0x212   :  { %v10071_v36 = vld [vmem:[#allocation8 + $0xfec] sm:$0xf0]  ;;  %v8045_v4 = vld [vmem:[#allocation8 + $0x9b0] sm:$0xf0] }
 0x213   :  { %v8844_v44 = vor.u32 %v10071_v36, %v8843_v23  ;;  %v8523_v45 = vld [vmem:[#allocation8 + $0xd50] sm:$0xf]  ;;  %4755 = vmatpush.bf16.msrb.mxu1 %v8108_v43  ;;  %v8048_v38 = vor.u32 %v9867_v22, %v8045_v4  ;;  %v9811_v32 = vld [vmem:[#allocation8 + $0x7d4] sm:$0xf] }
 0x214   :  { %v9991_v46 = vld [vmem:[#allocation8 + $0xd6c] sm:$0xf0]  ;;  %4730 = vmatmul.bf16.vlgmr.msra.gmra.mxu3 %v10621_v42  ;;  %v9803_v56 = vld [vmem:[#allocation8 + $0x794] sm:$0xf] }
 0x215   :  { %v8811_v51 = vld [vmem:[#allocation8 + $0xf90] sm:$0xf]  ;;  %v8524_v60 = vor.u32 %v9991_v46, %v8523_v45  ;;  %4774 = vmatpush.bf16.msrb.mxu3 %v8844_v44  ;;  %4790 = vmatpush.bf16.msra.mxu0 %v6960_v2  ;;  %v4511_v44 = vadd.f32 %v4510_v41, %v10693_v55  ;;  %v7789_v57 = vld [vmem:[#allocation8 + $0x7b0] sm:$0xf0] }
 0x216   :  { %v10063_v53 = vld [vmem:[#allocation8 + $0xfac] sm:$0xf0]  ;;  %4756 = vmatmul.bf16.vlgmr.msrb.gmra.mxu1 %v10629_v52  ;;  %v9787_v4 = vld [vmem:[#allocation8 + $0x714] sm:$0xf] }
 0x217   :  { %v8812_v61 = vor.u32 %v10063_v53, %v8811_v51  ;;  %v8491_v62 = vld [vmem:[#allocation8 + $0xd10] sm:$0xf]  ;;  %4800 = vmatpush.bf16.msra.mxu1 %v7312_v33  ;;  %4763 = vmatpush.bf16.msrb.mxu2 %v8524_v60  ;;  %v4538_v33 = vpop.f32.mrf.mxu0  ;;  %v6864_v51 = vor.u32 %v9571_v39, %v6861_v40  ;;  %v6829_v60 = vld [vmem:[#allocation8 + $0x30] sm:$0xf0] }
 0x218   :  { %v9983_v63 = vld [vmem:[#allocation8 + $0xd2c] sm:$0xf0]  ;;  %v6832_v10 = vor.u32 %v9563_v59, %v6829_v60  ;;  %v7821_v39 = vld [vmem:[#allocation8 + $0x7f0] sm:$0xf0] }
 0x219   :  { %v8779_v5 = vld [vmem:[#allocation8 + $0xf50] sm:$0xf]  ;;  %v8492_v14 = vor.u32 %v9983_v63, %v8491_v62  ;;  %4775 = vmatpush.bf16.msrb.mxu3 %v8812_v61  ;;  %4791 = vmatpush.bf16.msra.mxu0 %v6928_v20  ;;  %v9875_v62 = vld [vmem:[#allocation8 + $0x9d4] sm:$0xf]  ;;  %v4512_v20 = vpop.f32.mrf.mxu2 }
 0x21a   :  { %v10055_v6 = vld [vmem:[#allocation8 + $0xf6c] sm:$0xf0]  ;;  %v8077_v63 = vld [vmem:[#allocation8 + $0x9f0] sm:$0xf0] }
 0x21b   :  { %v8780_v15 = vor.u32 %v10055_v6, %v8779_v5  ;;  %v8459_v16 = vld [vmem:[#allocation8 + $0xcd0] sm:$0xf]  ;;  %4801 = vmatpush.bf16.msra.mxu1 %v7280_v0  ;;  %4764 = vmatpush.bf16.msrb.mxu2 %v8492_v14  ;;  %v9747_v5 = vld [vmem:[#allocation8 + $0x5d4] sm:$0xf]  ;;  %v4523_v6 = vpop.f32.mrf.mxu3 }
 0x21c   :  { %v9975_v37 = vld [vmem:[#allocation8 + $0xcec] sm:$0xf0]  ;;  %v7568_v26 = vor.u32 %v9747_v5, %v7565_v11  ;;  %v9939_v40 = vld [vmem:[#allocation8 + $0xbd4] sm:$0xf] }
 0x21d   :  { %v8747_v21 = vld [vmem:[#allocation8 + $0xf10] sm:$0xf]  ;;  %v8460_v27 = vor.u32 %v9975_v37, %v8459_v16  ;;  %4776 = vmatpush.bf16.msrb.mxu3 %v8780_v15  ;;  %4792 = vmatpush.bf16.msra.mxu0 %v6896_v35  ;;  %v4524_v15 = vadd.f32 %v4523_v6, %v4511_v44  ;;  %v8080_v16 = vor.u32 %v9875_v62, %v8077_v63  ;;  %v9635_v37 = vld [vmem:[#allocation8 + $0x254] sm:$0xf] }
 0x21e   :  { %v10047_v1 = vld [vmem:[#allocation8 + $0xf2c] sm:$0xf0]  ;;  %v8013_v44 = vld [vmem:[#allocation8 + $0x970] sm:$0xf0] }
 0x21f   :  { %v8748_v28 = vor.u32 %v10047_v1, %v8747_v21  ;;  %v8427_v29 = vld [vmem:[#allocation8 + $0xc90] sm:$0xf]  ;;  %4802 = vmatpush.bf16.msra.mxu1 %v7248_v19  ;;  %4765 = vmatpush.bf16.msrb.mxu2 %v8460_v27  ;;  %v7117_v19 = vld [vmem:[#allocation8 + $0x270] sm:$0xf0]  ;;  %v4551_v21 = vpop.f32.mrf.mxu1  ;;  %v4537_v24 = vadd.f32 %v10701_v18, %v4524_v15 }
 0x220   :  { %v9967_v30 = vld [vmem:[#allocation8 + $0xcac] sm:$0xf0]  ;;  %v8333_v18 = vld [vmem:[#allocation8 + $0xbf0] sm:$0xf0]  ;;  %v4588_v21 = vpop.f32.mrf.mxu0 }
 0x221   :  { %v8715_v23 = vld [vmem:[#allocation8 + $0xed0] sm:$0xf]  ;;  %v8428_v43 = vor.u32 %v9967_v30, %v8427_v29  ;;  %4777 = vmatpush.bf16.msrb.mxu3 %v8748_v28  ;;  %4793 = vmatpush.bf16.msra.mxu0 %v6864_v51  ;;  %v9739_v28 = vld [vmem:[#allocation8 + $0x594] sm:$0xf]  ;;  %v10708_v41 = vadd.f32 %v10703_v47, %v4537_v24  ;;  %v8336_v47 = vor.u32 %v9939_v40, %v8333_v18 }
 0x222   :  { %v10039_v36 = vld [vmem:[#allocation8 + $0xeec] sm:$0xf0]  ;;  %v7533_v29 = vld [vmem:[#allocation8 + $0x5b0] sm:$0xf0] }
 0x223   :  { %v8716_v45 = vor.u32 %v10039_v36, %v8715_v23  ;;  %v8395_v46 = vld [vmem:[#allocation8 + $0xc50] sm:$0xf]  ;;  %4803 = vmatpush.bf16.msra.mxu1 %v7216_v34  ;;  %4766 = vmatpush.bf16.msrb.mxu2 %v8428_v43  ;;  %v7120_v34 = vor.u32 %v9635_v37, %v7117_v19  ;;  %v9627_v23 = vld [vmem:[#allocation8 + $0x214] sm:$0xf] }
 0x224   :  { %v9959_v49 = vld [vmem:[#allocation8 + $0xc6c] sm:$0xf0]  ;;  %v7085_v36 = vld [vmem:[#allocation8 + $0x230] sm:$0xf0] }
 0x225   :  { %v8683_v53 = vld [vmem:[#allocation8 + $0xe90] sm:$0xf]  ;;  %v8396_v61 = vor.u32 %v9959_v49, %v8395_v46  ;;  %4778 = vmatpush.bf16.msrb.mxu3 %v8716_v45  ;;  %4794 = vmatpush.bf16.msra.mxu0 %v6832_v10  ;;  %v9859_v43 = vld [vmem:[#allocation8 + $0x954] sm:$0xf]  ;;  %v7536_v45 = vor.u32 %v9739_v28, %v7533_v29  ;;  %v4525_v49 = vpop.f32.mrf.mxu3  ;;  %v7088_v33 = vor.u32 %v9627_v23, %v7085_v36 }
 0x226   :  { %v10031_v54 = vld [vmem:[#allocation8 + $0xeac] sm:$0xf0]  ;;  %v9731_v51 = vld [vmem:[#allocation8 + $0x554] sm:$0xf] }
 0x227   :  { %v8684_v55 = vor.u32 %v10031_v54, %v8683_v53  ;;  %v8363_v0 = vld [vmem:[#allocation8 + $0xc10] sm:$0xf]  ;;  %4804 = vmatpush.bf16.msra.mxu1 %v7184_v50  ;;  %4767 = vmatpush.bf16.msrb.mxu2 %v8396_v61  ;;  %v7824_v50 = vor.u32 %v9811_v32, %v7821_v39  ;;  %v7501_v53 = vld [vmem:[#allocation8 + $0x570] sm:$0xf0]  ;;  %v8016_v54 = vor.u32 %v9859_v43, %v8013_v44 }
 0x228   :  { %v9951_v2 = vld [vmem:[#allocation8 + $0xc2c] sm:$0xf0]  ;;  %4795 = vmatmul.bf16.vlgmr.msra.gmra.mxu0 %v10610_v25  ;;  %v9931_v59 = vld [vmem:[#allocation8 + $0xb94] sm:$0xf]  ;;  %v7504_v63 = vor.u32 %v9731_v51, %v7501_v53 }
 0x229   :  { %v8651_v12 = vld [vmem:[#allocation8 + $0xe50] sm:$0xf]  ;;  %v8364_v1 = vor.u32 %v9951_v2, %v8363_v0  ;;  %4779 = vmatpush.bf16.msrb.mxu3 %v8684_v55  ;;  %4839 = vmatpush.bf16.msrb.mxu0 %v8080_v16  ;;  %v8301_v60 = vld [vmem:[#allocation8 + $0xbb0] sm:$0xf0]  ;;  %v7792_v55 = vor.u32 %v9803_v56, %v7789_v57  ;;  %v4590_v57 = vpop.f32.mrf.mxu0 }
 0x22a   :  { %v10023_v14 = vld [vmem:[#allocation8 + $0xe6c] sm:$0xf0]  ;;  %v9851_v61 = vld [vmem:[#allocation8 + $0x914] sm:$0xf]  ;;  %v8304_v5 = vor.u32 %v9931_v59, %v8301_v60 }
 0x22b   :  { %v8652_v27 = vor.u32 %v10023_v14, %v8651_v12  ;;  %v8619_v30 = vld [vmem:[#allocation8 + $0xe10] sm:$0xf]  ;;  %4805 = vmatpush.bf16.msra.mxu1 %v7152_v8  ;;  %4768 = vmatpush.bf16.msrb.mxu2 %v8364_v1  ;;  %v7981_v62 = vld [vmem:[#allocation8 + $0x930] sm:$0xf0] }
 0x22c   :  { %v10015_v35 = vld [vmem:[#allocation8 + $0xe2c] sm:$0xf0]  ;;  %v9723_v0 = vld [vmem:[#allocation8 + $0x514] sm:$0xf]  ;;  %v7984_v6 = vor.u32 %v9851_v61, %v7981_v62 }
 0x22d   :  { %4780 = vmatpush.bf16.msrb.mxu3 %v8652_v27  ;;  %v8620_v46 = vor.u32 %v10015_v35, %v8619_v30  ;;  %4840 = vmatpush.bf16.msrb.mxu0 %v8048_v38  ;;  %v7469_v2 = vld [vmem:[#allocation8 + $0x530] sm:$0xf0]  ;;  %v1694_v30 = vperm.slane %v10689_v9, 3  ;;  %v4562_v9 = vpop.f32.mrf.mxu2 }
 0x22e   :  { %4769 = vmatmul.bf16.vlgmr.msrb.gmra.mxu2 %v10636_v3  ;;  %v9795_v8 = vld [vmem:[#allocation8 + $0x754] sm:$0xf]  ;;  %v7472_v16 = vor.u32 %v9723_v0, %v7469_v2 }
 0x22f   :  { %4813 = vmatpush.bf16.msra.mxu2 %v7568_v26  ;;  %4806 = vmatpush.bf16.msra.mxu1 %v7120_v34  ;;  %v7757_v10 = vld [vmem:[#allocation8 + $0x770] sm:$0xf0] }
 0x230   :  { %v9923_v11 = vld [vmem:[#allocation8 + $0xb54] sm:$0xf]  ;;  %v7760_v37 = vor.u32 %v9795_v8, %v7757_v10 }
 0x231   :  { %4781 = vmatpush.bf16.msrb.mxu3 %v8620_v46  ;;  %4841 = vmatpush.bf16.msrb.mxu0 %v8016_v54  ;;  %v8269_v12 = vld [vmem:[#allocation8 + $0xb70] sm:$0xf0]  ;;  %v4589_v46 = vadd.f32 %v4588_v21, %v1694_v30  ;;  %v4563_v54 = vadd.f32 %v4562_v9, %v10708_v41 }
 0x232   :  { %v9843_v14 = vld [vmem:[#allocation8 + $0x8d4] sm:$0xf]  ;;  %v8272_v1 = vor.u32 %v9923_v11, %v8269_v12  ;;  %v4575_v12 = vpop.f32.mrf.mxu3 }
 0x233   :  { %4814 = vmatpush.bf16.msra.mxu2 %v7536_v45  ;;  %4807 = vmatpush.bf16.msra.mxu1 %v7088_v33  ;;  %v7949_v15 = vld [vmem:[#allocation8 + $0x8f0] sm:$0xf0]  ;;  %v4601_v33 = vpop.f32.mrf.mxu1 }
 0x234   :  { %4782 = vmatmul.bf16.vlgmr.msrb.gmra.mxu3 %v10640_v13  ;;  %v9715_v19 = vld [vmem:[#allocation8 + $0x4d4] sm:$0xf]  ;;  %v7952_v22 = vor.u32 %v9843_v14, %v7949_v15  ;;  %v10716_v56 = vadd.f32 %v4601_v33, %v4589_v46  ;;  %v6995_v46 = vld [vmem:[#allocation8 + $0x158] sm:$0xf] }
 0x235   :  { %4826 = vmatpush.bf16.msra.mxu3 %v7824_v50  ;;  %v7437_v20 = vld [vmem:[#allocation8 + $0x4f0] sm:$0xf0]  ;;  %4842 = vmatpush.bf16.msrb.mxu0 %v7984_v6  ;;  %v9624_v6 = vld [vmem:[#allocation8 + $0x1f4] sm:$0xf0] }
 0x236   :  { %4808 = vmatmul.bf16.vlgmr.msra.gmra.mxu1 %v10613_v58  ;;  %v7725_v24 = vld [vmem:[#allocation8 + $0x730] sm:$0xf0]  ;;  %v7440_v34 = vor.u32 %v9715_v19, %v7437_v20  ;;  %v10718_v20 = vadd.f32 %v4575_v12, %v4563_v54 }
 0x237   :  { %4852 = vmatpush.bf16.msrb.mxu1 %v8336_v47  ;;  %4815 = vmatpush.bf16.msra.mxu2 %v7504_v63  ;;  %v9915_v26 = vld [vmem:[#allocation8 + $0xb14] sm:$0xf]  ;;  %v7728_v35 = vor.u32 %v9787_v4, %v7725_v24  ;;  %v7027_v24 = vld [vmem:[#allocation8 + $0x198] sm:$0xf] }
 0x238   :  { %v8237_v27 = vld [vmem:[#allocation8 + $0xb30] sm:$0xf0] }
 0x239   :  { %4827 = vmatpush.bf16.msra.mxu3 %v7792_v55  ;;  %v9835_v28 = vld [vmem:[#allocation8 + $0x894] sm:$0xf]  ;;  %4843 = vmatpush.bf16.msrb.mxu0 %v7952_v22  ;;  %v8240_v32 = vor.u32 %v9915_v26, %v8237_v27  ;;  %v9616_v26 = vld [vmem:[#allocation8 + $0x1b4] sm:$0xf0]  ;;  %v4564_v27 = vpop.f32.mrf.mxu2 }
 0x23a   :  { %v7917_v29 = vld [vmem:[#allocation8 + $0x8b0] sm:$0xf0] }
 0x23b   :  { %4853 = vmatpush.bf16.msrb.mxu1 %v8304_v5  ;;  %4816 = vmatpush.bf16.msra.mxu2 %v7472_v16  ;;  %v9707_v23 = vld [vmem:[#allocation8 + $0x494] sm:$0xf]  ;;  %v7920_v39 = vor.u32 %v9835_v28, %v7917_v29  ;;  %v7059_v5 = vld [vmem:[#allocation8 + $0x1d8] sm:$0xf]  ;;  %v4603_v28 = vpop.f32.mrf.mxu1 }
 0x23c   :  { %v7405_v36 = vld [vmem:[#allocation8 + $0x4b0] sm:$0xf0]  ;;  %v7060_v21 = vor.u32 %v9624_v6, %v7059_v5 }
 0x23d   :  { %4828 = vmatpush.bf16.msra.mxu3 %v7760_v37  ;;  %v9779_v38 = vld [vmem:[#allocation8 + $0x6d4] sm:$0xf]  ;;  %v7408_v49 = vor.u32 %v9707_v23, %v7405_v36  ;;  %4844 = vmatpush.bf16.msrb.mxu0 %v7920_v39 }
 0x23e   :  { %v7693_v40 = vld [vmem:[#allocation8 + $0x6f0] sm:$0xf0] }
 0x23f   :  { %4854 = vmatpush.bf16.msrb.mxu1 %v8272_v1  ;;  %v9907_v18 = vld [vmem:[#allocation8 + $0xad4] sm:$0xf]  ;;  %4817 = vmatpush.bf16.msra.mxu2 %v7440_v34  ;;  %v7696_v50 = vor.u32 %v9779_v38, %v7693_v40  ;;  %v7028_v40 = vor.u32 %v9616_v26, %v7027_v24 }
 0x240   :  { %v8205_v43 = vld [vmem:[#allocation8 + $0xaf0] sm:$0xf0] }
 0x241   :  { %v9827_v44 = vld [vmem:[#allocation8 + $0x854] sm:$0xf]  ;;  %4829 = vmatpush.bf16.msra.mxu3 %v7728_v35  ;;  %v8208_v51 = vor.u32 %v9907_v18, %v8205_v43 }
 0x242   :  { %v7885_v45 = vld [vmem:[#allocation8 + $0x870] sm:$0xf0] }
 0x243   :  { %v9699_v53 = vld [vmem:[#allocation8 + $0x454] sm:$0xf]  ;;  %4855 = vmatpush.bf16.msrb.mxu1 %v8240_v32  ;;  %v7888_v59 = vor.u32 %v9827_v44, %v7885_v45  ;;  %4818 = vmatpush.bf16.msra.mxu2 %v7408_v49  ;;  %v7315_v44 = vld [vmem:[#allocation8 + $0x3d8] sm:$0xf] }
 0x244   :  { %v7373_v47 = vld [vmem:[#allocation8 + $0x470] sm:$0xf0]  ;;  %v9688_v45 = vld [vmem:[#allocation8 + $0x3f4] sm:$0xf0] }
 0x245   :  { %v9771_v60 = vld [vmem:[#allocation8 + $0x694] sm:$0xf]  ;;  %v7376_v2 = vor.u32 %v9699_v53, %v7373_v47  ;;  %4830 = vmatpush.bf16.msra.mxu3 %v7696_v50  ;;  %4845 = vmatpush.bf16.msrb.mxu0 %v7888_v59  ;;  %v9608_v49 = vld [vmem:[#allocation8 + $0x174] sm:$0xf0]  ;;  %v4577_v50 = vpop.f32.mrf.mxu3  ;;  %v7316_v57 = vor.u32 %v9688_v45, %v7315_v44 }
 0x246   :  { %v7661_v61 = vld [vmem:[#allocation8 + $0x6b0] sm:$0xf0]  ;;  %v6996_v59 = vor.u32 %v9608_v49, %v6995_v46  ;;  %v7187_v44 = vld [vmem:[#allocation8 + $0x2d8] sm:$0xf] }
 0x247   :  { %v9899_v62 = vld [vmem:[#allocation8 + $0xa94] sm:$0xf]  ;;  %v7664_v8 = vor.u32 %v9771_v60, %v7661_v61  ;;  %4856 = vmatpush.bf16.msrb.mxu1 %v8208_v51  ;;  %4819 = vmatpush.bf16.msra.mxu2 %v7376_v2  ;;  %v9656_v45 = vld [vmem:[#allocation8 + $0x2f4] sm:$0xf0] }
 0x248   :  { %v8173_v63 = vld [vmem:[#allocation8 + $0xab0] sm:$0xf0]  ;;  %v6867_v46 = vld [vmem:[#allocation8 + $0x58] sm:$0xf] }
 0x249   :  { %v9819_v55 = vld [vmem:[#allocation8 + $0x814] sm:$0xf]  ;;  %v8176_v14 = vor.u32 %v9899_v62, %v8173_v63  ;;  %4831 = vmatpush.bf16.msra.mxu3 %v7664_v8  ;;  %v7283_v62 = vld [vmem:[#allocation8 + $0x398] sm:$0xf] }
 0x24a   :  { %v7853_v0 = vld [vmem:[#allocation8 + $0x830] sm:$0xf0]  ;;  %v9680_v63 = vld [vmem:[#allocation8 + $0x3b4] sm:$0xf0] }
 0x24b   :  { %v9691_v10 = vld [vmem:[#allocation8 + $0x414] sm:$0xf]  ;;  %v7856_v15 = vor.u32 %v9819_v55, %v7853_v0  ;;  %4857 = vmatpush.bf16.msrb.mxu1 %v8176_v14  ;;  %v6963_v55 = vld [vmem:[#allocation8 + $0x118] sm:$0xf]  ;;  %v4653_v50 = vpop.f32.mrf.mxu1 }
 0x24c   :  { %v7341_v41 = vld [vmem:[#allocation8 + $0x430] sm:$0xf0]  ;;  %v9600_v0 = vld [vmem:[#allocation8 + $0x134] sm:$0xf0] }
 0x24d   :  { %v10003_v11 = vld [vmem:[#allocation8 + $0xdd4] sm:$0xf]  ;;  %v7344_v4 = vor.u32 %v9691_v10, %v7341_v41  ;;  %4846 = vmatpush.bf16.msrb.mxu0 %v7856_v15  ;;  %v7284_v10 = vor.u32 %v9680_v63, %v7283_v62  ;;  %v6964_v41 = vor.u32 %v9600_v0, %v6963_v55  ;;  %v7251_v14 = vld [vmem:[#allocation8 + $0x358] sm:$0xf] }
 0x24e   :  { %v8589_v16 = vld [vmem:[#allocation8 + $0xdf0] sm:$0xf0]  ;;  %v9672_v15 = vld [vmem:[#allocation8 + $0x374] sm:$0xf0] }
 0x24f   :  { %v9763_v37 = vld [vmem:[#allocation8 + $0x654] sm:$0xf]  ;;  %v8592_v29 = vor.u32 %v10003_v11, %v8589_v16  ;;  %4820 = vmatpush.bf16.msra.mxu2 %v7344_v4  ;;  %v6931_v16 = vld [vmem:[#allocation8 + $0xd8] sm:$0xf]  ;;  %v10724_v4 = vpop.f32.mrf.mxu0  ;;  %v7252_v24 = vor.u32 %v9672_v15, %v7251_v14 }
 0x250   :  { %v7629_v19 = vld [vmem:[#allocation8 + $0x670] sm:$0xf0]  ;;  %4847 = vmatmul.bf16.vlgmr.msrb.gmra.mxu0 %v10626_v31  ;;  %v9576_v49 = vld [vmem:[#allocation8 + $0x74] sm:$0xf0] }
 0x251   :  { %v9891_v1 = vld [vmem:[#allocation8 + $0xa54] sm:$0xf]  ;;  %v7632_v30 = vor.u32 %v9763_v37, %v7629_v19  ;;  %4891 = vmatpush.bf16.msra.mxu0 %v7060_v21  ;;  %v9592_v37 = vld [vmem:[#allocation8 + $0xf4] sm:$0xf0] }
 0x252   :  { %v8141_v22 = vld [vmem:[#allocation8 + $0xa70] sm:$0xf0]  ;;  %4821 = vmatmul.bf16.vlgmr.msra.gmra.mxu2 %v10618_v7  ;;  %v6932_v26 = vor.u32 %v9592_v37, %v6931_v16  ;;  %v7155_v63 = vld [vmem:[#allocation8 + $0x298] sm:$0xf] }
 0x253   :  { %v9995_v34 = vld [vmem:[#allocation8 + $0xd94] sm:$0xf]  ;;  %v8144_v36 = vor.u32 %v9891_v1, %v8141_v22  ;;  %4865 = vmatpush.bf16.msrb.mxu2 %v8592_v29  ;;  %4832 = vmatpush.bf16.msra.mxu3 %v7632_v30  ;;  %v7219_v29 = vld [vmem:[#allocation8 + $0x318] sm:$0xf] }
 0x254   :  { %v8557_v35 = vld [vmem:[#allocation8 + $0xdb0] sm:$0xf0]  ;;  %v9664_v30 = vld [vmem:[#allocation8 + $0x334] sm:$0xf0] }
 0x255   :  { %v9755_v23 = vld [vmem:[#allocation8 + $0x614] sm:$0xf]  ;;  %v8560_v9 = vor.u32 %v9995_v34, %v8557_v35  ;;  %4858 = vmatpush.bf16.msrb.mxu1 %v8144_v36  ;;  %4892 = vmatpush.bf16.msra.mxu0 %v7028_v40  ;;  %v6899_v34 = vld [vmem:[#allocation8 + $0x98] sm:$0xf] }
 0x256   :  { %v7597_v38 = vld [vmem:[#allocation8 + $0x630] sm:$0xf0]  ;;  %v9584_v35 = vld [vmem:[#allocation8 + $0xb4] sm:$0xf0] }
 0x257   :  { %v9883_v32 = vld [vmem:[#allocation8 + $0xa14] sm:$0xf]  ;;  %v7600_v33 = vor.u32 %v9755_v23, %v7597_v38  ;;  %4866 = vmatpush.bf16.msrb.mxu2 %v8560_v9  ;;  %v6900_v40 = vor.u32 %v9584_v35, %v6899_v34  ;;  %v9648_v55 = vld [vmem:[#allocation8 + $0x2b4] sm:$0xf0]  ;;  %v4655_v34 = vpop.f32.mrf.mxu1 }
 0x258   :  { %v8109_v39 = vld [vmem:[#allocation8 + $0xa30] sm:$0xf0]  ;;  %v6835_v0 = vld [vmem:[#allocation8 + $0x18] sm:$0xf]  ;;  %v7156_v14 = vor.u32 %v9648_v55, %v7155_v63 }
 0x259   :  { %v10067_v18 = vld [vmem:[#allocation8 + $0xfd4] sm:$0xf]  ;;  %v8112_v51 = vor.u32 %v9883_v32, %v8109_v39  ;;  %4833 = vmatpush.bf16.msra.mxu3 %v7600_v33  ;;  %4893 = vmatpush.bf16.msra.mxu0 %v6996_v59  ;;  %v7220_v39 = vor.u32 %v9664_v30, %v7219_v29  ;;  %v4614_v33 = vpop.f32.mrf.mxu2  ;;  %v7188_v59 = vor.u32 %v9656_v45, %v7187_v44  ;;  %v9752_v16 = vld [vmem:[#allocation8 + $0x5f4] sm:$0xf0] }
 0x25a   :  { %v8845_v43 = vld [vmem:[#allocation8 + $0xff0] sm:$0xf0]  ;;  %v7827_v45 = vld [vmem:[#allocation8 + $0x7d8] sm:$0xf] }
 0x25b   :  { %v8848_v53 = vor.u32 %v10067_v18, %v8845_v43  ;;  %v9987_v47 = vld [vmem:[#allocation8 + $0xd54] sm:$0xf]  ;;  %4859 = vmatpush.bf16.msrb.mxu1 %v8112_v51  ;;  %v7795_v63 = vld [vmem:[#allocation8 + $0x798] sm:$0xf] }
 0x25c   :  { %v8525_v54 = vld [vmem:[#allocation8 + $0xd70] sm:$0xf0]  ;;  %4834 = vmatmul.bf16.vlgmr.msra.gmra.mxu3 %v10621_v42  ;;  %v9808_v55 = vld [vmem:[#allocation8 + $0x7b4] sm:$0xf0] }
 0x25d   :  { %v10059_v60 = vld [vmem:[#allocation8 + $0xf94] sm:$0xf]  ;;  %v8528_v2 = vor.u32 %v9987_v47, %v8525_v54  ;;  %4878 = vmatpush.bf16.msrb.mxu3 %v8848_v53  ;;  %4894 = vmatpush.bf16.msra.mxu0 %v6964_v41  ;;  %v4615_v54 = vadd.f32 %v4614_v33, %v10716_v56  ;;  %v7571_v56 = vld [vmem:[#allocation8 + $0x5d8] sm:$0xf] }
 0x25e   :  { %v8813_v61 = vld [vmem:[#allocation8 + $0xfb0] sm:$0xf0]  ;;  %4860 = vmatmul.bf16.vlgmr.msrb.gmra.mxu1 %v10629_v52  ;;  %v7572_v35 = vor.u32 %v9752_v16, %v7571_v56  ;;  %v8019_v33 = vld [vmem:[#allocation8 + $0x958] sm:$0xf] }
 0x25f   :  { %v8816_v5 = vor.u32 %v10059_v60, %v8813_v61  ;;  %v9979_v6 = vld [vmem:[#allocation8 + $0xd14] sm:$0xf]  ;;  %4904 = vmatpush.bf16.msra.mxu1 %v7316_v57  ;;  %4867 = vmatpush.bf16.msrb.mxu2 %v8528_v2  ;;  %v4642_v57 = vpop.f32.mrf.mxu0  ;;  %v6868_v60 = vor.u32 %v9576_v49, %v6867_v46  ;;  %v9568_v2 = vld [vmem:[#allocation8 + $0x34] sm:$0xf0] }
 0x260   :  { %v8493_v8 = vld [vmem:[#allocation8 + $0xd30] sm:$0xf0]  ;;  %v6836_v15 = vor.u32 %v9568_v2, %v6835_v0  ;;  %v9816_v46 = vld [vmem:[#allocation8 + $0x7f4] sm:$0xf0] }
 0x261   :  { %v10051_v11 = vld [vmem:[#allocation8 + $0xf54] sm:$0xf]  ;;  %v8496_v19 = vor.u32 %v9979_v6, %v8493_v8  ;;  %4879 = vmatpush.bf16.msrb.mxu3 %v8816_v5  ;;  %4895 = vmatpush.bf16.msra.mxu0 %v6932_v26  ;;  %v8083_v6 = vld [vmem:[#allocation8 + $0x9d8] sm:$0xf]  ;;  %v4616_v30 = vpop.f32.mrf.mxu2 }
 0x262   :  { %v8781_v12 = vld [vmem:[#allocation8 + $0xf70] sm:$0xf0]  ;;  %v9880_v8 = vld [vmem:[#allocation8 + $0x9f4] sm:$0xf0] }
 0x263   :  { %v8784_v21 = vor.u32 %v10051_v11, %v8781_v12  ;;  %v9971_v1 = vld [vmem:[#allocation8 + $0xcd4] sm:$0xf]  ;;  %4905 = vmatpush.bf16.msra.mxu1 %v7284_v10  ;;  %4868 = vmatpush.bf16.msrb.mxu2 %v8496_v19  ;;  %v4627_v12 = vpop.f32.mrf.mxu3  ;;  %v8339_v49 = vld [vmem:[#allocation8 + $0xbd8] sm:$0xf] }
 0x264   :  { %v8461_v22 = vld [vmem:[#allocation8 + $0xcf0] sm:$0xf0]  ;;  %v8307_v0 = vld [vmem:[#allocation8 + $0xb98] sm:$0xf] }
 0x265   :  { %v10043_v27 = vld [vmem:[#allocation8 + $0xf14] sm:$0xf]  ;;  %v8464_v23 = vor.u32 %v9971_v1, %v8461_v22  ;;  %4880 = vmatpush.bf16.msrb.mxu3 %v8784_v21  ;;  %4896 = vmatpush.bf16.msra.mxu0 %v6900_v40  ;;  %v4628_v21 = vadd.f32 %v4627_v12, %v4615_v54  ;;  %v8084_v1 = vor.u32 %v9880_v8, %v8083_v6  ;;  %v7123_v22 = vld [vmem:[#allocation8 + $0x258] sm:$0xf] }
 0x266   :  { %v8749_v28 = vld [vmem:[#allocation8 + $0xf30] sm:$0xf0]  ;;  %v9936_v2 = vld [vmem:[#allocation8 + $0xbb4] sm:$0xf0] }
 0x267   :  { %v8752_v36 = vor.u32 %v10043_v27, %v8749_v28  ;;  %v9963_v38 = vld [vmem:[#allocation8 + $0xc94] sm:$0xf]  ;;  %4906 = vmatpush.bf16.msra.mxu1 %v7252_v24  ;;  %4869 = vmatpush.bf16.msrb.mxu2 %v8464_v23  ;;  %v9640_v24 = vld [vmem:[#allocation8 + $0x274] sm:$0xf0]  ;;  %v4641_v29 = vadd.f32 %v10724_v4, %v4628_v21  ;;  %v8308_v56 = vor.u32 %v9936_v2, %v8307_v0 }
 0x268   :  { %v8429_v32 = vld [vmem:[#allocation8 + $0xcb0] sm:$0xf0]  ;;  %v8051_v27 = vld [vmem:[#allocation8 + $0x998] sm:$0xf] }
 0x269   :  { %v10035_v18 = vld [vmem:[#allocation8 + $0xed4] sm:$0xf]  ;;  %v8432_v9 = vor.u32 %v9963_v38, %v8429_v32  ;;  %4881 = vmatpush.bf16.msrb.mxu3 %v8752_v36  ;;  %4897 = vmatpush.bf16.msra.mxu0 %v6868_v60  ;;  %v9872_v28 = vld [vmem:[#allocation8 + $0x9b4] sm:$0xf0]  ;;  %v10728_v4 = vadd.f32 %v4653_v50, %v4641_v29 }
 0x26a   :  { %v8717_v43 = vld [vmem:[#allocation8 + $0xef0] sm:$0xf0]  ;;  %v7539_v36 = vld [vmem:[#allocation8 + $0x598] sm:$0xf]  ;;  %v8052_v44 = vor.u32 %v9872_v28, %v8051_v27  ;;  %v4692_v27 = vpop.f32.mrf.mxu0 }
 0x26b   :  { %v8720_v51 = vor.u32 %v10035_v18, %v8717_v43  ;;  %v9955_v53 = vld [vmem:[#allocation8 + $0xc54] sm:$0xf]  ;;  %4907 = vmatpush.bf16.msra.mxu1 %v7220_v39  ;;  %4870 = vmatpush.bf16.msrb.mxu2 %v8432_v9  ;;  %v9744_v38 = vld [vmem:[#allocation8 + $0x5b4] sm:$0xf0]  ;;  %v7124_v39 = vor.u32 %v9640_v24, %v7123_v22  ;;  %v4629_v54 = vpop.f32.mrf.mxu3 }
 0x26c   :  { %v8397_v47 = vld [vmem:[#allocation8 + $0xc70] sm:$0xf0]  ;;  %v7091_v18 = vld [vmem:[#allocation8 + $0x218] sm:$0xf] }
 0x26d   :  { %v10027_v61 = vld [vmem:[#allocation8 + $0xe94] sm:$0xf]  ;;  %v8400_v5 = vor.u32 %v9955_v53, %v8397_v47  ;;  %4882 = vmatpush.bf16.msrb.mxu3 %v8720_v51  ;;  %4898 = vmatpush.bf16.msra.mxu0 %v6836_v15  ;;  %v9632_v43 = vld [vmem:[#allocation8 + $0x234] sm:$0xf0]  ;;  %v7540_v53 = vor.u32 %v9744_v38, %v7539_v36 }
 0x26e   :  { %v8685_v62 = vld [vmem:[#allocation8 + $0xeb0] sm:$0xf0]  ;;  %v9944_v9 = vld [vmem:[#allocation8 + $0xbf4] sm:$0xf0]  ;;  %v7092_v57 = vor.u32 %v9632_v43, %v7091_v18 }
 0x26f   :  { %v8688_v10 = vor.u32 %v10027_v61, %v8685_v62  ;;  %v9947_v41 = vld [vmem:[#allocation8 + $0xc14] sm:$0xf]  ;;  %4908 = vmatpush.bf16.msra.mxu1 %v7188_v59  ;;  %4871 = vmatpush.bf16.msrb.mxu2 %v8400_v5  ;;  %v9864_v51 = vld [vmem:[#allocation8 + $0x974] sm:$0xf0]  ;;  %v7828_v59 = vor.u32 %v9816_v46, %v7827_v45  ;;  %v8340_v50 = vor.u32 %v9944_v9, %v8339_v49 }
 0x270   :  { %v8365_v11 = vld [vmem:[#allocation8 + $0xc30] sm:$0xf0]  ;;  %4899 = vmatmul.bf16.vlgmr.msra.gmra.mxu0 %v10610_v25  ;;  %v7507_v60 = vld [vmem:[#allocation8 + $0x558] sm:$0xf]  ;;  %v8020_v62 = vor.u32 %v9864_v51, %v8019_v33 }
 0x271   :  { %v10019_v37 = vld [vmem:[#allocation8 + $0xe54] sm:$0xf]  ;;  %v8368_v26 = vor.u32 %v9947_v41, %v8365_v11  ;;  %4883 = vmatpush.bf16.msrb.mxu3 %v8688_v10  ;;  %4943 = vmatpush.bf16.msrb.mxu0 %v8084_v1  ;;  %v9736_v61 = vld [vmem:[#allocation8 + $0x574] sm:$0xf0]  ;;  %v7796_v10 = vor.u32 %v9808_v55, %v7795_v63 }
 0x272   :  { %v8653_v19 = vld [vmem:[#allocation8 + $0xe70] sm:$0xf0]  ;;  %v7987_v5 = vld [vmem:[#allocation8 + $0x918] sm:$0xf]  ;;  %v7508_v8 = vor.u32 %v9736_v61, %v7507_v60  ;;  %v4705_v60 = vpop.f32.mrf.mxu1  ;;  %v4694_v2 = vpop.f32.mrf.mxu0 }
 0x273   :  { %v8656_v23 = vor.u32 %v10019_v37, %v8653_v19  ;;  %v10011_v32 = vld [vmem:[#allocation8 + $0xe14] sm:$0xf]  ;;  %4909 = vmatpush.bf16.msra.mxu1 %v7156_v14  ;;  %4872 = vmatpush.bf16.msrb.mxu2 %v8368_v26  ;;  %v9856_v6 = vld [vmem:[#allocation8 + $0x934] sm:$0xf0] }
 0x274   :  { %v8621_v40 = vld [vmem:[#allocation8 + $0xe30] sm:$0xf0]  ;;  %v7475_v41 = vld [vmem:[#allocation8 + $0x518] sm:$0xf]  ;;  %v7988_v12 = vor.u32 %v9856_v6, %v7987_v5 }
 0x275   :  { %4884 = vmatpush.bf16.msrb.mxu3 %v8656_v23  ;;  %v8624_v47 = vor.u32 %v10011_v32, %v8621_v40  ;;  %4944 = vmatpush.bf16.msrb.mxu0 %v8052_v44  ;;  %v9728_v11 = vld [vmem:[#allocation8 + $0x534] sm:$0xf0]  ;;  %v10239_v32 = vld [vmem:[#allocation10] sm:$0xff] }
 0x276   :  { %4873 = vmatmul.bf16.vlgmr.msrb.gmra.mxu2 %v10636_v3  ;;  %v7763_v14 = vld [vmem:[#allocation8 + $0x758] sm:$0xf]  ;;  %v7476_v1 = vor.u32 %v9728_v11, %v7475_v41 }
 0x277   :  { %4917 = vmatpush.bf16.msra.mxu2 %v7572_v35  ;;  %4910 = vmatpush.bf16.msra.mxu1 %v7124_v39  ;;  %v9800_v15 = vld [vmem:[#allocation8 + $0x774] sm:$0xf0]  ;;  %v1695_v39 = vperm.slane %v10239_v32, 4 }
 0x278   :  { %v8275_v16 = vld [vmem:[#allocation8 + $0xb58] sm:$0xf]  ;;  %v7764_v22 = vor.u32 %v9800_v15, %v7763_v14  ;;  %v9620_v14 = vld [vmem:[#allocation8 + $0x1dc] sm:$0xf] }
 0x279   :  { %4885 = vmatpush.bf16.msrb.mxu3 %v8624_v47  ;;  %4945 = vmatpush.bf16.msrb.mxu0 %v8020_v62  ;;  %v9928_v37 = vld [vmem:[#allocation8 + $0xb74] sm:$0xf0]  ;;  %v4693_v54 = vadd.f32 %v4692_v27, %v1695_v39  ;;  %v7061_v15 = vld [vmem:[#allocation8 + $0x1f8] sm:$0xf0] }
 0x27a   :  { %v7955_v19 = vld [vmem:[#allocation8 + $0x8d8] sm:$0xf]  ;;  %v8276_v28 = vor.u32 %v9928_v37, %v8275_v16  ;;  %v4707_v32 = vpop.f32.mrf.mxu1 }
 0x27b   :  { %4918 = vmatpush.bf16.msra.mxu2 %v7540_v53  ;;  %4911 = vmatpush.bf16.msra.mxu1 %v7092_v57  ;;  %v9848_v21 = vld [vmem:[#allocation8 + $0x8f4] sm:$0xf0]  ;;  %v10735_v0 = vadd.f32 %v4705_v60, %v4693_v54  ;;  %v7317_v54 = vld [vmem:[#allocation8 + $0x3f8] sm:$0xf0] }
 0x27c   :  { %4886 = vmatmul.bf16.vlgmr.msrb.gmra.mxu3 %v10640_v13  ;;  %v7443_v24 = vld [vmem:[#allocation8 + $0x4d8] sm:$0xf]  ;;  %v7956_v29 = vor.u32 %v9848_v21, %v7955_v19  ;;  %v4679_v21 = vpop.f32.mrf.mxu3 }
 0x27d   :  { %4930 = vmatpush.bf16.msra.mxu3 %v7828_v59  ;;  %v9720_v26 = vld [vmem:[#allocation8 + $0x4f4] sm:$0xf0]  ;;  %4946 = vmatpush.bf16.msrb.mxu0 %v7988_v12  ;;  %v4666_v59 = vpop.f32.mrf.mxu2 }
 0x27e   :  { %4912 = vmatmul.bf16.vlgmr.msra.gmra.mxu1 %v10613_v58  ;;  %v7731_v30 = vld [vmem:[#allocation8 + $0x718] sm:$0xf]  ;;  %v7444_v40 = vor.u32 %v9720_v26, %v7443_v24  ;;  %v4667_v55 = vadd.f32 %v4666_v59, %v10728_v4  ;;  %v6997_v59 = vld [vmem:[#allocation8 + $0x178] sm:$0xf0] }
 0x27f   :  { %4956 = vmatpush.bf16.msrb.mxu1 %v8340_v50  ;;  %4919 = vmatpush.bf16.msra.mxu2 %v7508_v8  ;;  %v9792_v34 = vld [vmem:[#allocation8 + $0x734] sm:$0xf0] }
 0x280   :  { %v8243_v35 = vld [vmem:[#allocation8 + $0xb18] sm:$0xf]  ;;  %v7732_v18 = vor.u32 %v9792_v34, %v7731_v30 }
 0x281   :  { %4931 = vmatpush.bf16.msra.mxu3 %v7796_v10  ;;  %v9920_v23 = vld [vmem:[#allocation8 + $0xb34] sm:$0xf0]  ;;  %4947 = vmatpush.bf16.msrb.mxu0 %v7956_v29  ;;  %v7064_v29 = vor.u32 %v9620_v14, %v7061_v15 }
 0x282   :  { %v7923_v36 = vld [vmem:[#allocation8 + $0x898] sm:$0xf]  ;;  %v8244_v46 = vor.u32 %v9920_v23, %v8243_v35  ;;  %v9612_v23 = vld [vmem:[#allocation8 + $0x19c] sm:$0xf] }
 0x283   :  { %4957 = vmatpush.bf16.msrb.mxu1 %v8308_v56  ;;  %v9840_v38 = vld [vmem:[#allocation8 + $0x8b4] sm:$0xf0]  ;;  %4920 = vmatpush.bf16.msra.mxu2 %v7476_v1 }
 0x284   :  { %v7411_v43 = vld [vmem:[#allocation8 + $0x498] sm:$0xf]  ;;  %v7924_v49 = vor.u32 %v9840_v38, %v7923_v36  ;;  %v7029_v36 = vld [vmem:[#allocation8 + $0x1b8] sm:$0xf0] }
 0x285   :  { %4932 = vmatpush.bf16.msra.mxu3 %v7764_v22  ;;  %v9712_v44 = vld [vmem:[#allocation8 + $0x4b4] sm:$0xf0]  ;;  %v4668_v38 = vpop.f32.mrf.mxu2 }
 0x286   :  { %v7699_v45 = vld [vmem:[#allocation8 + $0x6d8] sm:$0xf]  ;;  %v7412_v57 = vor.u32 %v9712_v44, %v7411_v43  ;;  %4948 = vmatpush.bf16.msrb.mxu0 %v7924_v49 }
 0x287   :  { %4958 = vmatpush.bf16.msrb.mxu1 %v8276_v28  ;;  %v9784_v9 = vld [vmem:[#allocation8 + $0x6f4] sm:$0xf0]  ;;  %4921 = vmatpush.bf16.msra.mxu2 %v7444_v40  ;;  %v10737_v28 = vadd.f32 %v4679_v21, %v4667_v55 }
 0x288   :  { %v8211_v33 = vld [vmem:[#allocation8 + $0xad8] sm:$0xf]  ;;  %v7700_v61 = vor.u32 %v9784_v9, %v7699_v45 }
 0x289   :  { %v9912_v51 = vld [vmem:[#allocation8 + $0xaf4] sm:$0xf0]  ;;  %4933 = vmatpush.bf16.msra.mxu3 %v7732_v18 }
 0x28a   :  { %v7891_v53 = vld [vmem:[#allocation8 + $0x858] sm:$0xf]  ;;  %v8212_v50 = vor.u32 %v9912_v51, %v8211_v33  ;;  %v7032_v33 = vor.u32 %v9612_v23, %v7029_v36  ;;  %v10743_v23 = vpop.f32.mrf.mxu0 }
 0x28b   :  { %v9832_v47 = vld [vmem:[#allocation8 + $0x874] sm:$0xf0]  ;;  %4959 = vmatpush.bf16.msrb.mxu1 %v8244_v46  ;;  %4922 = vmatpush.bf16.msra.mxu2 %v7412_v57  ;;  %v9604_v57 = vld [vmem:[#allocation8 + $0x15c] sm:$0xf] }
 0x28c   :  { %v7379_v62 = vld [vmem:[#allocation8 + $0x458] sm:$0xf]  ;;  %v7892_v5 = vor.u32 %v9832_v47, %v7891_v53  ;;  %v9684_v47 = vld [vmem:[#allocation8 + $0x3dc] sm:$0xf] }
 0x28d   :  { %v9704_v63 = vld [vmem:[#allocation8 + $0x474] sm:$0xf0]  ;;  %4934 = vmatpush.bf16.msra.mxu3 %v7700_v61 }
 0x28e   :  { %v7667_v6 = vld [vmem:[#allocation8 + $0x698] sm:$0xf]  ;;  %v7380_v12 = vor.u32 %v9704_v63, %v7379_v62  ;;  %4949 = vmatpush.bf16.msrb.mxu0 %v7892_v5  ;;  %v7320_v5 = vor.u32 %v9684_v47, %v7317_v54  ;;  %v9652_v54 = vld [vmem:[#allocation8 + $0x2dc] sm:$0xf] }
 0x28f   :  { %v9776_v8 = vld [vmem:[#allocation8 + $0x6b4] sm:$0xf0]  ;;  %4960 = vmatpush.bf16.msrb.mxu1 %v8212_v50  ;;  %v4681_v50 = vpop.f32.mrf.mxu3 }
 0x290   :  { %v8179_v10 = vld [vmem:[#allocation8 + $0xa98] sm:$0xf]  ;;  %v7668_v16 = vor.u32 %v9776_v8, %v7667_v6  ;;  %4923 = vmatpush.bf16.msra.mxu2 %v7380_v12  ;;  %v7000_v6 = vor.u32 %v9604_v57, %v6997_v59  ;;  %v6965_v12 = vld [vmem:[#allocation8 + $0x138] sm:$0xf0]  ;;  %v4718_v50 = vpop.f32.mrf.mxu2 }
 0x291   :  { %v9904_v41 = vld [vmem:[#allocation8 + $0xab4] sm:$0xf0]  ;;  %v7189_v57 = vld [vmem:[#allocation8 + $0x2f8] sm:$0xf0] }
 0x292   :  { %v7859_v11 = vld [vmem:[#allocation8 + $0x818] sm:$0xf]  ;;  %v8180_v1 = vor.u32 %v9904_v41, %v8179_v10  ;;  %4935 = vmatpush.bf16.msra.mxu3 %v7668_v16  ;;  %v9676_v41 = vld [vmem:[#allocation8 + $0x39c] sm:$0xf] }
 0x293   :  { %v9824_v56 = vld [vmem:[#allocation8 + $0x834] sm:$0xf0]  ;;  %v9572_v59 = vld [vmem:[#allocation8 + $0x5c] sm:$0xf] }
 0x294   :  { %v7347_v37 = vld [vmem:[#allocation8 + $0x418] sm:$0xf]  ;;  %v7860_v22 = vor.u32 %v9824_v56, %v7859_v11  ;;  %4961 = vmatpush.bf16.msrb.mxu1 %v8180_v1  ;;  %v7285_v11 = vld [vmem:[#allocation8 + $0x3b8] sm:$0xf0] }
 0x295   :  { %v9696_v4 = vld [vmem:[#allocation8 + $0x434] sm:$0xf0]  ;;  %v9596_v56 = vld [vmem:[#allocation8 + $0x11c] sm:$0xf] }
 0x296   :  { %v8595_v19 = vld [vmem:[#allocation8 + $0xdd8] sm:$0xf]  ;;  %v7348_v35 = vor.u32 %v9696_v4, %v7347_v37  ;;  %4950 = vmatpush.bf16.msrb.mxu0 %v7860_v22  ;;  %v7288_v4 = vor.u32 %v9676_v41, %v7285_v11  ;;  %v9668_v22 = vld [vmem:[#allocation8 + $0x35c] sm:$0xf] }
 0x297   :  { %v10008_v24 = vld [vmem:[#allocation8 + $0xdf4] sm:$0xf0] }
 0x298   :  { %v7635_v26 = vld [vmem:[#allocation8 + $0x658] sm:$0xf]  ;;  %v8596_v39 = vor.u32 %v10008_v24, %v8595_v19  ;;  %4924 = vmatpush.bf16.msra.mxu2 %v7348_v35  ;;  %v6968_v19 = vor.u32 %v9596_v56, %v6965_v12  ;;  %v7253_v24 = vld [vmem:[#allocation8 + $0x378] sm:$0xf0] }
 0x299   :  { %v9768_v27 = vld [vmem:[#allocation8 + $0x674] sm:$0xf0]  ;;  %4951 = vmatmul.bf16.vlgmr.msrb.gmra.mxu0 %v10626_v31  ;;  %v7256_v36 = vor.u32 %v9668_v22, %v7253_v24  ;;  %v9644_v56 = vld [vmem:[#allocation8 + $0x29c] sm:$0xf]  ;;  %v4731_v22 = vpop.f32.mrf.mxu3 }
 0x29a   :  { %v8147_v30 = vld [vmem:[#allocation8 + $0xa58] sm:$0xf]  ;;  %v7636_v40 = vor.u32 %v9768_v27, %v7635_v26  ;;  %4995 = vmatpush.bf16.msra.mxu0 %v7064_v29  ;;  %v9588_v26 = vld [vmem:[#allocation8 + $0xdc] sm:$0xf] }
 0x29b   :  { %v9896_v34 = vld [vmem:[#allocation8 + $0xa74] sm:$0xf0]  ;;  %4925 = vmatmul.bf16.vlgmr.msra.gmra.mxu2 %v10618_v7  ;;  %v6933_v27 = vld [vmem:[#allocation8 + $0xf8] sm:$0xf0] }
 0x29c   :  { %v8563_v18 = vld [vmem:[#allocation8 + $0xd98] sm:$0xf]  ;;  %v8148_v45 = vor.u32 %v9896_v34, %v8147_v30  ;;  %4969 = vmatpush.bf16.msrb.mxu2 %v8596_v39  ;;  %4936 = vmatpush.bf16.msra.mxu3 %v7636_v40  ;;  %v6936_v38 = vor.u32 %v9588_v26, %v6933_v27  ;;  %v9660_v40 = vld [vmem:[#allocation8 + $0x31c] sm:$0xf] }
 0x29d   :  { %v10000_v43 = vld [vmem:[#allocation8 + $0xdb4] sm:$0xf0]  ;;  %v7157_v12 = vld [vmem:[#allocation8 + $0x2b8] sm:$0xf0] }
 0x29e   :  { %v7603_v44 = vld [vmem:[#allocation8 + $0x618] sm:$0xf]  ;;  %v8564_v60 = vor.u32 %v10000_v43, %v8563_v18  ;;  %4962 = vmatpush.bf16.msrb.mxu1 %v8148_v45  ;;  %4996 = vmatpush.bf16.msra.mxu0 %v7032_v33  ;;  %v7221_v18 = vld [vmem:[#allocation8 + $0x338] sm:$0xf0]  ;;  %v7160_v24 = vor.u32 %v9644_v56, %v7157_v12 }
 0x29f   :  { %v9760_v46 = vld [vmem:[#allocation8 + $0x634] sm:$0xf0]  ;;  %v9580_v43 = vld [vmem:[#allocation8 + $0x9c] sm:$0xf]  ;;  %v7224_v33 = vor.u32 %v9660_v40, %v7221_v18 }
 0x2a0   :  { %v8115_v49 = vld [vmem:[#allocation8 + $0xa18] sm:$0xf]  ;;  %v7604_v61 = vor.u32 %v9760_v46, %v7603_v44  ;;  %4970 = vmatpush.bf16.msrb.mxu2 %v8564_v60  ;;  %v6901_v44 = vld [vmem:[#allocation8 + $0xb8] sm:$0xf0] }
 0x2a1   :  { %v9888_v9 = vld [vmem:[#allocation8 + $0xa34] sm:$0xf0]  ;;  %v6869_v60 = vld [vmem:[#allocation8 + $0x78] sm:$0xf0] }
 0x2a2   :  { %v8851_v51 = vld [vmem:[#allocation8 + $0xfd8] sm:$0xf]  ;;  %v8116_v62 = vor.u32 %v9888_v9, %v8115_v49  ;;  %4937 = vmatpush.bf16.msra.mxu3 %v7604_v61  ;;  %4997 = vmatpush.bf16.msra.mxu0 %v7000_v6  ;;  %v4746_v6 = vpop.f32.mrf.mxu0  ;;  %v7573_v27 = vld [vmem:[#allocation8 + $0x5f8] sm:$0xf0] }
 0x2a3   :  { %v10072_v53 = vld [vmem:[#allocation8 + $0xff4] sm:$0xf0]  ;;  %v8053_v40 = vld [vmem:[#allocation8 + $0x9b8] sm:$0xf0]  ;;  %v4733_v6 = vpop.f32.mrf.mxu3 }
 0x2a4   :  { %v8852_v63 = vor.u32 %v10072_v53, %v8851_v51  ;;  %v8531_v55 = vld [vmem:[#allocation8 + $0xd58] sm:$0xf]  ;;  %4963 = vmatpush.bf16.msrb.mxu1 %v8116_v62  ;;  %v6904_v51 = vor.u32 %v9580_v43, %v6901_v44  ;;  %v4757_v62 = vpop.f32.mrf.mxu1  ;;  %v4720_v43 = vpop.f32.mrf.mxu2  ;;  %v9804_v12 = vld [vmem:[#allocation8 + $0x79c] sm:$0xf] }
 0x2a5   :  { %v9992_v2 = vld [vmem:[#allocation8 + $0xd74] sm:$0xf0]  ;;  %4938 = vmatmul.bf16.vlgmr.msra.gmra.mxu3 %v10621_v42  ;;  %v9788_v43 = vld [vmem:[#allocation8 + $0x71c] sm:$0xf] }
 0x2a6   :  { %v8819_v8 = vld [vmem:[#allocation8 + $0xf98] sm:$0xf]  ;;  %v8532_v14 = vor.u32 %v9992_v2, %v8531_v55  ;;  %4982 = vmatpush.bf16.msrb.mxu3 %v8852_v63  ;;  %4998 = vmatpush.bf16.msra.mxu0 %v6968_v19 }
 0x2a7   :  { %v10064_v10 = vld [vmem:[#allocation8 + $0xfb4] sm:$0xf0]  ;;  %4964 = vmatmul.bf16.vlgmr.msrb.gmra.mxu1 %v10629_v52 }
 0x2a8   :  { %v8820_v15 = vor.u32 %v10064_v10, %v8819_v8  ;;  %v8499_v16 = vld [vmem:[#allocation8 + $0xd18] sm:$0xf]  ;;  %5008 = vmatpush.bf16.msra.mxu1 %v7320_v5  ;;  %4971 = vmatpush.bf16.msrb.mxu2 %v8532_v14  ;;  %v4719_v5 = vadd.f32 %v4718_v50, %v10735_v0  ;;  %v7192_v8 = vor.u32 %v9652_v54, %v7189_v57  ;;  %v9564_v14 = vld [vmem:[#allocation8 + $0x1c] sm:$0xf] }
 0x2a9   :  { %v9984_v37 = vld [vmem:[#allocation8 + $0xd34] sm:$0xf0]  ;;  %v6872_v10 = vor.u32 %v9572_v59, %v6869_v60  ;;  %v9748_v0 = vld [vmem:[#allocation8 + $0x5dc] sm:$0xf] }
 0x2aa   :  { %v8787_v21 = vld [vmem:[#allocation8 + $0xf58] sm:$0xf]  ;;  %v8500_v29 = vor.u32 %v9984_v37, %v8499_v16  ;;  %4983 = vmatpush.bf16.msrb.mxu3 %v8820_v15  ;;  %4999 = vmatpush.bf16.msra.mxu0 %v6936_v38  ;;  %v6837_v15 = vld [vmem:[#allocation8 + $0x38] sm:$0xf0] }
 0x2ab   :  { %v10056_v1 = vld [vmem:[#allocation8 + $0xf74] sm:$0xf0]  ;;  %v9876_v37 = vld [vmem:[#allocation8 + $0x9dc] sm:$0xf]  ;;  %v6840_v26 = vor.u32 %v9564_v14, %v6837_v15 }
 0x2ac   :  { %v8788_v30 = vor.u32 %v10056_v1, %v8787_v21  ;;  %v8467_v34 = vld [vmem:[#allocation8 + $0xcd8] sm:$0xf]  ;;  %5009 = vmatpush.bf16.msra.mxu1 %v7288_v4  ;;  %4972 = vmatpush.bf16.msrb.mxu2 %v8500_v29  ;;  %v8085_v4 = vld [vmem:[#allocation8 + $0x9f8] sm:$0xf0]  ;;  %v4759_v44 = vpop.f32.mrf.mxu1 }
 0x2ad   :  { %v9976_v35 = vld [vmem:[#allocation8 + $0xcf4] sm:$0xf0]  ;;  %v7125_v38 = vld [vmem:[#allocation8 + $0x278] sm:$0xf0] }
 0x2ae   :  { %v8755_v32 = vld [vmem:[#allocation8 + $0xf18] sm:$0xf]  ;;  %v8468_v45 = vor.u32 %v9976_v35, %v8467_v34  ;;  %4984 = vmatpush.bf16.msrb.mxu3 %v8788_v30  ;;  %5000 = vmatpush.bf16.msra.mxu0 %v6904_v51  ;;  %v4732_v34 = vadd.f32 %v4731_v22, %v4719_v5  ;;  %v8088_v35 = vor.u32 %v9876_v37, %v8085_v4  ;;  %v7093_v54 = vld [vmem:[#allocation8 + $0x238] sm:$0xf0] }
 0x2af   :  { %v10048_v39 = vld [vmem:[#allocation8 + $0xf34] sm:$0xf0]  ;;  %v9812_v59 = vld [vmem:[#allocation8 + $0x7dc] sm:$0xf] }
 0x2b0   :  { %v8756_v46 = vor.u32 %v10048_v39, %v8755_v32  ;;  %v8435_v49 = vld [vmem:[#allocation8 + $0xc98] sm:$0xf]  ;;  %5010 = vmatpush.bf16.msra.mxu1 %v7256_v36  ;;  %4973 = vmatpush.bf16.msrb.mxu2 %v8468_v45  ;;  %v9636_v36 = vld [vmem:[#allocation8 + $0x25c] sm:$0xf]  ;;  %v4745_v18 = vadd.f32 %v10743_v23, %v4732_v34  ;;  %v7576_v45 = vor.u32 %v9748_v0, %v7573_v27 }
 0x2b1   :  { %v9968_v9 = vld [vmem:[#allocation8 + $0xcb4] sm:$0xf0]  ;;  %v9868_v39 = vld [vmem:[#allocation8 + $0x99c] sm:$0xf]  ;;  %v7128_v51 = vor.u32 %v9636_v36, %v7125_v38 }
 0x2b2   :  { %v8723_v53 = vld [vmem:[#allocation8 + $0xed8] sm:$0xf]  ;;  %v8436_v61 = vor.u32 %v9968_v9, %v8435_v49  ;;  %4985 = vmatpush.bf16.msrb.mxu3 %v8756_v46  ;;  %5001 = vmatpush.bf16.msra.mxu0 %v6872_v10  ;;  %v9740_v49 = vld [vmem:[#allocation8 + $0x59c] sm:$0xf]  ;;  %v8056_v57 = vor.u32 %v9868_v39, %v8053_v40  ;;  %v10747_v23 = vadd.f32 %v4757_v62, %v4745_v18  ;;  %v10753_v39 = vpop.f32.mrf.mxu0 }
 0x2b3   :  { %v10040_v47 = vld [vmem:[#allocation8 + $0xef4] sm:$0xf0]  ;;  %v7541_v9 = vld [vmem:[#allocation8 + $0x5b8] sm:$0xf0] }
 0x2b4   :  { %v8724_v63 = vor.u32 %v10040_v47, %v8723_v53  ;;  %v8403_v55 = vld [vmem:[#allocation8 + $0xc58] sm:$0xf]  ;;  %5011 = vmatpush.bf16.msra.mxu1 %v7224_v33  ;;  %4974 = vmatpush.bf16.msrb.mxu2 %v8436_v61  ;;  %v9628_v47 = vld [vmem:[#allocation8 + $0x21c] sm:$0xf] }
 0x2b5   :  { %v9960_v2 = vld [vmem:[#allocation8 + $0xc74] sm:$0xf0]  ;;  %v7829_v60 = vld [vmem:[#allocation8 + $0x7f8] sm:$0xf0] }
 0x2b6   :  { %v8691_v41 = vld [vmem:[#allocation8 + $0xe98] sm:$0xf]  ;;  %v8404_v16 = vor.u32 %v9960_v2, %v8403_v55  ;;  %4986 = vmatpush.bf16.msrb.mxu3 %v8724_v63  ;;  %5002 = vmatpush.bf16.msra.mxu0 %v6840_v26  ;;  %v9940_v61 = vld [vmem:[#allocation8 + $0xbdc] sm:$0xf]  ;;  %v7544_v2 = vor.u32 %v9740_v49, %v7541_v9  ;;  %v7832_v10 = vor.u32 %v9812_v59, %v7829_v60 }
 0x2b7   :  { %v10032_v11 = vld [vmem:[#allocation8 + $0xeb4] sm:$0xf0]  ;;  %v8341_v50 = vld [vmem:[#allocation8 + $0xbf8] sm:$0xf0] }
 0x2b8   :  { %v8692_v19 = vor.u32 %v10032_v11, %v8691_v41  ;;  %v8371_v21 = vld [vmem:[#allocation8 + $0xc18] sm:$0xf]  ;;  %5012 = vmatpush.bf16.msra.mxu1 %v7192_v8  ;;  %4975 = vmatpush.bf16.msrb.mxu2 %v8404_v16  ;;  %v9860_v63 = vld [vmem:[#allocation8 + $0x95c] sm:$0xf]  ;;  %v7096_v8 = vor.u32 %v9628_v47, %v7093_v54  ;;  %v8344_v62 = vor.u32 %v9940_v61, %v8341_v50 }
 0x2b9   :  { %v9952_v1 = vld [vmem:[#allocation8 + $0xc34] sm:$0xf0]  ;;  %v8021_v55 = vld [vmem:[#allocation8 + $0x978] sm:$0xf0]  ;;  %5003 = vmatmul.bf16.vlgmr.msra.gmra.mxu0 %v10610_v25 }
 0x2ba   :  { %v8659_v29 = vld [vmem:[#allocation8 + $0xe58] sm:$0xf]  ;;  %v8372_v32 = vor.u32 %v9952_v1, %v8371_v21  ;;  %4987 = vmatpush.bf16.msrb.mxu3 %v8692_v19  ;;  %5047 = vmatpush.bf16.msrb.mxu0 %v8088_v35  ;;  %v9732_v41 = vld [vmem:[#allocation8 + $0x55c] sm:$0xf]  ;;  %v8024_v56 = vor.u32 %v9860_v63, %v8021_v55 }
 0x2bb   :  { %v10024_v30 = vld [vmem:[#allocation8 + $0xe74] sm:$0xf0]  ;;  %v7509_v11 = vld [vmem:[#allocation8 + $0x578] sm:$0xf0] }
 0x2bc   :  { %v8660_v46 = vor.u32 %v10024_v30, %v8659_v29  ;;  %v8627_v33 = vld [vmem:[#allocation8 + $0xe18] sm:$0xf]  ;;  %5013 = vmatpush.bf16.msra.mxu1 %v7160_v24  ;;  %4976 = vmatpush.bf16.msrb.mxu2 %v8372_v32  ;;  %v7797_v14 = vld [vmem:[#allocation8 + $0x7b8] sm:$0xf0]  ;;  %v7512_v19 = vor.u32 %v9732_v41, %v7509_v11  ;;  %v4798_v41 = vpop.f32.mrf.mxu0 }
 0x2bd   :  { %v10016_v53 = vld [vmem:[#allocation8 + $0xe34] sm:$0xf0]  ;;  %v9932_v15 = vld [vmem:[#allocation8 + $0xb9c] sm:$0xf]  ;;  %v7800_v25 = vor.u32 %v9804_v12, %v7797_v14 }
 0x2be   :  { %4988 = vmatpush.bf16.msrb.mxu3 %v8660_v46  ;;  %v8628_v5 = vor.u32 %v10016_v53, %v8627_v33  ;;  %5048 = vmatpush.bf16.msrb.mxu0 %v8056_v57  ;;  %v8309_v16 = vld [vmem:[#allocation8 + $0xbb8] sm:$0xf0] }
 0x2bf   :  { %4977 = vmatmul.bf16.vlgmr.msrb.gmra.mxu2 %v10636_v3  ;;  %v9852_v37 = vld [vmem:[#allocation8 + $0x91c] sm:$0xf]  ;;  %v8312_v0 = vor.u32 %v9932_v15, %v8309_v16 }
 0x2c0   :  { %5021 = vmatpush.bf16.msra.mxu2 %v7576_v45  ;;  %5014 = vmatpush.bf16.msra.mxu1 %v7128_v51  ;;  %v7989_v4 = vld [vmem:[#allocation8 + $0x938] sm:$0xf0] }
 0x2c1   :  { %v9724_v21 = vld [vmem:[#allocation8 + $0x51c] sm:$0xf]  ;;  %v7992_v22 = vor.u32 %v9852_v37, %v7989_v4 }
 0x2c2   :  { %4989 = vmatpush.bf16.msrb.mxu3 %v8628_v5  ;;  %v7477_v1 = vld [vmem:[#allocation8 + $0x538] sm:$0xf0]  ;;  %5049 = vmatpush.bf16.msrb.mxu0 %v8024_v56  ;;  %v10757_v5 = vpop.f32.mrf.mxu1 }
 0x2c3   :  { %v9796_v24 = vld [vmem:[#allocation8 + $0x75c] sm:$0xf]  ;;  %v7480_v35 = vor.u32 %v9724_v21, %v7477_v1 }
 0x2c4   :  { %5022 = vmatpush.bf16.msra.mxu2 %v7544_v2  ;;  %5015 = vmatpush.bf16.msra.mxu1 %v7096_v8  ;;  %v7765_v26 = vld [vmem:[#allocation8 + $0x778] sm:$0xf0]  ;;  %v10755_v2 = vpop.f32.mrf.mxu2 }
 0x2c5   :  { %v9924_v27 = vld [vmem:[#allocation8 + $0xb5c] sm:$0xf]  ;;  %4990 = vmatmul.bf16.vlgmr.msrb.gmra.mxu3 %v10640_v13  ;;  %v7768_v36 = vor.u32 %v9796_v24, %v7765_v26  ;;  %v10759_v24 = vpop.f32.mrf.mxu3 }
 0x2c6   :  { %5034 = vmatpush.bf16.msra.mxu3 %v7832_v10  ;;  %v8277_v29 = vld [vmem:[#allocation8 + $0xb78] sm:$0xf0]  ;;  %5050 = vmatpush.bf16.msrb.mxu0 %v7992_v22 }
 0x2c7   :  { %v9844_v30 = vld [vmem:[#allocation8 + $0x8dc] sm:$0xf]  ;;  %5016 = vmatmul.bf16.vlgmr.msra.gmra.mxu1 %v10613_v58  ;;  %v8280_v40 = vor.u32 %v9924_v27, %v8277_v29 }
 0x2c8   :  { %5060 = vmatpush.bf16.msrb.mxu1 %v8344_v62  ;;  %v7957_v34 = vld [vmem:[#allocation8 + $0x8f8] sm:$0xf0]  ;;  %5023 = vmatpush.bf16.msra.mxu2 %v7512_v19  ;;  %v8915_v19 = vld [vmem:[#allocation11 + $0x70] sm:$0xf] }
 0x2c9   :  { %v9716_v38 = vld [vmem:[#allocation8 + $0x4dc] sm:$0xf]  ;;  %v7960_v18 = vor.u32 %v9844_v30, %v7957_v34 }
 0x2ca   :  { %5035 = vmatpush.bf16.msra.mxu3 %v7800_v25  ;;  %v7445_v32 = vld [vmem:[#allocation8 + $0x4f8] sm:$0xf0]  ;;  %v10088_v25 = vld [vmem:[#allocation11 + $0x74] sm:$0xf0] }
 0x2cb   :  { %v7733_v44 = vld [vmem:[#allocation8 + $0x738] sm:$0xf0]  ;;  %v7448_v58 = vor.u32 %v9716_v38, %v7445_v32  ;;  %5051 = vmatpush.bf16.msrb.mxu0 %v7960_v18  ;;  %v10086_v18 = vld [vmem:[#allocation11 + $0x64] sm:$0xf0] }
 0x2cc   :  { %5061 = vmatpush.bf16.msrb.mxu1 %v8312_v0  ;;  %v9916_v45 = vld [vmem:[#allocation8 + $0xb1c] sm:$0xf]  ;;  %5024 = vmatpush.bf16.msra.mxu2 %v7480_v35  ;;  %v7736_v33 = vor.u32 %v9788_v43, %v7733_v44  ;;  %v8916_v35 = vor.u32 %v10088_v25, %v8915_v19  ;;  %v4772_v43 = vpop.f32.mrf.mxu2  ;;  %v4811_v44 = vpop.f32.mrf.mxu1  ;;  %v10082_v19 = vld [vmem:[#allocation11 + $0x44] sm:$0xf0] }
 0x2cd   :  { %v8245_v46 = vld [vmem:[#allocation8 + $0xb38] sm:$0xf0] }
 0x2ce   :  { %v9836_v49 = vld [vmem:[#allocation8 + $0x89c] sm:$0xf]  ;;  %5036 = vmatpush.bf16.msra.mxu3 %v7768_v36  ;;  %v8248_v47 = vor.u32 %v9916_v45, %v8245_v46 }
 0x2cf   :  { %v7925_v9 = vld [vmem:[#allocation8 + $0x8b8] sm:$0xf0] }
 0x2d0   :  { %v9708_v51 = vld [vmem:[#allocation8 + $0x49c] sm:$0xf]  ;;  %5062 = vmatpush.bf16.msrb.mxu1 %v8280_v40  ;;  %v7928_v54 = vor.u32 %v9836_v49, %v7925_v9  ;;  %5025 = vmatpush.bf16.msra.mxu2 %v7448_v58  ;;  %v8907_v40 = vld [vmem:[#allocation11 + $0x60] sm:$0xf] }
 0x2d1   :  { %v7413_v53 = vld [vmem:[#allocation8 + $0x4b8] sm:$0xf0] }
 0x2d2   :  { %v9780_v57 = vld [vmem:[#allocation8 + $0x6dc] sm:$0xf]  ;;  %v7416_v55 = vor.u32 %v9708_v51, %v7413_v53  ;;  %5037 = vmatpush.bf16.msra.mxu3 %v7736_v33  ;;  %5052 = vmatpush.bf16.msrb.mxu0 %v7928_v54  ;;  %v8908_v54 = vor.u32 %v10086_v18, %v8907_v40  ;;  %v10765_v40 = vpop.f32.mrf.mxu0 }
 0x2d3   :  { %v7701_v59 = vld [vmem:[#allocation8 + $0x6f8] sm:$0xf0] }
 0x2d4   :  { %v9908_v60 = vld [vmem:[#allocation8 + $0xadc] sm:$0xf]  ;;  %v7704_v6 = vor.u32 %v9780_v57, %v7701_v59  ;;  %5063 = vmatpush.bf16.msrb.mxu1 %v8248_v47  ;;  %5026 = vmatpush.bf16.msra.mxu2 %v7416_v55 }
 0x2d5   :  { %v8213_v61 = vld [vmem:[#allocation8 + $0xaf8] sm:$0xf0] }
 0x2d6   :  { %v9828_v50 = vld [vmem:[#allocation8 + $0x85c] sm:$0xf]  ;;  %v8216_v11 = vor.u32 %v9908_v60, %v8213_v61  ;;  %5038 = vmatpush.bf16.msra.mxu3 %v7704_v6  ;;  %v8979_v60 = vld [vmem:[#allocation11 + $0xf0] sm:$0xf]  ;;  %v10104_v61 = vld [vmem:[#allocation11 + $0xf4] sm:$0xf0] }
 0x2d7   :  { %v7893_v63 = vld [vmem:[#allocation8 + $0x878] sm:$0xf0] }
 0x2d8   :  { %v9700_v8 = vld [vmem:[#allocation8 + $0x45c] sm:$0xf]  ;;  %v7896_v62 = vor.u32 %v9828_v50, %v7893_v63  ;;  %5064 = vmatpush.bf16.msrb.mxu1 %v8216_v11  ;;  %v8899_v50 = vld [vmem:[#allocation11 + $0x50] sm:$0xf]  ;;  %v10084_v63 = vld [vmem:[#allocation11 + $0x54] sm:$0xf0] }
 0x2d9   :  { %v7381_v10 = vld [vmem:[#allocation8 + $0x478] sm:$0xf0] }
 0x2da   :  { %v9772_v56 = vld [vmem:[#allocation8 + $0x69c] sm:$0xf]  ;;  %v7384_v4 = vor.u32 %v9700_v8, %v7381_v10  ;;  %5053 = vmatpush.bf16.msrb.mxu0 %v7896_v62  ;;  %v4785_v8 = vpop.f32.mrf.mxu3 }
 0x2db   :  { %v7669_v12 = vld [vmem:[#allocation8 + $0x6b8] sm:$0xf0] }
 0x2dc   :  { %v9900_v14 = vld [vmem:[#allocation8 + $0xa9c] sm:$0xf]  ;;  %v7672_v21 = vor.u32 %v9772_v56, %v7669_v12  ;;  %5027 = vmatpush.bf16.msra.mxu2 %v7384_v4  ;;  %v8980_v56 = vor.u32 %v10104_v61, %v8979_v60  ;;  %v8900_v12 = vor.u32 %v10084_v63, %v8899_v50  ;;  %v8891_v4 = vld [vmem:[#allocation11 + $0x40] sm:$0xf]  ;;  %v10096_v60 = vld [vmem:[#allocation11 + $0xb4] sm:$0xf0] }
 0x2dd   :  { %v8181_v15 = vld [vmem:[#allocation8 + $0xab8] sm:$0xf0]  ;;  %v8867_v61 = vld [vmem:[#allocation11 + $0x10] sm:$0xf]  ;;  %v10076_v50 = vld [vmem:[#allocation11 + $0x14] sm:$0xf0] }
 0x2de   :  { %v9820_v16 = vld [vmem:[#allocation8 + $0x81c] sm:$0xf]  ;;  %v8184_v26 = vor.u32 %v9900_v14, %v8181_v15  ;;  %5039 = vmatpush.bf16.msra.mxu3 %v7672_v21 }
 0x2df   :  { %v7861_v37 = vld [vmem:[#allocation8 + $0x838] sm:$0xf0] }
 0x2e0   :  { %v9692_v1 = vld [vmem:[#allocation8 + $0x41c] sm:$0xf]  ;;  %v7864_v27 = vor.u32 %v9820_v16, %v7861_v37  ;;  %5065 = vmatpush.bf16.msrb.mxu1 %v8184_v26  ;;  %v8971_v16 = vld [vmem:[#allocation11 + $0xe0] sm:$0xf]  ;;  %v10102_v37 = vld [vmem:[#allocation11 + $0xe4] sm:$0xf0] }
 0x2e1   :  { %v7349_v0 = vld [vmem:[#allocation8 + $0x438] sm:$0xf0] }
 0x2e2   :  { %v10004_v22 = vld [vmem:[#allocation8 + $0xddc] sm:$0xf]  ;;  %v7352_v32 = vor.u32 %v9692_v1, %v7349_v0  ;;  %5054 = vmatpush.bf16.msrb.mxu0 %v7864_v27  ;;  %v8892_v0 = vor.u32 %v10082_v19, %v8891_v4  ;;  %v8963_v27 = vld [vmem:[#allocation11 + $0xd0] sm:$0xf]  ;;  %v10074_v4 = vld [vmem:[#allocation11 + $0x4] sm:$0xf0] }
 0x2e3   :  { %v8597_v29 = vld [vmem:[#allocation8 + $0xdf8] sm:$0xf0] }
 0x2e4   :  { %v9764_v30 = vld [vmem:[#allocation8 + $0x65c] sm:$0xf]  ;;  %v8600_v45 = vor.u32 %v10004_v22, %v8597_v29  ;;  %5028 = vmatpush.bf16.msra.mxu2 %v7352_v32  ;;  %v10100_v29 = vld [vmem:[#allocation11 + $0xd4] sm:$0xf0] }
 0x2e5   :  { %v7637_v34 = vld [vmem:[#allocation8 + $0x678] sm:$0xf0]  ;;  %5055 = vmatmul.bf16.vlgmr.msrb.gmra.mxu0 %v10626_v31  ;;  %v8964_v18 = vor.u32 %v10100_v29, %v8963_v27  ;;  %v10120_v29 = vld [vmem:[#allocation11 + $0x174] sm:$0xf0] }
 0x2e6   :  { %v9892_v36 = vld [vmem:[#allocation8 + $0xa5c] sm:$0xf]  ;;  %v7640_v46 = vor.u32 %v9764_v30, %v7637_v34  ;;  %5889 = vmatpush.bf16.msra.mxu0 %v8916_v35  ;;  %v8883_v30 = vld [vmem:[#allocation11 + $0x30] sm:$0xf]  ;;  %v10080_v34 = vld [vmem:[#allocation11 + $0x34] sm:$0xf0] }
 0x2e7   :  { %v8149_v38 = vld [vmem:[#allocation8 + $0xa78] sm:$0xf0]  ;;  %5029 = vmatmul.bf16.vlgmr.msra.gmra.mxu2 %v10618_v7  ;;  %v8972_v7 = vor.u32 %v10102_v37, %v8971_v16  ;;  %v8884_v43 = vor.u32 %v10080_v34, %v8883_v30  ;;  %v10094_v16 = vld [vmem:[#allocation11 + $0xa4] sm:$0xf0]  ;;  %v8859_v37 = vld [vmem:[#allocation11] sm:$0xf] }
 0x2e8   :  { %v9996_v49 = vld [vmem:[#allocation8 + $0xd9c] sm:$0xf]  ;;  %v8152_v33 = vor.u32 %v9892_v36, %v8149_v38  ;;  %5073 = vmatpush.bf16.msrb.mxu2 %v8600_v45  ;;  %5040 = vmatpush.bf16.msra.mxu3 %v7640_v46  ;;  %v10098_v46 = vld [vmem:[#allocation11 + $0xc4] sm:$0xf0]  ;;  %v8860_v27 = vor.u32 %v10074_v4, %v8859_v37  ;;  %v9099_v37 = vld [vmem:[#allocation11 + $0x1e0] sm:$0xf] }
 0x2e9   :  { %v8565_v9 = vld [vmem:[#allocation8 + $0xdb8] sm:$0xf0]  ;;  %v10134_v4 = vld [vmem:[#allocation11 + $0x1e4] sm:$0xf0] }
 0x2ea   :  { %v9756_v58 = vld [vmem:[#allocation8 + $0x61c] sm:$0xf]  ;;  %v8568_v55 = vor.u32 %v9996_v49, %v8565_v9  ;;  %5066 = vmatpush.bf16.msrb.mxu1 %v8152_v33  ;;  %5890 = vmatpush.bf16.msra.mxu0 %v8908_v54  ;;  %v8875_v49 = vld [vmem:[#allocation11 + $0x20] sm:$0xf]  ;;  %v10078_v9 = vld [vmem:[#allocation11 + $0x24] sm:$0xf0] }
 0x2eb   :  { %v7605_v51 = vld [vmem:[#allocation8 + $0x638] sm:$0xf0] }
 0x2ec   :  { %v9884_v53 = vld [vmem:[#allocation8 + $0xa1c] sm:$0xf]  ;;  %v7608_v6 = vor.u32 %v9756_v58, %v7605_v51  ;;  %5074 = vmatpush.bf16.msrb.mxu2 %v8568_v55  ;;  %v10767_v55 = vpop.f32.mrf.mxu2 }
 0x2ed   :  { %v8117_v47 = vld [vmem:[#allocation8 + $0xa38] sm:$0xf0] }
 0x2ee   :  { %v10068_v57 = vld [vmem:[#allocation8 + $0xfdc] sm:$0xf]  ;;  %v8120_v10 = vor.u32 %v9884_v53, %v8117_v47  ;;  %5041 = vmatpush.bf16.msra.mxu3 %v7608_v6  ;;  %5891 = vmatpush.bf16.msra.mxu0 %v8900_v12  ;;  %v8876_v47 = vor.u32 %v10078_v9, %v8875_v49  ;;  %v10769_v6 = vpop.f32.mrf.mxu1  ;;  %v9035_v9 = vld [vmem:[#allocation11 + $0x160] sm:$0xf] }
 0x2ef   :  { %v8853_v59 = vld [vmem:[#allocation8 + $0xff8] sm:$0xf0] }
 0x2f0   :  { %v8856_v41 = vor.u32 %v10068_v57, %v8853_v59  ;;  %v9988_v11 = vld [vmem:[#allocation8 + $0xd5c] sm:$0xf]  ;;  %5067 = vmatpush.bf16.msrb.mxu1 %v8120_v10  ;;  %v8947_v59 = vld [vmem:[#allocation11 + $0xb0] sm:$0xf] }
 0x2f1   :  { %v8533_v62 = vld [vmem:[#allocation8 + $0xd78] sm:$0xf0]  ;;  %5042 = vmatmul.bf16.vlgmr.msra.gmra.mxu3 %v10621_v42  ;;  %v8955_v42 = vld [vmem:[#allocation11 + $0xc0] sm:$0xf] }
 0x2f2   :  { %v10060_v14 = vld [vmem:[#allocation8 + $0xf9c] sm:$0xf]  ;;  %v8536_v25 = vor.u32 %v9988_v11, %v8533_v62  ;;  %5086 = vmatpush.bf16.msrb.mxu3 %v8856_v41  ;;  %5892 = vmatpush.bf16.msra.mxu0 %v8892_v0  ;;  %v8956_v53 = vor.u32 %v10098_v46, %v8955_v42  ;;  %v4850_v11 = vpop.f32.mrf.mxu0  ;;  %v8948_v62 = vor.u32 %v10096_v60, %v8947_v59  ;;  %v9043_v0 = vld [vmem:[#allocation11 + $0x170] sm:$0xf] }
 0x2f3   :  { %v8821_v15 = vld [vmem:[#allocation8 + $0xfb8] sm:$0xf0]  ;;  %5068 = vmatmul.bf16.vlgmr.msrb.gmra.mxu1 %v10629_v52  ;;  %v9044_v46 = vor.u32 %v10120_v29, %v9043_v0  ;;  %v9235_v59 = vld [vmem:[#allocation11 + $0x2f0] sm:$0xf]  ;;  %v9100_v0 = vor.u32 %v10134_v4, %v9099_v37 }
 0x2f4   :  { %v8824_v31 = vor.u32 %v10060_v14, %v8821_v15  ;;  %v9980_v21 = vld [vmem:[#allocation8 + $0xd1c] sm:$0xf]  ;;  %5902 = vmatpush.bf16.msra.mxu1 %v8980_v56  ;;  %5075 = vmatpush.bf16.msrb.mxu2 %v8536_v25  ;;  %v8868_v56 = vor.u32 %v10076_v50, %v8867_v61  ;;  %v8939_v15 = vld [vmem:[#allocation11 + $0xa0] sm:$0xf]  ;;  %v9171_v25 = vld [vmem:[#allocation11 + $0x270] sm:$0xf] }
 0x2f5   :  { %v8501_v1 = vld [vmem:[#allocation8 + $0xd38] sm:$0xf0]  ;;  %v10168_v61 = vld [vmem:[#allocation11 + $0x2f4] sm:$0xf0]  ;;  %v9155_v50 = vld [vmem:[#allocation11 + $0x250] sm:$0xf] }
 0x2f6   :  { %v10052_v22 = vld [vmem:[#allocation8 + $0xf5c] sm:$0xf]  ;;  %v8504_v35 = vor.u32 %v9980_v21, %v8501_v1  ;;  %5087 = vmatpush.bf16.msrb.mxu3 %v8824_v31  ;;  %5893 = vmatpush.bf16.msra.mxu0 %v8884_v43  ;;  %v10152_v31 = vld [vmem:[#allocation11 + $0x274] sm:$0xf0]  ;;  %v9163_v43 = vld [vmem:[#allocation11 + $0x260] sm:$0xf]  ;;  %v4863_v42 = vpop.f32.mrf.mxu1 }
 0x2f7   :  { %v8789_v26 = vld [vmem:[#allocation8 + $0xf78] sm:$0xf0]  ;;  %v9011_v42 = vld [vmem:[#allocation11 + $0x130] sm:$0xf] }
 0x2f8   :  { %v8792_v36 = vor.u32 %v10052_v22, %v8789_v26  ;;  %v9972_v38 = vld [vmem:[#allocation8 + $0xcdc] sm:$0xf]  ;;  %5903 = vmatpush.bf16.msra.mxu1 %v8972_v7  ;;  %5076 = vmatpush.bf16.msrb.mxu2 %v8504_v35  ;;  %v10771_v22 = vpop.f32.mrf.mxu3  ;;  %v8940_v26 = vor.u32 %v10094_v16, %v8939_v15  ;;  %v9172_v35 = vor.u32 %v10152_v31, %v9171_v25  ;;  %v10166_v25 = vld [vmem:[#allocation11 + $0x2e4] sm:$0xf0]  ;;  %v9147_v31 = vld [vmem:[#allocation11 + $0x240] sm:$0xf] }
 0x2f9   :  { %v8469_v32 = vld [vmem:[#allocation8 + $0xcf8] sm:$0xf0]  ;;  %v9236_v15 = vor.u32 %v10168_v61, %v9235_v59  ;;  %v9003_v59 = vld [vmem:[#allocation11 + $0x120] sm:$0xf]  ;;  %v10110_v61 = vld [vmem:[#allocation11 + $0x124] sm:$0xf0] }
 0x2fa   :  { %v10044_v44 = vld [vmem:[#allocation8 + $0xf1c] sm:$0xf]  ;;  %v8472_v52 = vor.u32 %v9972_v38, %v8469_v32  ;;  %5088 = vmatpush.bf16.msrb.mxu3 %v8792_v36  ;;  %5894 = vmatpush.bf16.msra.mxu0 %v8876_v47  ;;  %v8931_v36 = vld [vmem:[#allocation11 + $0x90] sm:$0xf]  ;;  %v10092_v38 = vld [vmem:[#allocation11 + $0x94] sm:$0xf0] }
 0x2fb   :  { %v8757_v45 = vld [vmem:[#allocation8 + $0xf38] sm:$0xf0]  ;;  %v5099_v32 = vmax.f32 %v10681_v48, 0.0  ;;  %v10090_v47 = vld [vmem:[#allocation11 + $0x84] sm:$0xf0] }
 0x2fc   :  { %v8760_v58 = vor.u32 %v10044_v44, %v8757_v45  ;;  %v9964_v33 = vld [vmem:[#allocation8 + $0xc9c] sm:$0xf]  ;;  %5904 = vmatpush.bf16.msra.mxu1 %v8964_v18  ;;  %5077 = vmatpush.bf16.msrb.mxu2 %v8472_v52  ;;  %v10150_v44 = vld [vmem:[#allocation11 + $0x264] sm:$0xf0]  ;;  %v4824_v45 = vpop.f32.mrf.mxu2  ;;  %v8995_v4 = vld [vmem:[#allocation11 + $0x110] sm:$0xf] }
 0x2fd   :  { %v8437_v51 = vld [vmem:[#allocation8 + $0xcb8] sm:$0xf0]  ;;  %v10118_v52 = vld [vmem:[#allocation11 + $0x164] sm:$0xf0]  ;;  %v9164_v48 = vor.u32 %v10150_v44, %v9163_v43  ;;  %v10774_v60 = vpack.c.bf16 %v5099_v32, %v5099_v32  ;;  %v9139_v32 = vld [vmem:[#allocation11 + $0x230] sm:$0xf] }
 0x2fe   :  { %v10036_v54 = vld [vmem:[#allocation8 + $0xedc] sm:$0xf]  ;;  %v8440_v63 = vor.u32 %v9964_v33, %v8437_v51  ;;  %5089 = vmatpush.bf16.msrb.mxu3 %v8760_v58  ;;  %5895 = vmatpush.bf16.msra.mxu0 %v8868_v56  ;;  %v8932_v33 = vor.u32 %v10092_v38, %v8931_v36  ;;  %v9219_v36 = vld [vmem:[#allocation11 + $0x2d0] sm:$0xf]  ;;  %v10164_v38 = vld [vmem:[#allocation11 + $0x2d4] sm:$0xf0] }
 0x2ff   :  { %v8725_v57 = vld [vmem:[#allocation8 + $0xef8] sm:$0xf0] }
 0x300   :  { %v8728_v8 = vor.u32 %v10036_v54, %v8725_v57  ;;  %v9956_v10 = vld [vmem:[#allocation8 + $0xc5c] sm:$0xf]  ;;  %5905 = vmatpush.bf16.msra.mxu1 %v8956_v53  ;;  %5078 = vmatpush.bf16.msrb.mxu2 %v8440_v63  ;;  %v8923_v53 = vld [vmem:[#allocation11 + $0x80] sm:$0xf]  ;;  %v9107_v54 = vld [vmem:[#allocation11 + $0x1f0] sm:$0xf]  ;;  %v4837_v11 = vpop.f32.mrf.mxu3 }
 0x301   :  { %v8405_v41 = vld [vmem:[#allocation8 + $0xc78] sm:$0xf0]  ;;  %v10136_v57 = vld [vmem:[#allocation11 + $0x1f4] sm:$0xf0] }
 0x302   :  { %v10028_v12 = vld [vmem:[#allocation8 + $0xe9c] sm:$0xf]  ;;  %v8408_v19 = vor.u32 %v9956_v10, %v8405_v41  ;;  %5090 = vmatpush.bf16.msrb.mxu3 %v8728_v8  ;;  %5896 = vmatpush.bf16.msra.mxu0 %v8860_v27  ;;  %v10148_v63 = vld [vmem:[#allocation11 + $0x254] sm:$0xf0]  ;;  %v9036_v8 = vor.u32 %v10118_v52, %v9035_v9  ;;  %v5100_v41 = vmax.f32 %v10695_v17, 0.0  ;;  %v9108_v56 = vor.u32 %v10136_v57, %v9107_v54 }
 0x303   :  { %v8693_v14 = vld [vmem:[#allocation8 + $0xeb8] sm:$0xf0]  ;;  %v9156_v16 = vor.u32 %v10148_v63, %v9155_v50  ;;  %v9220_v9 = vor.u32 %v10164_v38, %v9219_v36  ;;  %v10106_v36 = vld [vmem:[#allocation11 + $0x104] sm:$0xf0] }
 0x304   :  { %v8696_v21 = vor.u32 %v10028_v12, %v8693_v14  ;;  %v9948_v1 = vld [vmem:[#allocation8 + $0xc1c] sm:$0xf]  ;;  %5906 = vmatpush.bf16.msra.mxu1 %v8948_v62  ;;  %5079 = vmatpush.bf16.msrb.mxu2 %v8408_v19  ;;  %v8924_v62 = vor.u32 %v10090_v47, %v8923_v53  ;;  %v9027_v12 = vld [vmem:[#allocation11 + $0x150] sm:$0xf]  ;;  %v10116_v14 = vld [vmem:[#allocation11 + $0x154] sm:$0xf0]  ;;  %v10782_v27 = vpack.c.bf16 %v5100_v41, %v5100_v41 }
 0x305   :  { %v8373_v7 = vld [vmem:[#allocation8 + $0xc38] sm:$0xf0]  ;;  %5897 = vmatmul.bf16.vlgmr.msra.gmra.mxu0 %v10774_v60  ;;  %v9227_v19 = vld [vmem:[#allocation11 + $0x2e0] sm:$0xf]  ;;  %v9028_v17 = vor.u32 %v10116_v14, %v9027_v12  ;;  %v10162_v53 = vld [vmem:[#allocation11 + $0x2c4] sm:$0xf0] }
 0x306   :  { %v10020_v30 = vld [vmem:[#allocation8 + $0xe5c] sm:$0xf]  ;;  %v8376_v18 = vor.u32 %v9948_v1, %v8373_v7  ;;  %5091 = vmatpush.bf16.msrb.mxu3 %v8696_v21  ;;  %5941 = vmatpush.bf16.msrb.mxu0 %v9172_v35  ;;  %v10146_v21 = vld [vmem:[#allocation11 + $0x244] sm:$0xf0]  ;;  %v10779_v1 = vld [vmem:[#allocation10] sm:$0xff]  ;;  %v9228_v29 = vor.u32 %v10166_v25, %v9227_v19 }
 0x307   :  { %v8661_v34 = vld [vmem:[#allocation8 + $0xe78] sm:$0xf0]  ;;  %v1696_v7 = vperm.slane %v10779_v1, 5  ;;  %v10132_v35 = vld [vmem:[#allocation11 + $0x1d4] sm:$0xf0] }
 0x308   :  { %v8664_v49 = vor.u32 %v10020_v30, %v8661_v34  ;;  %v10012_v58 = vld [vmem:[#allocation8 + $0xe1c] sm:$0xf]  ;;  %5907 = vmatpush.bf16.msra.mxu1 %v8940_v26  ;;  %5080 = vmatpush.bf16.msrb.mxu2 %v8376_v18  ;;  %v10114_v26 = vld [vmem:[#allocation11 + $0x144] sm:$0xf0]  ;;  %v9148_v30 = vor.u32 %v10146_v21, %v9147_v31  ;;  %v9091_v34 = vld [vmem:[#allocation11 + $0x1d0] sm:$0xf]  ;;  %v4887_v38 = vpop.f32.mrf.mxu3 }
 0x309   :  { %v8629_v51 = vld [vmem:[#allocation8 + $0xe38] sm:$0xf0]  ;;  %v10144_v18 = vld [vmem:[#allocation11 + $0x234] sm:$0xf0]  ;;  %v4797_v44 = vadd.f32 %v10753_v39, %v1696_v7  ;;  %v9092_v45 = vor.u32 %v10132_v35, %v9091_v34  ;;  %v9131_v47 = vld [vmem:[#allocation11 + $0x220] sm:$0xf] }
 0x30a   :  { %5092 = vmatpush.bf16.msrb.mxu3 %v8664_v49  ;;  %v8632_v10 = vor.u32 %v10012_v58, %v8629_v51  ;;  %5942 = vmatpush.bf16.msrb.mxu0 %v9164_v48  ;;  %v10787_v49 = vpop.f32.mrf.mxu0  ;;  %v9140_v52 = vor.u32 %v10144_v18, %v9139_v32  ;;  %v10130_v58 = vld [vmem:[#allocation11 + $0x1c4] sm:$0xf0]  ;;  %v9203_v41 = vld [vmem:[#allocation11 + $0x2b0] sm:$0xf]  ;;  %v10140_v12 = vld [vmem:[#allocation11 + $0x214] sm:$0xf0] }
 0x30b   :  { %5081 = vmatmul.bf16.vlgmr.msrb.gmra.mxu2 %v10636_v3  ;;  %v9019_v3 = vld [vmem:[#allocation11 + $0x140] sm:$0xf]  ;;  %v4810_v51 = vadd.f32 %v10757_v5, %v4797_v44  ;;  %v10142_v48 = vld [vmem:[#allocation11 + $0x224] sm:$0xf0]  ;;  %v4771_v5 = vadd.f32 %v10755_v2, %v10747_v23  ;;  %v10108_v19 = vld [vmem:[#allocation11 + $0x114] sm:$0xf0] }
 0x30c   :  { %5915 = vmatpush.bf16.msra.mxu2 %v9044_v46  ;;  %5908 = vmatpush.bf16.msra.mxu1 %v8932_v33  ;;  %v9020_v43 = vor.u32 %v10114_v26, %v9019_v3  ;;  %v10112_v46 = vld [vmem:[#allocation11 + $0x134] sm:$0xf0]  ;;  %v9211_v33 = vld [vmem:[#allocation11 + $0x2c0] sm:$0xf]  ;;  %v9132_v63 = vor.u32 %v10142_v48, %v9131_v47  ;;  %v10126_v31 = vld [vmem:[#allocation11 + $0x1a4] sm:$0xf0]  ;;  %v8996_v3 = vor.u32 %v10108_v19, %v8995_v4 }
 0x30d   :  { %v9012_v39 = vor.u32 %v10112_v46, %v9011_v42  ;;  %v4823_v54 = vadd.f32 %v10767_v55, %v4810_v51  ;;  %v9212_v50 = vor.u32 %v10162_v53, %v9211_v33  ;;  %v9004_v55 = vor.u32 %v10110_v61, %v9003_v59  ;;  %v9195_v21 = vld [vmem:[#allocation11 + $0x2a0] sm:$0xf]  ;;  %v10158_v7 = vld [vmem:[#allocation11 + $0x2a4] sm:$0xf0]  ;;  %v10087_v26 = vld [vmem:[#allocation11 + $0x74] sm:$0xf] }
 0x30e   :  { %5093 = vmatpush.bf16.msrb.mxu3 %v8632_v10  ;;  %5943 = vmatpush.bf16.msrb.mxu0 %v9156_v16  ;;  %v10128_v10 = vld [vmem:[#allocation11 + $0x1b4] sm:$0xf0]  ;;  %v4784_v14 = vadd.f32 %v10759_v24, %v4771_v5  ;;  %v10795_v16 = vpop.f32.mrf.mxu1  ;;  %v10138_v24 = vld [vmem:[#allocation11 + $0x204] sm:$0xf0]  ;;  %v8987_v35 = vld [vmem:[#allocation11 + $0x100] sm:$0xf]  ;;  %v9196_v32 = vor.u32 %v10158_v7, %v9195_v21 }
 0x30f   :  { %v4836_v11 = vadd.f32 %v10771_v22, %v4823_v54  ;;  %v9067_v22 = vld [vmem:[#allocation11 + $0x1a0] sm:$0xf]  ;;  %v10124_v44 = vld [vmem:[#allocation11 + $0x194] sm:$0xf0]  ;;  %v8909_v33 = vld [vmem:[#allocation11 + $0x68] sm:$0xf0] }
 0x310   :  { %5916 = vmatpush.bf16.msra.mxu2 %v9036_v8  ;;  %5909 = vmatpush.bf16.msra.mxu1 %v8924_v62  ;;  %v9075_v8 = vld [vmem:[#allocation11 + $0x1b0] sm:$0xf]  ;;  %v10160_v62 = vld [vmem:[#allocation11 + $0x2b4] sm:$0xf0]  ;;  %v9068_v34 = vor.u32 %v10126_v31, %v9067_v22  ;;  %v5101_v51 = vmax.f32 %v10718_v20, 0.0 }
 0x311   :  { %5094 = vmatmul.bf16.vlgmr.msrb.gmra.mxu3 %v10640_v13  ;;  %v9083_v13 = vld [vmem:[#allocation11 + $0x1c0] sm:$0xf]  ;;  %v9076_v37 = vor.u32 %v10128_v10, %v9075_v8  ;;  %v9204_v23 = vor.u32 %v10160_v62, %v9203_v41  ;;  %v10156_v46 = vld [vmem:[#allocation11 + $0x294] sm:$0xf0]  ;;  %v10122_v59 = vld [vmem:[#allocation11 + $0x184] sm:$0xf0] }
 0x312   :  { %5928 = vmatpush.bf16.msra.mxu3 %v9108_v56  ;;  %5944 = vmatpush.bf16.msrb.mxu0 %v9148_v30  ;;  %v9084_v57 = vor.u32 %v10130_v58, %v9083_v13  ;;  %v9123_v56 = vld [vmem:[#allocation11 + $0x210] sm:$0xf]  ;;  %v4902_v25 = vpop.f32.mrf.mxu0  ;;  %v5103_v30 = vmax.f32 %v4784_v14, 0.0  ;;  %v8988_v13 = vor.u32 %v10106_v36, %v8987_v35  ;;  %v10085_v58 = vld [vmem:[#allocation11 + $0x64] sm:$0xf]  ;;  %v5102_v14 = vmax.f32 %v10737_v28, 0.0 }
 0x313   :  { %5910 = vmatmul.bf16.vlgmr.msra.gmra.mxu1 %v10782_v27  ;;  %v9124_v2 = vor.u32 %v10140_v12, %v9123_v56  ;;  %v9051_v54 = vld [vmem:[#allocation11 + $0x180] sm:$0xf]  ;;  %v8912_v10 = vor.u32 %v10085_v58, %v8909_v33  ;;  %v10182_v20 = vld [vmem:[#allocation11 + $0x364] sm:$0xf0]  ;;  %v10103_v5 = vld [vmem:[#allocation11 + $0xf4] sm:$0xf]  ;;  %v10802_v12 = vpack.c.bf16 %v5101_v51, %v5101_v51 }
 0x314   :  { %5954 = vmatpush.bf16.msrb.mxu1 %v9236_v15  ;;  %5917 = vmatpush.bf16.msra.mxu2 %v9028_v17  ;;  %v4874_v15 = vpop.f32.mrf.mxu2  ;;  %v4849_v17 = vadd.f32 %v10765_v40, %v4836_v11  ;;  %v9187_v40 = vld [vmem:[#allocation11 + $0x290] sm:$0xf]  ;;  %v9179_v61 = vld [vmem:[#allocation11 + $0x280] sm:$0xf]  ;;  %v8981_v11 = vld [vmem:[#allocation11 + $0xf8] sm:$0xf0] }
 0x315   :  { %v9291_v41 = vld [vmem:[#allocation11 + $0x360] sm:$0xf]  ;;  %v10083_v62 = vld [vmem:[#allocation11 + $0x54] sm:$0xf]  ;;  %v8901_v56 = vld [vmem:[#allocation11 + $0x58] sm:$0xf0] }
 0x316   :  { %5929 = vmatpush.bf16.msra.mxu3 %v9100_v0  ;;  %5945 = vmatpush.bf16.msrb.mxu0 %v9140_v52  ;;  %v9115_v0 = vld [vmem:[#allocation11 + $0x200] sm:$0xf]  ;;  %v10184_v52 = vld [vmem:[#allocation11 + $0x374] sm:$0xf0]  ;;  %v4915_v48 = vpop.f32.mrf.mxu1  ;;  %v9292_v4 = vor.u32 %v10182_v20, %v9291_v41  ;;  %v9283_v19 = vld [vmem:[#allocation11 + $0x350] sm:$0xf] }
 0x317   :  { %v9116_v18 = vor.u32 %v10138_v24, %v9115_v0  ;;  %v10180_v22 = vld [vmem:[#allocation11 + $0x354] sm:$0xf0]  ;;  %v10101_v31 = vld [vmem:[#allocation11 + $0xe4] sm:$0xf]  ;;  %v8973_v21 = vld [vmem:[#allocation11 + $0xe8] sm:$0xf0]  ;;  %v10807_v0 = vpack.c.bf16 %v5102_v14, %v5102_v14 }
 0x318   :  { %5955 = vmatpush.bf16.msrb.mxu1 %v9228_v29  ;;  %5918 = vmatpush.bf16.msra.mxu2 %v9020_v43  ;;  %v8917_v29 = vld [vmem:[#allocation11 + $0x78] sm:$0xf0]  ;;  %v9059_v43 = vld [vmem:[#allocation11 + $0x190] sm:$0xf]  ;;  %v8893_v7 = vld [vmem:[#allocation11 + $0x48] sm:$0xf0]  ;;  %v9284_v28 = vor.u32 %v10180_v22, %v9283_v19 }
 0x319   :  { %v8920_v42 = vor.u32 %v10087_v26, %v8917_v29  ;;  %v9275_v29 = vld [vmem:[#allocation11 + $0x340] sm:$0xf]  ;;  %v8965_v35 = vld [vmem:[#allocation11 + $0xd8] sm:$0xf0]  ;;  %v10079_v36 = vld [vmem:[#allocation11 + $0x34] sm:$0xf] }
 0x31a   :  { %5930 = vmatpush.bf16.msra.mxu3 %v9092_v45  ;;  %5946 = vmatpush.bf16.msrb.mxu0 %v9132_v63  ;;  %v4862_v45 = vadd.f32 %v10769_v6, %v4849_v17  ;;  %v10800_v63 = vpack.c.bf16 %v5103_v30, %v5103_v30  ;;  %v10081_v17 = vld [vmem:[#allocation11 + $0x44] sm:$0xf]  ;;  %v10178_v30 = vld [vmem:[#allocation11 + $0x344] sm:$0xf0]  ;;  %v9259_v51 = vld [vmem:[#allocation11 + $0x320] sm:$0xf] }
 0x31b   :  { %v8896_v26 = vor.u32 %v10081_v17, %v8893_v7  ;;  %v8949_v48 = vld [vmem:[#allocation11 + $0xb8] sm:$0xf0]  ;;  %v10172_v41 = vld [vmem:[#allocation11 + $0x314] sm:$0xf0]  ;;  %v10093_v20 = vld [vmem:[#allocation11 + $0xa4] sm:$0xf] }
 0x31c   :  { %5956 = vmatpush.bf16.msrb.mxu1 %v9220_v9  ;;  %5919 = vmatpush.bf16.msra.mxu2 %v9012_v39  ;;  %v9299_v9 = vld [vmem:[#allocation11 + $0x370] sm:$0xf]  ;;  %v4875_v53 = vadd.f32 %v4874_v15, %v4862_v45  ;;  %v4876_v47 = vpop.f32.mrf.mxu2  ;;  %v9060_v39 = vor.u32 %v10124_v44, %v9059_v43  ;;  %v4889_v15 = vpop.f32.mrf.mxu3  ;;  %v10176_v45 = vld [vmem:[#allocation11 + $0x334] sm:$0xf0]  ;;  %v9243_v19 = vld [vmem:[#allocation11 + $0x300] sm:$0xf] }
 0x31d   :  { %v9300_v6 = vor.u32 %v10184_v52, %v9299_v9  ;;  %v10077_v9 = vld [vmem:[#allocation11 + $0x24] sm:$0xf]  ;;  %v8877_v52 = vld [vmem:[#allocation11 + $0x28] sm:$0xf0]  ;;  %v10095_v47 = vld [vmem:[#allocation11 + $0xb4] sm:$0xf] }
 0x31e   :  { %5931 = vmatpush.bf16.msra.mxu3 %v9084_v57  ;;  %5947 = vmatpush.bf16.msrb.mxu0 %v9124_v2  ;;  %v9188_v57 = vor.u32 %v10156_v46, %v9187_v40  ;;  %v4888_v8 = vadd.f32 %v4887_v38, %v4875_v53  ;;  %v8904_v2 = vor.u32 %v10083_v62, %v8901_v56  ;;  %v8885_v38 = vld [vmem:[#allocation11 + $0x38] sm:$0xf0]  ;;  %v9267_v40 = vld [vmem:[#allocation11 + $0x330] sm:$0xf]  ;;  %v8957_v46 = vld [vmem:[#allocation11 + $0xc8] sm:$0xf0] }
 0x31f   :  { %v8888_v44 = vor.u32 %v10079_v36, %v8885_v38  ;;  %v8880_v33 = vor.u32 %v10077_v9, %v8877_v52  ;;  %v10174_v53 = vld [vmem:[#allocation11 + $0x324] sm:$0xf0]  ;;  %v8861_v62 = vld [vmem:[#allocation11 + $0x8] sm:$0xf0]  ;;  %v10151_v56 = vld [vmem:[#allocation11 + $0x274] sm:$0xf] }
 0x320   :  { %5957 = vmatpush.bf16.msrb.mxu1 %v9212_v50  ;;  %5920 = vmatpush.bf16.msra.mxu2 %v9004_v55  ;;  %v10154_v50 = vld [vmem:[#allocation11 + $0x284] sm:$0xf0]  ;;  %v9052_v55 = vor.u32 %v10122_v59, %v9051_v54  ;;  %v5104_v25 = vmax.f32 %v4888_v8, 0.0  ;;  %v8869_v54 = vld [vmem:[#allocation11 + $0x18] sm:$0xf0]  ;;  %v9260_v59 = vor.u32 %v10174_v53, %v9259_v51 }
 0x321   :  { %v8933_v22 = vld [vmem:[#allocation11 + $0x98] sm:$0xf0]  ;;  %v10149_v17 = vld [vmem:[#allocation11 + $0x264] sm:$0xf]  ;;  %v9165_v7 = vld [vmem:[#allocation11 + $0x268] sm:$0xf0] }
 0x322   :  { %5932 = vmatpush.bf16.msra.mxu3 %v9076_v37  ;;  %5948 = vmatpush.bf16.msrb.mxu0 %v9116_v18  ;;  %v9180_v37 = vor.u32 %v10154_v50, %v9179_v61  ;;  %v10809_v24 = vpack.c.bf16 %v5104_v25, %v5104_v25  ;;  %v10813_v18 = vpop.f32.mrf.mxu0  ;;  %v8952_v50 = vor.u32 %v10095_v47, %v8949_v48  ;;  %v10170_v25 = vld [vmem:[#allocation11 + $0x304] sm:$0xf0]  ;;  %v10089_v36 = vld [vmem:[#allocation11 + $0x84] sm:$0xf]  ;;  %v8925_v38 = vld [vmem:[#allocation11 + $0x88] sm:$0xf0] }
 0x323   :  { %v9157_v9 = vld [vmem:[#allocation11 + $0x258] sm:$0xf0]  ;;  %v9355_v52 = vld [vmem:[#allocation11 + $0x3e0] sm:$0xf]  ;;  %v8928_v51 = vor.u32 %v10089_v36, %v8925_v38  ;;  %v10192_v36 = vld [vmem:[#allocation11 + $0x3b4] sm:$0xf0] }
 0x324   :  { %5958 = vmatpush.bf16.msrb.mxu1 %v9204_v23  ;;  %5921 = vmatpush.bf16.msra.mxu2 %v8996_v3  ;;  %v8984_v23 = vor.u32 %v10103_v5, %v8981_v11  ;;  %v8976_v3 = vor.u32 %v10101_v31, %v8973_v21  ;;  %v8941_v5 = vld [vmem:[#allocation11 + $0xa8] sm:$0xf0]  ;;  %v10073_v11 = vld [vmem:[#allocation11 + $0x4] sm:$0xf]  ;;  %v10119_v31 = vld [vmem:[#allocation11 + $0x174] sm:$0xf] }
 0x325   :  { %5949 = vmatmul.bf16.vlgmr.msrb.gmra.mxu0 %v10800_v63  ;;  %v9045_v21 = vld [vmem:[#allocation11 + $0x178] sm:$0xf0]  ;;  %v10109_v38 = vld [vmem:[#allocation11 + $0x124] sm:$0xf] }
 0x326   :  { %5933 = vmatpush.bf16.msra.mxu3 %v9068_v34  ;;  %5993 = vmatpush.bf16.msra.mxu0 %v8920_v42  ;;  %v10099_v34 = vld [vmem:[#allocation11 + $0xd4] sm:$0xf]  ;;  %v10097_v42 = vld [vmem:[#allocation11 + $0xc4] sm:$0xf] }
 0x327   :  { %v8968_v43 = vor.u32 %v10099_v34, %v8965_v35  ;;  %v8960_v58 = vor.u32 %v10097_v42, %v8957_v46  ;;  %v9048_v35 = vor.u32 %v10119_v31, %v9045_v21  ;;  %v9237_v42 = vld [vmem:[#allocation11 + $0x2f8] sm:$0xf0]  ;;  %v10147_v46 = vld [vmem:[#allocation11 + $0x254] sm:$0xf] }
 0x328   :  { %5959 = vmatpush.bf16.msrb.mxu1 %v9196_v32  ;;  %5922 = vmatpush.bf16.msra.mxu2 %v8988_v13  ;;  %v9276_v32 = vor.u32 %v10178_v30, %v9275_v29  ;;  %v9268_v13 = vor.u32 %v10176_v45, %v9267_v40  ;;  %v10819_v15 = vpop.f32.mrf.mxu3  ;;  %v9363_v29 = vld [vmem:[#allocation11 + $0x3f0] sm:$0xf]  ;;  %v10200_v30 = vld [vmem:[#allocation11 + $0x3f4] sm:$0xf0]  ;;  %v9037_v40 = vld [vmem:[#allocation11 + $0x168] sm:$0xf0] }
 0x329   :  { %v10167_v45 = vld [vmem:[#allocation11 + $0x2f4] sm:$0xf] }
 0x32a   :  { %5934 = vmatpush.bf16.msra.mxu3 %v9060_v39  ;;  %5994 = vmatpush.bf16.msra.mxu0 %v8912_v10  ;;  %v10075_v39 = vld [vmem:[#allocation11 + $0x14] sm:$0xf]  ;;  %v4954_v61 = vpop.f32.mrf.mxu0  ;;  %v9251_v10 = vld [vmem:[#allocation11 + $0x310] sm:$0xf]  ;;  %v9240_v48 = vor.u32 %v10167_v45, %v9237_v42  ;;  %v9205_v42 = vld [vmem:[#allocation11 + $0x2b8] sm:$0xf0] }
 0x32b   :  { %5923 = vmatmul.bf16.vlgmr.msra.gmra.mxu2 %v10802_v12  ;;  %v8872_v8 = vor.u32 %v10075_v39, %v8869_v54  ;;  %v9252_v14 = vor.u32 %v10172_v41, %v9251_v10  ;;  %v9160_v39 = vor.u32 %v10147_v46, %v9157_v9  ;;  %v10115_v54 = vld [vmem:[#allocation11 + $0x154] sm:$0xf]  ;;  %v10165_v61 = vld [vmem:[#allocation11 + $0x2e4] sm:$0xf]  ;;  %v9149_v10 = vld [vmem:[#allocation11 + $0x248] sm:$0xf0] }
 0x32c   :  { %5960 = vmatpush.bf16.msrb.mxu1 %v9188_v57  ;;  %5967 = vmatpush.bf16.msrb.mxu2 %v9300_v6  ;;  %v10815_v57 = vpop.f32.mrf.mxu2  ;;  %v10817_v6 = vpop.f32.mrf.mxu1  ;;  %v10196_v41 = vld [vmem:[#allocation11 + $0x3d4] sm:$0xf0]  ;;  %v10159_v45 = vld [vmem:[#allocation11 + $0x2b4] sm:$0xf]  ;;  %v9125_v9 = vld [vmem:[#allocation11 + $0x218] sm:$0xf0] }
 0x32d   :  { %v10139_v46 = vld [vmem:[#allocation11 + $0x214] sm:$0xf] }
 0x32e   :  { %5935 = vmatpush.bf16.msra.mxu3 %v9052_v55  ;;  %5995 = vmatpush.bf16.msra.mxu0 %v8904_v2  ;;  %v9173_v55 = vld [vmem:[#allocation11 + $0x278] sm:$0xf0] }
 0x32f   :  { %v9176_v2 = vor.u32 %v10151_v56, %v9173_v55 }
 0x330   :  { %5961 = vmatpush.bf16.msrb.mxu1 %v9180_v37  ;;  %5968 = vmatpush.bf16.msrb.mxu2 %v9292_v4  ;;  %v8944_v37 = vor.u32 %v10093_v20, %v8941_v5  ;;  %v8864_v4 = vor.u32 %v10073_v11, %v8861_v62  ;;  %v10113_v11 = vld [vmem:[#allocation11 + $0x144] sm:$0xf]  ;;  %v9021_v62 = vld [vmem:[#allocation11 + $0x148] sm:$0xf0] }
 0x331   :  { %5936 = vmatmul.bf16.vlgmr.msra.gmra.mxu3 %v10807_v0  ;;  %v9024_v21 = vor.u32 %v10113_v11, %v9021_v62 }
 0x332   :  { %5996 = vmatpush.bf16.msra.mxu0 %v8896_v26  ;;  %v9244_v26 = vor.u32 %v10170_v25, %v9243_v19  ;;  %v10143_v19 = vld [vmem:[#allocation11 + $0x234] sm:$0xf] }
 0x333   :  { %5962 = vmatmul.bf16.vlgmr.msrb.gmra.mxu1 %v10809_v24 }
 0x334   :  { %6006 = vmatpush.bf16.msra.mxu1 %v8984_v23  ;;  %5969 = vmatpush.bf16.msrb.mxu2 %v9284_v28  ;;  %v10091_v23 = vld [vmem:[#allocation11 + $0x94] sm:$0xf]  ;;  %v4928_v28 = vpop.f32.mrf.mxu2 }
 0x335   :  { %v8936_v34 = vor.u32 %v10091_v23, %v8933_v22  ;;  %v9141_v23 = vld [vmem:[#allocation11 + $0x238] sm:$0xf0]  ;;  %v10194_v22 = vld [vmem:[#allocation11 + $0x3c4] sm:$0xf0] }
 0x336   :  { %5997 = vmatpush.bf16.msra.mxu0 %v8888_v44  ;;  %v10117_v44 = vld [vmem:[#allocation11 + $0x164] sm:$0xf]  ;;  %v9144_v28 = vor.u32 %v10143_v19, %v9141_v23  ;;  %v10186_v23 = vld [vmem:[#allocation11 + $0x384] sm:$0xf0] }
 0x337   :  { %v9040_v53 = vor.u32 %v10117_v44, %v9037_v40 }
 0x338   :  { %6007 = vmatpush.bf16.msra.mxu1 %v8976_v3  ;;  %5970 = vmatpush.bf16.msrb.mxu2 %v9276_v32  ;;  %v4967_v3 = vpop.f32.mrf.mxu1  ;;  %v9364_v32 = vor.u32 %v10200_v30, %v9363_v29  ;;  %v9213_v30 = vld [vmem:[#allocation11 + $0x2c8] sm:$0xf0] }
 0x339   :  { %v10111_v3 = vld [vmem:[#allocation11 + $0x134] sm:$0xf] }
 0x33a   :  { %5998 = vmatpush.bf16.msra.mxu0 %v8880_v33  ;;  %5980 = vmatpush.bf16.msrb.mxu3 %v9364_v32  ;;  %v4941_v33 = vpop.f32.mrf.mxu3  ;;  %v9005_v32 = vld [vmem:[#allocation11 + $0x128] sm:$0xf0] }
 0x33c   :  { %6008 = vmatpush.bf16.msra.mxu1 %v8968_v43  ;;  %5971 = vmatpush.bf16.msrb.mxu2 %v9268_v13  ;;  %v9168_v43 = vor.u32 %v10149_v17, %v9165_v7  ;;  %v10198_v13 = vld [vmem:[#allocation11 + $0x3e4] sm:$0xf0]  ;;  %v10827_v17 = vpop.f32.mrf.mxu0 }
 0x33d   :  { %v9356_v47 = vor.u32 %v10198_v13, %v9355_v52  ;;  %v9323_v52 = vld [vmem:[#allocation11 + $0x3a0] sm:$0xf]  ;;  %v10190_v13 = vld [vmem:[#allocation11 + $0x3a4] sm:$0xf0] }
 0x33e   :  { %5999 = vmatpush.bf16.msra.mxu0 %v8872_v8  ;;  %v10145_v8 = vld [vmem:[#allocation11 + $0x244] sm:$0xf] }
 0x33f   :  { %5981 = vmatpush.bf16.msrb.mxu3 %v9356_v47 }
 0x340   :  { %6009 = vmatpush.bf16.msra.mxu1 %v8960_v58  ;;  %5972 = vmatpush.bf16.msrb.mxu2 %v9260_v59  ;;  %v1697_v58 = vperm.slane %v10779_v1, 6  ;;  %v9029_v59 = vld [vmem:[#allocation11 + $0x158] sm:$0xf0] }
 0x341   :  { %v9032_v5 = vor.u32 %v10115_v54, %v9029_v59  ;;  %v10107_v54 = vld [vmem:[#allocation11 + $0x114] sm:$0xf]  ;;  %v8997_v59 = vld [vmem:[#allocation11 + $0x118] sm:$0xf0] }
 0x342   :  { %6000 = vmatpush.bf16.msra.mxu0 %v8864_v4  ;;  %v4901_v20 = vadd.f32 %v10787_v49, %v1697_v58  ;;  %v9221_v4 = vld [vmem:[#allocation11 + $0x2d8] sm:$0xf0]  ;;  %v9324_v58 = vor.u32 %v10190_v13, %v9323_v52  ;;  %v4978_v33 = vpop.f32.mrf.mxu2 }
 0x344   :  { %6010 = vmatpush.bf16.msra.mxu1 %v8952_v50  ;;  %5973 = vmatpush.bf16.msrb.mxu2 %v9252_v14  ;;  %v9229_v50 = vld [vmem:[#allocation11 + $0x2e8] sm:$0xf0]  ;;  %v9152_v14 = vor.u32 %v10145_v8, %v9149_v10  ;;  %v4914_v25 = vadd.f32 %v10795_v16, %v4901_v20  ;;  %v10161_v16 = vld [vmem:[#allocation11 + $0x2c4] sm:$0xf]  ;;  %v5006_v47 = vpop.f32.mrf.mxu0 }
 0x345   :  { %6001 = vmatmul.bf16.vlgmr.msra.gmra.mxu0 %v10774_v60  ;;  %v9347_v60 = vld [vmem:[#allocation11 + $0x3d0] sm:$0xf]  ;;  %v9232_v55 = vor.u32 %v10165_v61, %v9229_v50  ;;  %v9216_v44 = vor.u32 %v10161_v16, %v9213_v30  ;;  %v10157_v61 = vld [vmem:[#allocation11 + $0x2a4] sm:$0xf]  ;;  %v9197_v50 = vld [vmem:[#allocation11 + $0x2a8] sm:$0xf0] }
 0x346   :  { %6045 = vmatpush.bf16.msrb.mxu0 %v9176_v2  ;;  %v9348_v56 = vor.u32 %v10196_v41, %v9347_v60  ;;  %v9339_v2 = vld [vmem:[#allocation11 + $0x3c0] sm:$0xf]  ;;  %v4927_v31 = vadd.f32 %v10815_v57, %v4914_v25  ;;  %v10137_v8 = vld [vmem:[#allocation11 + $0x204] sm:$0xf]  ;;  %v9117_v10 = vld [vmem:[#allocation11 + $0x208] sm:$0xf0] }
 0x347   :  { %v9340_v49 = vor.u32 %v10194_v22, %v9339_v2  ;;  %v9315_v60 = vld [vmem:[#allocation11 + $0x390] sm:$0xf]  ;;  %v10188_v41 = vld [vmem:[#allocation11 + $0x394] sm:$0xf0]  ;;  %v9307_v25 = vld [vmem:[#allocation11 + $0x380] sm:$0xf] }
 0x348   :  { %6011 = vmatpush.bf16.msra.mxu1 %v8944_v37  ;;  %5974 = vmatpush.bf16.msrb.mxu2 %v9244_v26  ;;  %v10163_v37 = vld [vmem:[#allocation11 + $0x2d4] sm:$0xf]  ;;  %v9013_v26 = vld [vmem:[#allocation11 + $0x138] sm:$0xf0]  ;;  %v4940_v29 = vadd.f32 %v10819_v15, %v4927_v31  ;;  %v9316_v11 = vor.u32 %v10188_v41, %v9315_v60  ;;  %v4991_v62 = vpop.f32.mrf.mxu3  ;;  %v9261_v60 = vld [vmem:[#allocation11 + $0x328] sm:$0xf0] }
 0x349   :  { %5982 = vmatpush.bf16.msrb.mxu3 %v9348_v56  ;;  %v9224_v7 = vor.u32 %v10163_v37, %v9221_v4  ;;  %v9016_v57 = vor.u32 %v10111_v3, %v9013_v26  ;;  %v9200_v56 = vor.u32 %v10157_v61, %v9197_v50  ;;  %v8989_v37 = vld [vmem:[#allocation11 + $0x108] sm:$0xf0]  ;;  %v10155_v4 = vld [vmem:[#allocation11 + $0x294] sm:$0xf]  ;;  %v9301_v22 = vld [vmem:[#allocation11 + $0x378] sm:$0xf0] }
 0x34a   :  { %6046 = vmatpush.bf16.msrb.mxu0 %v9168_v43  ;;  %v4953_v15 = vadd.f32 %v10813_v18, %v4940_v29  ;;  %v10183_v2 = vld [vmem:[#allocation11 + $0x374] sm:$0xf]  ;;  %v9109_v3 = vld [vmem:[#allocation11 + $0x1f8] sm:$0xf0]  ;;  %v10125_v41 = vld [vmem:[#allocation11 + $0x1a4] sm:$0xf] }
 0x34b   :  { %v10127_v61 = vld [vmem:[#allocation11 + $0x1b4] sm:$0xf] }
 0x34c   :  { %6012 = vmatpush.bf16.msra.mxu1 %v8936_v34  ;;  %6019 = vmatpush.bf16.msra.mxu2 %v9048_v35  ;;  %v10141_v34 = vld [vmem:[#allocation11 + $0x224] sm:$0xf]  ;;  %v9133_v35 = vld [vmem:[#allocation11 + $0x228] sm:$0xf0]  ;;  %v4966_v18 = vadd.f32 %v10817_v6, %v4953_v15  ;;  %v9189_v6 = vld [vmem:[#allocation11 + $0x298] sm:$0xf0] }
 0x34d   :  { %5983 = vmatpush.bf16.msrb.mxu3 %v9340_v49  ;;  %v9136_v40 = vor.u32 %v10141_v34, %v9133_v35  ;;  %v9308_v49 = vor.u32 %v10186_v23, %v9307_v25  ;;  %v9192_v16 = vor.u32 %v10155_v4, %v9189_v6  ;;  %v9304_v34 = vor.u32 %v10183_v2, %v9301_v22  ;;  %v10153_v35 = vld [vmem:[#allocation11 + $0x284] sm:$0xf]  ;;  %v10179_v15 = vld [vmem:[#allocation11 + $0x354] sm:$0xf]  ;;  %v9061_v4 = vld [vmem:[#allocation11 + $0x198] sm:$0xf0] }
 0x34e   :  { %6047 = vmatpush.bf16.msrb.mxu0 %v9160_v39  ;;  %v9128_v39 = vor.u32 %v10139_v46, %v9125_v9  ;;  %v4979_v20 = vadd.f32 %v4978_v33, %v4966_v18  ;;  %v9285_v9 = vld [vmem:[#allocation11 + $0x358] sm:$0xf0]  ;;  %v10129_v33 = vld [vmem:[#allocation11 + $0x1c4] sm:$0xf]  ;;  %v9245_v2 = vld [vmem:[#allocation11 + $0x308] sm:$0xf0] }
 0x34f   :  { %v9288_v13 = vor.u32 %v10179_v15, %v9285_v9  ;;  %v9077_v18 = vld [vmem:[#allocation11 + $0x1b8] sm:$0xf0]  ;;  %v10169_v23 = vld [vmem:[#allocation11 + $0x304] sm:$0xf] }
 0x350   :  { %6013 = vmatpush.bf16.msra.mxu1 %v8928_v51  ;;  %6020 = vmatpush.bf16.msra.mxu2 %v9040_v53  ;;  %v10831_v51 = vpop.f32.mrf.mxu1  ;;  %v9008_v53 = vor.u32 %v10109_v38, %v9005_v32  ;;  %v4992_v19 = vadd.f32 %v4991_v62, %v4979_v20  ;;  %v10133_v38 = vld [vmem:[#allocation11 + $0x1e4] sm:$0xf]  ;;  %v9101_v32 = vld [vmem:[#allocation11 + $0x1e8] sm:$0xf0]  ;;  %v9080_v50 = vor.u32 %v10127_v61, %v9077_v18 }
 0x351   :  { %v9069_v20 = vld [vmem:[#allocation11 + $0x1a8] sm:$0xf0]  ;;  %v10121_v22 = vld [vmem:[#allocation11 + $0x184] sm:$0xf] }
 0x352   :  { %6048 = vmatpush.bf16.msrb.mxu0 %v9152_v14  ;;  %v10105_v14 = vld [vmem:[#allocation11 + $0x104] sm:$0xf]  ;;  %v5105_v31 = vmax.f32 %v4992_v19, 0.0 }
 0x353   :  { %6014 = vmatmul.bf16.vlgmr.msra.gmra.mxu1 %v10782_v27  ;;  %v9331_v27 = vld [vmem:[#allocation11 + $0x3b0] sm:$0xf]  ;;  %v8992_v26 = vor.u32 %v10105_v14, %v8989_v37  ;;  %v9253_v14 = vld [vmem:[#allocation11 + $0x318] sm:$0xf0]  ;;  %v10123_v37 = vld [vmem:[#allocation11 + $0x194] sm:$0xf] }
 0x354   :  { %6058 = vmatpush.bf16.msrb.mxu1 %v9240_v48  ;;  %6021 = vmatpush.bf16.msra.mxu2 %v9032_v5  ;;  %v9332_v43 = vor.u32 %v10192_v36, %v9331_v27  ;;  %v9208_v48 = vor.u32 %v10159_v45, %v9205_v42  ;;  %v9000_v5 = vor.u32 %v10107_v54, %v8997_v59  ;;  %v9181_v27 = vld [vmem:[#allocation11 + $0x288] sm:$0xf0]  ;;  %v10181_v36 = vld [vmem:[#allocation11 + $0x364] sm:$0xf]  ;;  %v10131_v45 = vld [vmem:[#allocation11 + $0x1d4] sm:$0xf] }
 0x355   :  { %v10834_v30 = vpack.c.bf16 %v5105_v31, %v5105_v31  ;;  %v9093_v42 = vld [vmem:[#allocation11 + $0x1d8] sm:$0xf0]  ;;  %v10175_v54 = vld [vmem:[#allocation11 + $0x334] sm:$0xf]  ;;  %v9064_v19 = vor.u32 %v10123_v37, %v9061_v4  ;;  %v10185_v4 = vld [vmem:[#allocation11 + $0x384] sm:$0xf] }
 0x356   :  { %6049 = vmatpush.bf16.msrb.mxu0 %v9144_v28  ;;  %5984 = vmatpush.bf16.msrb.mxu3 %v9332_v43  ;;  %v10135_v28 = vld [vmem:[#allocation11 + $0x1f4] sm:$0xf]  ;;  %v4993_v43 = vpop.f32.mrf.mxu3  ;;  %v9096_v52 = vor.u32 %v10131_v45, %v9093_v42  ;;  %v9269_v59 = vld [vmem:[#allocation11 + $0x338] sm:$0xf0] }
 0x357   :  { %v9112_v29 = vor.u32 %v10135_v28, %v9109_v3  ;;  %5975 = vmatmul.bf16.vlgmr.msrb.gmra.mxu2 %v10834_v30  ;;  %v1698_v28 = vperm.slane %v10779_v1, 7 }
 0x358   :  { %6059 = vmatpush.bf16.msrb.mxu1 %v9232_v55  ;;  %6022 = vmatpush.bf16.msra.mxu2 %v9024_v21  ;;  %v9120_v55 = vor.u32 %v10137_v8, %v9117_v10  ;;  %v4980_v21 = vpop.f32.mrf.mxu2  ;;  %v9272_v8 = vor.u32 %v10175_v54, %v9269_v59  ;;  %v10173_v10 = vld [vmem:[#allocation11 + $0x324] sm:$0xf]  ;;  %v9341_v59 = vld [vmem:[#allocation11 + $0x3c8] sm:$0xf0] }
 0x359   :  { %v10193_v54 = vld [vmem:[#allocation11 + $0x3c4] sm:$0xf] }
 0x35a   :  { %6050 = vmatpush.bf16.msrb.mxu0 %v9136_v40  ;;  %5985 = vmatpush.bf16.msrb.mxu3 %v9324_v58  ;;  %v9104_v40 = vor.u32 %v10133_v38, %v9101_v32  ;;  %v10177_v58 = vld [vmem:[#allocation11 + $0x344] sm:$0xf]  ;;  %v9344_v18 = vor.u32 %v10193_v54, %v9341_v59 }
 0x35b   :  { %v10209_v54 = vld [vmem:[#allocation14 + $0x40] sm:$0xff] }
 0x35c   :  { %6060 = vmatpush.bf16.msrb.mxu1 %v9224_v7  ;;  %6023 = vmatpush.bf16.msra.mxu2 %v9016_v57  ;;  %v5019_v7 = vpop.f32.mrf.mxu1  ;;  %v9293_v57 = vld [vmem:[#allocation11 + $0x368] sm:$0xf0] }
 0x35d   :  { %v9296_v46 = vor.u32 %v10181_v36, %v9293_v57  ;;  %v9248_v7 = vor.u32 %v10169_v23, %v9245_v2 }
 0x35e   :  { %6051 = vmatpush.bf16.msrb.mxu0 %v9128_v39  ;;  %5986 = vmatpush.bf16.msrb.mxu3 %v9316_v11 }
 0x360   :  { %6061 = vmatpush.bf16.msrb.mxu1 %v9216_v44  ;;  %6024 = vmatpush.bf16.msra.mxu2 %v9008_v53  ;;  %v9184_v44 = vor.u32 %v10153_v35, %v9181_v27  ;;  %v9085_v53 = vld [vmem:[#allocation11 + $0x1c8] sm:$0xf0] }
 0x361   :  { %v9088_v47 = vor.u32 %v10129_v33, %v9085_v53 }
 0x362   :  { %6052 = vmatpush.bf16.msrb.mxu0 %v9120_v55  ;;  %5987 = vmatpush.bf16.msrb.mxu3 %v9308_v49  ;;  %v10171_v55 = vld [vmem:[#allocation11 + $0x314] sm:$0xf] }
 0x363   :  { %v9256_v25 = vor.u32 %v10171_v55, %v9253_v14  ;;  %v9317_v55 = vld [vmem:[#allocation11 + $0x398] sm:$0xf0] }
 0x364   :  { %6062 = vmatpush.bf16.msrb.mxu1 %v9208_v48  ;;  %6025 = vmatpush.bf16.msra.mxu2 %v9000_v5  ;;  %v5056_v48 = vpop.f32.mrf.mxu0 }
 0x365   :  { %6053 = vmatmul.bf16.vlgmr.msrb.gmra.mxu0 %v10800_v63  ;;  %v9277_v63 = vld [vmem:[#allocation11 + $0x348] sm:$0xf0] }
 0x366   :  { %6032 = vmatpush.bf16.msra.mxu3 %v9112_v29  ;;  %v9280_v39 = vor.u32 %v10177_v58, %v9277_v63  ;;  %v10197_v58 = vld [vmem:[#allocation11 + $0x3e4] sm:$0xf]  ;;  %v9357_v63 = vld [vmem:[#allocation11 + $0x3e8] sm:$0xf0] }
 0x367   :  { %v9360_v53 = vor.u32 %v10197_v58, %v9357_v63  ;;  %v10212_v58 = vld [vmem:[#allocation14 + $0x58] sm:$0xff]  ;;  %v10211_v63 = vld [vmem:[#allocation14 + $0x50] sm:$0xff] }
 0x368   :  { %6063 = vmatpush.bf16.msrb.mxu1 %v9200_v56  ;;  %6026 = vmatpush.bf16.msra.mxu2 %v8992_v26  ;;  %v9264_v56 = vor.u32 %v10173_v10, %v9261_v60  ;;  %v5005_v26 = vadd.f32 %v10827_v17, %v1698_v28  ;;  %v10199_v17 = vld [vmem:[#allocation11 + $0x3f4] sm:$0xf]  ;;  %v10189_v60 = vld [vmem:[#allocation11 + $0x3a4] sm:$0xf] }
 0x36a   :  { %6033 = vmatpush.bf16.msra.mxu3 %v9104_v40  ;;  %v5030_v5 = vpop.f32.mrf.mxu2 }
 0x36b   :  { %6027 = vmatmul.bf16.vlgmr.msra.gmra.mxu2 %v10802_v12  ;;  %v9053_v12 = vld [vmem:[#allocation11 + $0x188] sm:$0xf0] }
 0x36c   :  { %6064 = vmatpush.bf16.msrb.mxu1 %v9192_v16  ;;  %6071 = vmatpush.bf16.msrb.mxu2 %v9304_v34  ;;  %v5058_v62 = vpop.f32.mrf.mxu0  ;;  %v9056_v21 = vor.u32 %v10121_v22, %v9053_v12  ;;  %v5018_v16 = vadd.f32 %v10831_v51, %v5005_v26  ;;  %v10844_v34 = vld [vmem:[#allocation13] sm:$0x3] }
 0x36d   :  { %v5245_v36 = vperm.slane %v10844_v34, 0 }
 0x36e   :  { %6034 = vmatpush.bf16.msra.mxu3 %v9096_v52  ;;  %v5031_v29 = vadd.f32 %v5030_v5, %v5018_v16 }
 0x370   :  { %6065 = vmatpush.bf16.msrb.mxu1 %v9184_v44  ;;  %6072 = vmatpush.bf16.msrb.mxu2 %v9296_v46  ;;  %v5069_v11 = vpop.f32.mrf.mxu1  ;;  %v9365_v46 = vld [vmem:[#allocation11 + $0x3f8] sm:$0xf0] }
 0x371   :  { %v9368_v52 = vor.u32 %v10199_v17, %v9365_v46  ;;  %v10201_v17 = vld [vmem:[#allocation14] sm:$0xff] }
 0x372   :  { %6035 = vmatpush.bf16.msra.mxu3 %v9088_v47  ;;  %v5032_v49 = vpop.f32.mrf.mxu2  ;;  %v10195_v47 = vld [vmem:[#allocation11 + $0x3d4] sm:$0xf] }
 0x373   :  { %6066 = vmatmul.bf16.vlgmr.msrb.gmra.mxu1 %v10809_v24  ;;  %v9072_v24 = vor.u32 %v10125_v41, %v9069_v20  ;;  %v9325_v41 = vld [vmem:[#allocation11 + $0x3a8] sm:$0xf0] }
 0x374   :  { %6073 = vmatpush.bf16.msrb.mxu2 %v9288_v13  ;;  %v5043_v6 = vpop.f32.mrf.mxu3  ;;  %v9328_v5 = vor.u32 %v10189_v60, %v9325_v41 }
 0x375   :  { %v5044_v27 = vadd.f32 %v5043_v6, %v5031_v29 }
 0x376   :  { %6036 = vmatpush.bf16.msra.mxu3 %v9080_v50  ;;  %v10191_v50 = vld [vmem:[#allocation11 + $0x3b4] sm:$0xf] }
 0x377   :  { %v5057_v57 = vadd.f32 %v5056_v48, %v5044_v27  ;;  %v9349_v48 = vld [vmem:[#allocation11 + $0x3d8] sm:$0xf0] }
 0x378   :  { %6074 = vmatpush.bf16.msrb.mxu2 %v9280_v39  ;;  %v5071_v31 = vpop.f32.mrf.mxu1  ;;  %v9352_v39 = vor.u32 %v10195_v47, %v9349_v48 }
 0x379   :  { %v5070_v40 = vadd.f32 %v5069_v11, %v5057_v57  ;;  %v5246_v31 = vperm.slane %v10844_v34, 1  ;;  %v10207_v57 = vld [vmem:[#allocation14 + $0x30] sm:$0xff]  ;;  %v10204_v34 = vld [vmem:[#allocation14 + $0x18] sm:$0xff] }
 0x37a   :  { %6037 = vmatpush.bf16.msra.mxu3 %v9072_v24 }
 0x37c   :  { %6075 = vmatpush.bf16.msrb.mxu2 %v9272_v8  ;;  %v5045_v3 = vpop.f32.mrf.mxu3  ;;  %v9333_v8 = vld [vmem:[#allocation11 + $0x3b8] sm:$0xf0] }
 0x37d   :  { %v9336_v10 = vor.u32 %v10191_v50, %v9333_v8 }
 0x37e   :  { %6038 = vmatpush.bf16.msra.mxu3 %v9064_v19  ;;  %v9309_v19 = vld [vmem:[#allocation11 + $0x388] sm:$0xf0] }
 0x37f   :  { %v9312_v22 = vor.u32 %v10185_v4, %v9309_v19 }
 0x380   :  { %6076 = vmatpush.bf16.msrb.mxu2 %v9264_v56  ;;  %v10187_v56 = vld [vmem:[#allocation11 + $0x394] sm:$0xf] }
 0x381   :  { %v9320_v14 = vor.u32 %v10187_v56, %v9317_v55 }
 0x382   :  { %6039 = vmatpush.bf16.msra.mxu3 %v9056_v21  ;;  %v5898_v35 = vpop.f32.mrf.mxu0 }
 0x383   :  { %v5899_v38 = vadd.f32 %v5898_v35, %v5245_v36  ;;  %v10208_v35 = vld [vmem:[#allocation14 + $0x38] sm:$0xff] }
 0x384   :  { %6077 = vmatpush.bf16.msrb.mxu2 %v9256_v25  ;;  %6233 = vmatpush.bf16.msra.mxu0 %v10208_v35 }
 0x388   :  { %6078 = vmatpush.bf16.msrb.mxu2 %v9248_v7  ;;  %6234 = vmatpush.bf16.msra.mxu0 %v10207_v57 }
 0x38a   :  { %v5900_v44 = vpop.f32.mrf.mxu0 }
 0x38b   :  { %6079 = vmatmul.bf16.vlgmr.msrb.gmra.mxu2 %v10834_v30 }
 0x38e   :  { %v5082_v32 = vpop.f32.mrf.mxu2 }
 0x38f   :  { %v5083_v45 = vadd.f32 %v5082_v32, %v5070_v40  ;;  %v10206_v32 = vld [vmem:[#allocation14 + $0x28] sm:$0xff] }
 0x390   :  { %v5911_v43 = vpop.f32.mrf.mxu1  ;;  %6235 = vmatpush.bf16.msra.mxu0 %v10206_v32 }
 0x391   :  { %v5912_v1 = vadd.f32 %v5911_v43, %v5899_v38 }
 0x394   :  { %v5095_v30 = vpop.f32.mrf.mxu3 }
 0x395   :  { %v5096_v42 = vadd.f32 %v5095_v30, %v5083_v45  ;;  %v10203_v45 = vld [vmem:[#allocation14 + $0x10] sm:$0xff] }
 0x396   :  { %v5084_v15 = vpop.f32.mrf.mxu2 }
 0x397   :  { %v5106_v51 = vmax.f32 %v5096_v42, 0.0  ;;  %v10202_v42 = vld [vmem:[#allocation14 + $0x8] sm:$0xff]  ;;  %v10215_v15 = vld [vmem:[#allocation14 + $0x70] sm:$0xff] }
 0x398   :  { %v5913_v9 = vpop.f32.mrf.mxu1 }
 0x399   :  { %v5114_v13 = vpack.c.bf16 %v5106_v51, %v5106_v51  ;;  %v10216_v51 = vld [vmem:[#allocation14 + $0x78] sm:$0xff] }
 0x39a   :  { %6246 = vmatpush.bf16.msra.mxu1 %v10216_v51 }
 0x39b   :  { %5988 = vmatmul.bf16.vlgmr.msrb.gmra.mxu3 %v5114_v13 }
 0x39c   :  { %v5097_v33 = vpop.f32.mrf.mxu3  ;;  %6084 = vmatpush.bf16.msrb.mxu3 %v9368_v52  ;;  %v10214_v52 = vld [vmem:[#allocation14 + $0x68] sm:$0xff] }
 0x39e   :  { %6247 = vmatpush.bf16.msra.mxu1 %v10215_v15 }
 0x3a0   :  { %6085 = vmatpush.bf16.msrb.mxu3 %v9360_v53  ;;  %v10210_v53 = vld [vmem:[#allocation14 + $0x48] sm:$0xff] }
 0x3a2   :  { %v5950_v61 = vpop.f32.mrf.mxu0  ;;  %6248 = vmatpush.bf16.msra.mxu1 %v10214_v52 }
 0x3a4   :  { %6086 = vmatpush.bf16.msrb.mxu3 %v9352_v39 }
 0x3a8   :  { %6087 = vmatpush.bf16.msrb.mxu3 %v9344_v18 }
 0x3aa   :  { %v5952_v62 = vpop.f32.mrf.mxu0 }
 0x3ab   :  { %6040 = vmatmul.bf16.vlgmr.msra.gmra.mxu3 %v10807_v0 }
 0x3ac   :  { %6088 = vmatpush.bf16.msrb.mxu3 %v9336_v10 }
 0x3ae   :  { %v5924_v20 = vpop.f32.mrf.mxu2 }
 0x3af   :  { %v5925_v11 = vadd.f32 %v5924_v20, %v5912_v1  ;;  %v10205_v1 = vld [vmem:[#allocation14 + $0x20] sm:$0xff] }
 0x3b0   :  { %v5963_v24 = vpop.f32.mrf.mxu1  ;;  %6089 = vmatpush.bf16.msrb.mxu3 %v9328_v5  ;;  %6236 = vmatpush.bf16.msra.mxu0 %v10205_v1 }
 0x3b4   :  { %v5937_v37 = vpop.f32.mrf.mxu3  ;;  %6090 = vmatpush.bf16.msrb.mxu3 %v9320_v14  ;;  %6237 = vmatpush.bf16.msra.mxu0 %v10204_v34  ;;  %v6259_v14 = vlaneseq }
 0x3b5   :  { %v5938_v6 = vadd.f32 %v5937_v37, %v5925_v11  ;;  %v10233_v37 = vld [vmem:[#allocation16] ss:$0 sm:$0xff] }
 0x3b6   :  { %v5926_v23 = vpop.f32.mrf.mxu2  ;;  %v6260_v4 = vand.u32 127, %v6259_v14 }
 0x3b7   :  { %v5951_v25 = vadd.f32 %v5950_v61, %v5938_v6 }
 0x3b8   :  { %v5965_v2 = vpop.f32.mrf.mxu1  ;;  %6091 = vmatpush.bf16.msrb.mxu3 %v9312_v22  ;;  %6238 = vmatpush.bf16.msra.mxu0 %v10203_v45  ;;  %vm6272_vm0 = vcmp.eq.s32.totalorder %v6260_v4, 5  ;;  %vm6261_vm1 = vcmp.lt.s32.totalorder %v6260_v4, 5 }
 0x3b9   :  { %v5964_v0 = vadd.f32 %v5963_v24, %v5951_v25 }
 0x3bb   :  { %6092 = vmatmul.bf16.vlgmr.msrb.gmra.mxu3 %v5114_v13  ;;  %v10213_v13 = vld [vmem:[#allocation14 + $0x60] sm:$0xff] }
 0x3bc   :  { %v5939_v12 = vpop.f32.mrf.mxu3  ;;  %6239 = vmatpush.bf16.msra.mxu0 %v10202_v42  ;;  %6249 = vmatpush.bf16.msra.mxu1 %v10213_v13 }
 0x3c0   :  { %6240 = vmatpush.bf16.msra.mxu0 %v10201_v17  ;;  %6250 = vmatpush.bf16.msra.mxu1 %v10212_v58 }
 0x3c2   :  { %v6002_v49 = vpop.f32.mrf.mxu0 }
 0x3c3   :  { %v6003_v21 = vadd.f32 %v6002_v49, %v5246_v31 }
 0x3c4   :  { %6251 = vmatpush.bf16.msra.mxu1 %v10211_v63 }
 0x3c8   :  { %6252 = vmatpush.bf16.msra.mxu1 %v10210_v53 }
 0x3ca   :  { %v6004_v28 = vpop.f32.mrf.mxu0 }
 0x3cc   :  { %6253 = vmatpush.bf16.msra.mxu1 %v10209_v54 }
 0x3d0   :  { %v6015_v7 = vpop.f32.mrf.mxu1 }
 0x3d1   :  { %v6016_v3 = vadd.f32 %v6015_v7, %v6003_v21 }
 0x3d8   :  { %v6017_v26 = vpop.f32.mrf.mxu1 }
 0x3da   :  { %v5976_v29 = vpop.f32.mrf.mxu2 }
 0x3db   :  { %v5977_v33 = vadd.f32 %v5976_v29, %v5964_v0 }
 0x3e2   :  { %v6054_v16 = vpop.f32.mrf.mxu0  ;;  %v5978_v38 = vpop.f32.mrf.mxu2 }
 0x3ea   :  { %v6056_v36 = vpop.f32.mrf.mxu0 }
 0x3ee   :  { %v6028_v44 = vpop.f32.mrf.mxu2 }
 0x3ef   :  { %v6029_v40 = vadd.f32 %v6028_v44, %v6016_v3 }
 0x3f0   :  { %v6067_v27 = vpop.f32.mrf.mxu1 }
 0x3f6   :  { %v6030_v30 = vpop.f32.mrf.mxu2 }
 0x3f8   :  { %v6069_v43 = vpop.f32.mrf.mxu1 }
 0x40e   :  { %v6080_v46 = vpop.f32.mrf.mxu2 }
 0x416   :  { %v6082_v9 = vpop.f32.mrf.mxu2 }
 0x41e   :  { %v5989_v47 = vpop.f32.mrf.mxu3 }
 0x41f   :  { %v5990_v48 = vadd.f32 %v5989_v47, %v5977_v33 }
 0x421   :  { %v6097_v39 = vmax.f32 %v5990_v48, 0.0 }
 0x423   :  { %v6099_v59 = vpack.c.bf16 %v6097_v39, %v6097_v39 }
 0x425   :  { %6241 = vmatmul.bf16.vlgmr.msra.gmra.mxu0 %v6099_v59 }
 0x426   :  { %v5991_v61 = vpop.f32.mrf.mxu3 }
 0x42e   :  { %v6041_v18 = vpop.f32.mrf.mxu3 }
 0x42f   :  { %v6042_v50 = vadd.f32 %v6041_v18, %v6029_v40 }
 0x431   :  { %v6055_v8 = vadd.f32 %v6054_v16, %v6042_v50 }
 0x433   :  { %v6068_v60 = vadd.f32 %v6067_v27, %v6055_v8 }
 0x435   :  { %v6081_v41 = vadd.f32 %v6080_v46, %v6068_v60 }
 0x436   :  { %v6043_v10 = vpop.f32.mrf.mxu3 }
 0x43e   :  { %v6093_v20 = vpop.f32.mrf.mxu3 }
 0x43f   :  { %v6094_v24 = vadd.f32 %v6093_v20, %v6081_v41 }
 0x441   :  { %v6098_v5 = vmax.f32 %v6094_v24, 0.0 }
 0x443   :  { %v6100_v11 = vpack.c.bf16 %v6098_v5, %v6098_v5 }
 0x445   :  { %6254 = vmatmul.bf16.vlgmr.msra.gmra.mxu1 %v6100_v11 }
 0x446   :  { %v6095_v62 = vpop.f32.mrf.mxu3 }
 0x4a2   :  { %v6242_v56 = vpop.f32.mrf.mxu0 }
 0x4a3   :  { %v6243_v19 = vadd.f32 %v10233_v37, %v6242_v56 }
 0x4aa   :  { %v6244_v55 = vpop.f32.mrf.mxu0 }
 0x4c2   :  { %v6255_v6 = vpop.f32.mrf.mxu1 }
 0x4c3   :  { %v6256_v25 = vadd.f32 %v6255_v6, %v6243_v19 }
 0x4c5   :  { %v6273_v23 = vsel %vm6272_vm0, %v6256_v25, 0.0  ;;  %v6262_v2 = vsel %vm6261_vm1, %v6256_v25, -1e+30 }
 0x4c6   :  { %6263 = vmax.xlane.f32.xlu0 %v6262_v2 }
 0x4ca   :  { %v6257_v22 = vpop.f32.mrf.mxu1 }
 0x539   :  { %v6264_v0 = vpop.xlane.xlu0 %6263 }
 0x53a   :  { %v6265_v12 = vsub.f32 %v6262_v2, %v6264_v0 }
 0x53c   :  { %v6266_v49 = vmul.f32 1.442695, %v6265_v12 }
 0x53e   :  { %10234 = vpow2.f32 %v6266_v49 }
 0x544   :  { %v10235_v31 = vpop.eup %10234 }
 0x545   :  { %6268 = vadd.xlane.f32.xlu0 %v10235_v31 }
 0x5b8   :  { %v6269_v21 = vpop.xlane.xlu0 %6268 }
 0x5b9   :  { %10236 = vrcp.f32 %v6269_v21 }
 0x5bf   :  { %v10237_v7 = vpop.eup %10236 }
 0x5c0   :  { %v6271_v28 = vmul.f32 %v10237_v7, %v10235_v31 }
 0x5c2   :  { %v6274_v3 = vsel %vm6261_vm1, %v6271_v28, %v6273_v23 }
 0x5c3   :  { %6275 = vst [vmem:[#allocation17] sm:$0xff] %v6274_v3 }
 0x5c4   :  { %6286 = dma.vmem_to_hbm [thread:$0]  %s6282_s8, 128, %s6284_s11, [#allocation4]  }
 0x5c5   :  { %10491 = dma.done.wait [#allocation4], 128  }
 0x5c6   :  { %10492 = vsyncadd [#allocation4], 4294967168 }
 0x5c7   :  { %6291 = vsyncpa [#allocation3], 1 }
 0x5c8   :  { %6292 = vsyncpa [#allocation6], 1 }
 0x5c9   :  { %6293 = vsyncpa [#allocation9], 1 }
 0x5ca   :  { %6294 = vsyncpa [#allocation12], 1 }
 0x5cb   :  { %6295 = vsyncpa [#allocation15], 1 }
 0x5cc   :  { %6296 = vsyncpa [#allocation4], 1 }

</bundles_post_ra>
